<compile_context>
chip_gen: v7x
topology: tpu7x:2x2x1
jax: 0.10.0
libtpu: 0.0.40
codegen_flags: <defaults>
</compile_context>

<pallas_src>
import functools

import numpy as np
import jax
import jax.numpy as jnp
from jax.experimental import pallas as pl
from jax.experimental.pallas import tpu as pltpu


# ----------------------------------------------------------------------------
# Fused kernel: one batch element per grid step.
# ----------------------------------------------------------------------------
def _fused_forward_kernel(p1_ref, w1_ref, b1_ref, w2_ref, b2_ref, wl_ref, bl_ref,
                          out_ref, y1p_ref, patch_ref):
    f32 = jnp.float32
    bf16 = jnp.bfloat16

    # ---------------- conv1 + ReLU : a single MXU matmul ---------------------
    # p1 rows are conv1 output positions, pre-ordered by phase (see wrapper).
    a1 = jnp.dot(p1_ref[0], w1_ref[...], preferred_element_type=f32)   # (256, 128)
    y1 = jnp.maximum(a1 + b1_ref[...], 0.0).astype(bf16)               # (256, 128)

    # ---- scatter conv1 output into the zero-padded, phase-split scratch -----
    # scratch row ((rh*4+rw)*5 + qh)*5 + qw holds the conv2 input at padded
    # position (h, w) = (4*qh + rh, 4*qw + rw); unwritten rows stay zero (= pad 2).
    y1p_ref[...] = jnp.zeros_like(y1p_ref)
    for g in range(16):                       # g = rh*4 + rw (phase of padded coords)
        rh, rw = g // 4, g % 4
        qh0 = 1 if rh < 2 else 0
        qw0 = 1 if rw < 2 else 0
        for i in range(4):
            src = g * 16 + i * 4
            dst = g * 25 + (qh0 + i) * 5 + qw0
            y1p_ref[dst:dst + 4, :] = y1[src:src + 4, :]

    # ---------------- conv2 + ReLU : 25 tap matmuls ---------------------------
    acc2 = jnp.zeros((16, 128), f32)          # rows = ho2*4 + wo2
    for kh in range(5):
        for kw in range(5):
            base = ((kh % 4) * 4 + (kw % 4)) * 25
            dh, dw = kh // 4, kw // 4
            for i in range(4):                # i = ho2; contiguous 4-row reads
                row = base + (dh + i) * 5 + dw
                patch_ref[i * 4:(i + 1) * 4, :] = y1p_ref[row:row + 4, :]
            tap = kh * 5 + kw
            acc2 = acc2 + jnp.dot(patch_ref[...],
                                  w2_ref[tap * 128:(tap + 1) * 128, :],
                                  preferred_element_type=f32)
    y2 = jnp.maximum(acc2 + b2_ref[...], 0.0).astype(bf16)             # (16, 128)

    # ---------------- flatten + Linear ----------------------------------------
    # Dropout(0.5) is identity in eval mode; NCHW flatten order is folded into wl.
    out = jnp.zeros((1, 128), f32)
    for s in range(16):                       # s = ho2*4 + wo2
        out = out + jnp.dot(y2[s:s + 1, :],
                            wl_ref[s * 128:(s + 1) * 128, :],
                            preferred_element_type=f32)
    out = out + bl_ref[...]
    out_ref[0] = jnp.broadcast_to(out, (8, 128)).astype(out_ref.dtype)


# ----------------------------------------------------------------------------
# Wrapper-side layout glue (pure XLA, one-time / tiny).
# ----------------------------------------------------------------------------
def _conv1_row_perm():
    """Row order of the conv1 im2col matrix: grouped by the phase (mod 4) of the
    padded conv2-input coordinate, so the kernel scatters contiguous row chunks."""
    perm = np.zeros((256,), np.int32)
    for g in range(16):
        rh, rw = g // 4, g % 4
        qh0 = 1 if rh < 2 else 0
        qw0 = 1 if rw < 2 else 0
        for i in range(4):
            for j in range(4):
                ho = 4 * (qh0 + i) + rh - 2          # conv1 output row, 0..15
                wo = 4 * (qw0 + j) + rw - 2          # conv1 output col, 0..15
                perm[g * 16 + i * 4 + j] = ho * 16 + wo
    return perm


_PERM = _conv1_row_perm()


def _conv1_patches(x):
    """im2col for conv1 (5x5, stride 4, pad 2) on the raw NCHW input.
    Rows phase-ordered, K zero-padded 75 -> 128, cast to bf16.
    # TODO(synk): conv1 patch extraction stays in XLA (input lives in HBM and is tiny);
    # conv2's im2col is done fully in-kernel from VMEM."""
    B = x.shape[0]
    xp = jnp.pad(x, ((0, 0), (0, 0), (2, 2), (2, 2)))          # (B, 3, 68, 68)
    cols = []
    for kh in range(5):
        for kw in range(5):
            cols.append(xp[:, :, kh:kh + 61:4, kw:kw + 61:4])  # (B, 3, 16, 16)
    p = jnp.stack(cols, axis=-1)                               # (B, 3, 16, 16, 25)
    p = p.transpose(0, 2, 3, 1, 4).reshape(B, 256, 75)         # cols = (ci, kh, kw)
    p = p[:, _PERM, :]                                         # phase-ordered rows
    p = jnp.pad(p, ((0, 0), (0, 0), (0, 128 - 75)))
    return p.astype(jnp.bfloat16)


def _prepare_params(params, params_n):
    """One-time weight prep: pad all lane dims to 128, fold layouts, cast bf16."""
    assert params_n <= 128
    f32 = jnp.float32
    # conv1 weight (16, 3, 5, 5) -> (75, 16), pad to (128, 128)
    w1 = params["w1"].reshape(16, 75).T
    w1p = jnp.zeros((128, 128), f32).at[:75, :16].set(w1).astype(jnp.bfloat16)
    b1p = jnp.zeros((1, 128), f32).at[0, :16].set(params["b1"])
    # conv2 weight (64, 16, 5, 5) -> per-tap (ci, co) blocks, padded, flattened 2-D
    w2 = params["w2"].transpose(2, 3, 1, 0).reshape(25, 16, 64)
    w2p = (jnp.zeros((25, 128, 128), f32).at[:, :16, :64].set(w2)
           .astype(jnp.bfloat16).reshape(25 * 128, 128))
    b2p = jnp.zeros((1, 128), f32).at[0, :64].set(params["b2"])
    # linear weight: fold NCHW flatten order (c2*16 + s) into the weight, pad, flatten
    wl = params["wl"].reshape(params_n, 64, 16).transpose(2, 1, 0)   # (s, c2, p)
    wlp = (jnp.zeros((16, 128, 128), f32).at[:, :64, :params_n].set(wl)
           .astype(jnp.bfloat16).reshape(16 * 128, 128))
    blp = jnp.zeros((1, 128), f32).at[0, :params_n].set(params["bl"])
    return {"w1": w1p, "b1": b1p, "w2": w2p, "b2": b2p, "wl": wlp, "bl": blp}


# ----------------------------------------------------------------------------
# Forward pass (ParameterEstimatorLight.forward, eval mode)
# ----------------------------------------------------------------------------
@functools.partial(jax.jit, static_argnames=("params_n", "do_transform"))
def parameter_estimator_light_forward(x, prepped, *, params_n, do_transform=False):
    # x: (B, 3, 64, 64) NCHW float32
    if do_transform:
        x = x[:, :, :64, :64]
    B = x.shape[0]
    p1 = _conv1_patches(x)                                     # (B, 256, 128) bf16

    out_padded = pl.pallas_call(
        _fused_forward_kernel,
        out_shape=jax.ShapeDtypeStruct((B, 8, 128), jnp.float32),
        grid=(B,),
        in_specs=[
            pl.BlockSpec((1, 256, 128), lambda b: (b, 0, 0)),   # conv1 patches
            pl.BlockSpec((128, 128), lambda b: (0, 0)),         # w1 (resident)
            pl.BlockSpec((1, 128), lambda b: (0, 0)),           # b1
            pl.BlockSpec((25 * 128, 128), lambda b: (0, 0)),    # w2, per-tap blocks
            pl.BlockSpec((1, 128), lambda b: (0, 0)),           # b2
            pl.BlockSpec((16 * 128, 128), lambda b: (0, 0)),    # wl, per-position blocks
            pl.BlockSpec((1, 128), lambda b: (0, 0)),           # bl
        ],
        out_specs=pl.BlockSpec((1, 8, 128), lambda b: (b, 0, 0)),
        scratch_shapes=[
            pltpu.VMEM((400, 128), jnp.bfloat16),   # phase-split padded conv2 input
            pltpu.VMEM((16, 128), jnp.bfloat16),    # per-tap im2col patch
        ],
        compiler_params=pltpu.CompilerParams(
            dimension_semantics=("parallel",)),
    )(p1, prepped["w1"], prepped["b1"], prepped["w2"], prepped["b2"],
      prepped["wl"], prepped["bl"])

    # TODO(synk): training-mode Dropout (random mask * 2.0) not implemented (eval only).
    return out_padded[:, 0, :params_n]


# ----------------------------------------------------------------------------
# Module parameters (deterministic synthetic init, shapes from __init__)
# ----------------------------------------------------------------------------
def init_params(key, params_n):
    ks = jax.random.split(key, 6)
    scale = 0.05
    return {
        "w1": scale * jax.random.normal(ks[0], (16, 3, 5, 5), jnp.float32),
        "b1": scale * jax.random.normal(ks[1], (16,), jnp.float32),
        "w2": scale * jax.random.normal(ks[2], (64, 16, 5, 5), jnp.float32),
        "b2": scale * jax.random.normal(ks[3], (64,), jnp.float32),
        "wl": scale * jax.random.normal(ks[4], (params_n, 1024), jnp.float32),
        "bl": scale * jax.random.normal(ks[5], (params_n,), jnp.float32),
    }


def _reference_forward(x, params):
    """Plain-XLA reference of the PyTorch module (eval mode)."""
    y = jax.lax.conv_general_dilated(
        x, params["w1"], window_strides=(4, 4), padding=((2, 2), (2, 2)),
        dimension_numbers=("NCHW", "OIHW", "NCHW"))
    y = jax.nn.relu(y + params["b1"][None, :, None, None])
    y = jax.lax.conv_general_dilated(
        y, params["w2"], window_strides=(4, 4), padding=((2, 2), (2, 2)),
        dimension_numbers=("NCHW", "OIHW", "NCHW"))
    y = jax.nn.relu(y + params["b2"][None, :, None, None])
    y = y.reshape(x.shape[0], -1)
    return y @ params["wl"].T + params["bl"][None, :]


if __name__ == "__main__":
    params_n = 8
    key = jax.random.PRNGKey(0)
    k_param, k_input = jax.random.split(key)
    params = init_params(k_param, params_n)
    prepped = _prepare_params(params, params_n)

    # Linear(1024, .) forces a 64x64 spatial input (64/4/4 = 4; 64*4*4 = 1024).
    B = 2
    x = jax.random.normal(k_input, (B, 3, 64, 64), jnp.float32)

    out = parameter_estimator_light_forward(x, prepped, params_n=params_n)
    out = jax.block_until_ready(out)
    assert out.shape == (B, params_n), out.shape
    assert out.dtype == jnp.float32

    # Numerical check vs the XLA reference (bf16 matmul operands => loose tolerance).
    ref = _reference_forward(x, params)
    err = float(jnp.max(jnp.abs(out - ref)))
    assert err < 5e-2, f"max abs error vs reference: {err}"
    print("KERNEL_OK")
</pallas_src>

<mosaic_0001>
module attributes {stable_mosaic.version = 11 : i64} {
  func.func @_fused_forward_kernel(%arg0: i32, %arg1: memref<1x256x128xbf16, #tpu.memory_space<vmem>>, %arg2: memref<128x128xbf16, #tpu.memory_space<vmem>>, %arg3: memref<1x128xf32, #tpu.memory_space<vmem>>, %arg4: memref<3200x128xbf16, #tpu.memory_space<vmem>>, %arg5: memref<1x128xf32, #tpu.memory_space<vmem>>, %arg6: memref<2048x128xbf16, #tpu.memory_space<vmem>>, %arg7: memref<1x128xf32, #tpu.memory_space<vmem>>, %arg8: memref<1x8x128xf32, #tpu.memory_space<vmem>>, %arg9: memref<400x128xbf16, #tpu.memory_space<vmem>>, %arg10: memref<16x128xbf16, #tpu.memory_space<vmem>>) attributes {dimension_semantics = [#tpu.dimension_semantics<parallel>], iteration_bounds = array<i64: 2>, scalar_prefetch = 0 : i64, scratch_operands = 2 : i64, tpu.core_type = #tpu.core_type<tc>, window_params = [{transform_indices = @transform_0, window_bounds = array<i64: 1, 256, 128>}, {pipeline_mode = #tpu.pipeline_mode<synchronous>, transform_indices = @transform_1, window_bounds = array<i64: 128, 128>}, {pipeline_mode = #tpu.pipeline_mode<synchronous>, transform_indices = @transform_2, window_bounds = array<i64: 1, 128>}, {pipeline_mode = #tpu.pipeline_mode<synchronous>, transform_indices = @transform_3, window_bounds = array<i64: 3200, 128>}, {pipeline_mode = #tpu.pipeline_mode<synchronous>, transform_indices = @transform_4, window_bounds = array<i64: 1, 128>}, {pipeline_mode = #tpu.pipeline_mode<synchronous>, transform_indices = @transform_5, window_bounds = array<i64: 2048, 128>}, {pipeline_mode = #tpu.pipeline_mode<synchronous>, transform_indices = @transform_6, window_bounds = array<i64: 1, 128>}, {transform_indices = @transform_7, window_bounds = array<i64: 1, 8, 128>}]} {
    %c0 = arith.constant 0 : index
    %c0_0 = arith.constant 0 : index
    %c0_1 = arith.constant 0 : index
    %0 = vector.load %arg1[%c0, %c0_0, %c0_1] : memref<1x256x128xbf16, #tpu.memory_space<vmem>>, vector<1x256x128xbf16>
    %1 = vector.shape_cast %0 : vector<1x256x128xbf16> to vector<256x128xbf16>
    %c0_2 = arith.constant 0 : index
    %c0_3 = arith.constant 0 : index
    %2 = vector.load %arg2[%c0_2, %c0_3] : memref<128x128xbf16, #tpu.memory_space<vmem>>, vector<128x128xbf16>
    %cst = arith.constant dense<0.000000e+00> : vector<256x128xf32>
    %3 = tpu.matmul %1, %2, %cst {dimension_numbers = #tpu.dot_dimension_numbers<[1], [0], [0], [1], [0, 0, 1, 1], [], []>} : vector<256x128xbf16>, vector<128x128xbf16>, vector<256x128xf32> -> vector<256x128xf32>
    %c0_4 = arith.constant 0 : index
    %c0_5 = arith.constant 0 : index
    %4 = vector.load %arg3[%c0_4, %c0_5] : memref<1x128xf32, #tpu.memory_space<vmem>>, vector<1x128xf32>
    %5 = vector.broadcast %4 : vector<1x128xf32> to vector<256x128xf32>
    %6 = arith.addf %3, %5 : vector<256x128xf32>
    %cst_6 = arith.constant 0.000000e+00 : f32
    %7 = vector.broadcast %cst_6 : f32 to vector<256x128xf32>
    %8 = arith.maximumf %6, %7 : vector<256x128xf32>
    %9 = arith.truncf %8 : vector<256x128xf32> to vector<256x128xbf16>
    %cst_7 = arith.constant 0.000000e+00 : bf16
    %10 = vector.broadcast %cst_7 : bf16 to vector<400x128xbf16>
    %c0_8 = arith.constant 0 : index
    %c0_9 = arith.constant 0 : index
    %11 = vector.load %arg9[%c0_8, %c0_9] : memref<400x128xbf16, #tpu.memory_space<vmem>>, vector<400x128xbf16>
    tpu.vector_store %arg9[%c0_8, %c0_9], %10 {strides = array<i32>} : memref<400x128xbf16, #tpu.memory_space<vmem>>, vector<400x128xbf16>,
    %12 = vector.extract_strided_slice %9 {offsets = [0, 0], sizes = [4, 128], strides = [1, 1]} : vector<256x128xbf16> to vector<4x128xbf16>
    %c6 = arith.constant 6 : index
    %c0_10 = arith.constant 0 : index
    %13 = vector.load %arg9[%c6, %c0_10] : memref<400x128xbf16, #tpu.memory_space<vmem>>, vector<4x128xbf16>
    tpu.vector_store %arg9[%c6, %c0_10], %12 {strides = array<i32>} : memref<400x128xbf16, #tpu.memory_space<vmem>>, vector<4x128xbf16>,
    %14 = vector.extract_strided_slice %9 {offsets = [4, 0], sizes = [4, 128], strides = [1, 1]} : vector<256x128xbf16> to vector<4x128xbf16>
    %c11 = arith.constant 11 : index
    %c0_11 = arith.constant 0 : index
    %15 = vector.load %arg9[%c11, %c0_11] : memref<400x128xbf16, #tpu.memory_space<vmem>>, vector<4x128xbf16>
    tpu.vector_store %arg9[%c11, %c0_11], %14 {strides = array<i32>} : memref<400x128xbf16, #tpu.memory_space<vmem>>, vector<4x128xbf16>,
    %16 = vector.extract_strided_slice %9 {offsets = [8, 0], sizes = [4, 128], strides = [1, 1]} : vector<256x128xbf16> to vector<4x128xbf16>
    %c16 = arith.constant 16 : index
    %c0_12 = arith.constant 0 : index
    %17 = vector.load %arg9[%c16, %c0_12] : memref<400x128xbf16, #tpu.memory_space<vmem>>, vector<4x128xbf16>
    tpu.vector_store %arg9[%c16, %c0_12], %16 {strides = array<i32>} : memref<400x128xbf16, #tpu.memory_space<vmem>>, vector<4x128xbf16>,
    %18 = vector.extract_strided_slice %9 {offsets = [12, 0], sizes = [4, 128], strides = [1, 1]} : vector<256x128xbf16> to vector<4x128xbf16>
    %c21 = arith.constant 21 : index
    %c0_13 = arith.constant 0 : index
    %19 = vector.load %arg9[%c21, %c0_13] : memref<400x128xbf16, #tpu.memory_space<vmem>>, vector<4x128xbf16>
    tpu.vector_store %arg9[%c21, %c0_13], %18 {strides = array<i32>} : memref<400x128xbf16, #tpu.memory_space<vmem>>, vector<4x128xbf16>,
    %20 = vector.extract_strided_slice %9 {offsets = [16, 0], sizes = [4, 128], strides = [1, 1]} : vector<256x128xbf16> to vector<4x128xbf16>
    %c31 = arith.constant 31 : index
    %c0_14 = arith.constant 0 : index
    %21 = vector.load %arg9[%c31, %c0_14] : memref<400x128xbf16, #tpu.memory_space<vmem>>, vector<4x128xbf16>
    tpu.vector_store %arg9[%c31, %c0_14], %20 {strides = array<i32>} : memref<400x128xbf16, #tpu.memory_space<vmem>>, vector<4x128xbf16>,
    %22 = vector.extract_strided_slice %9 {offsets = [20, 0], sizes = [4, 128], strides = [1, 1]} : vector<256x128xbf16> to vector<4x128xbf16>
    %c36 = arith.constant 36 : index
    %c0_15 = arith.constant 0 : index
    %23 = vector.load %arg9[%c36, %c0_15] : memref<400x128xbf16, #tpu.memory_space<vmem>>, vector<4x128xbf16>
    tpu.vector_store %arg9[%c36, %c0_15], %22 {strides = array<i32>} : memref<400x128xbf16, #tpu.memory_space<vmem>>, vector<4x128xbf16>,
    %24 = vector.extract_strided_slice %9 {offsets = [24, 0], sizes = [4, 128], strides = [1, 1]} : vector<256x128xbf16> to vector<4x128xbf16>
    %c41 = arith.constant 41 : index
    %c0_16 = arith.constant 0 : index
    %25 = vector.load %arg9[%c41, %c0_16] : memref<400x128xbf16, #tpu.memory_space<vmem>>, vector<4x128xbf16>
    tpu.vector_store %arg9[%c41, %c0_16], %24 {strides = array<i32>} : memref<400x128xbf16, #tpu.memory_space<vmem>>, vector<4x128xbf16>,
    %26 = vector.extract_strided_slice %9 {offsets = [28, 0], sizes = [4, 128], strides = [1, 1]} : vector<256x128xbf16> to vector<4x128xbf16>
    %c46 = arith.constant 46 : index
    %c0_17 = arith.constant 0 : index
    %27 = vector.load %arg9[%c46, %c0_17] : memref<400x128xbf16, #tpu.memory_space<vmem>>, vector<4x128xbf16>
    tpu.vector_store %arg9[%c46, %c0_17], %26 {strides = array<i32>} : memref<400x128xbf16, #tpu.memory_space<vmem>>, vector<4x128xbf16>,
    %28 = vector.extract_strided_slice %9 {offsets = [32, 0], sizes = [4, 128], strides = [1, 1]} : vector<256x128xbf16> to vector<4x128xbf16>
    %c55 = arith.constant 55 : index
    %c0_18 = arith.constant 0 : index
    %29 = vector.load %arg9[%c55, %c0_18] : memref<400x128xbf16, #tpu.memory_space<vmem>>, vector<4x128xbf16>
    tpu.vector_store %arg9[%c55, %c0_18], %28 {strides = array<i32>} : memref<400x128xbf16, #tpu.memory_space<vmem>>, vector<4x128xbf16>,
    %30 = vector.extract_strided_slice %9 {offsets = [36, 0], sizes = [4, 128], strides = [1, 1]} : vector<256x128xbf16> to vector<4x128xbf16>
    %c60 = arith.constant 60 : index
    %c0_19 = arith.constant 0 : index
    %31 = vector.load %arg9[%c60, %c0_19] : memref<400x128xbf16, #tpu.memory_space<vmem>>, vector<4x128xbf16>
    tpu.vector_store %arg9[%c60, %c0_19], %30 {strides = array<i32>} : memref<400x128xbf16, #tpu.memory_space<vmem>>, vector<4x128xbf16>,
    %32 = vector.extract_strided_slice %9 {offsets = [40, 0], sizes = [4, 128], strides = [1, 1]} : vector<256x128xbf16> to vector<4x128xbf16>
    %c65 = arith.constant 65 : index
    %c0_20 = arith.constant 0 : index
    %33 = vector.load %arg9[%c65, %c0_20] : memref<400x128xbf16, #tpu.memory_space<vmem>>, vector<4x128xbf16>
    tpu.vector_store %arg9[%c65, %c0_20], %32 {strides = array<i32>} : memref<400x128xbf16, #tpu.memory_space<vmem>>, vector<4x128xbf16>,
    %34 = vector.extract_strided_slice %9 {offsets = [44, 0], sizes = [4, 128], strides = [1, 1]} : vector<256x128xbf16> to vector<4x128xbf16>
    %c70 = arith.constant 70 : index
    %c0_21 = arith.constant 0 : index
    %35 = vector.load %arg9[%c70, %c0_21] : memref<400x128xbf16, #tpu.memory_space<vmem>>, vector<4x128xbf16>
    tpu.vector_store %arg9[%c70, %c0_21], %34 {strides = array<i32>} : memref<400x128xbf16, #tpu.memory_space<vmem>>, vector<4x128xbf16>,
    %36 = vector.extract_strided_slice %9 {offsets = [48, 0], sizes = [4, 128], strides = [1, 1]} : vector<256x128xbf16> to vector<4x128xbf16>
    %c80 = arith.constant 80 : index
    %c0_22 = arith.constant 0 : index
    %37 = vector.load %arg9[%c80, %c0_22] : memref<400x128xbf16, #tpu.memory_space<vmem>>, vector<4x128xbf16>
    tpu.vector_store %arg9[%c80, %c0_22], %36 {strides = array<i32>} : memref<400x128xbf16, #tpu.memory_space<vmem>>, vector<4x128xbf16>,
    %38 = vector.extract_strided_slice %9 {offsets = [52, 0], sizes = [4, 128], strides = [1, 1]} : vector<256x128xbf16> to vector<4x128xbf16>
    %c85 = arith.constant 85 : index
    %c0_23 = arith.constant 0 : index
    %39 = vector.load %arg9[%c85, %c0_23] : memref<400x128xbf16, #tpu.memory_space<vmem>>, vector<4x128xbf16>
    tpu.vector_store %arg9[%c85, %c0_23], %38 {strides = array<i32>} : memref<400x128xbf16, #tpu.memory_space<vmem>>, vector<4x128xbf16>,
    %40 = vector.extract_strided_slice %9 {offsets = [56, 0], sizes = [4, 128], strides = [1, 1]} : vector<256x128xbf16> to vector<4x128xbf16>
    %c90 = arith.constant 90 : index
    %c0_24 = arith.constant 0 : index
    %41 = vector.load %arg9[%c90, %c0_24] : memref<400x128xbf16, #tpu.memory_space<vmem>>, vector<4x128xbf16>
    tpu.vector_store %arg9[%c90, %c0_24], %40 {strides = array<i32>} : memref<400x128xbf16, #tpu.memory_space<vmem>>, vector<4x128xbf16>,
    %42 = vector.extract_strided_slice %9 {offsets = [60, 0], sizes = [4, 128], strides = [1, 1]} : vector<256x128xbf16> to vector<4x128xbf16>
    %c95 = arith.constant 95 : index
    %c0_25 = arith.constant 0 : index
    %43 = vector.load %arg9[%c95, %c0_25] : memref<400x128xbf16, #tpu.memory_space<vmem>>, vector<4x128xbf16>
    tpu.vector_store %arg9[%c95, %c0_25], %42 {strides = array<i32>} : memref<400x128xbf16, #tpu.memory_space<vmem>>, vector<4x128xbf16>,
    %44 = vector.extract_strided_slice %9 {offsets = [64, 0], sizes = [4, 128], strides = [1, 1]} : vector<256x128xbf16> to vector<4x128xbf16>
    %c106 = arith.constant 106 : index
    %c0_26 = arith.constant 0 : index
    %45 = vector.load %arg9[%c106, %c0_26] : memref<400x128xbf16, #tpu.memory_space<vmem>>, vector<4x128xbf16>
    tpu.vector_store %arg9[%c106, %c0_26], %44 {strides = array<i32>} : memref<400x128xbf16, #tpu.memory_space<vmem>>, vector<4x128xbf16>,
    %46 = vector.extract_strided_slice %9 {offsets = [68, 0], sizes = [4, 128], strides = [1, 1]} : vector<256x128xbf16> to vector<4x128xbf16>
    %c111 = arith.constant 111 : index
    %c0_27 = arith.constant 0 : index
    %47 = vector.load %arg9[%c111, %c0_27] : memref<400x128xbf16, #tpu.memory_space<vmem>>, vector<4x128xbf16>
    tpu.vector_store %arg9[%c111, %c0_27], %46 {strides = array<i32>} : memref<400x128xbf16, #tpu.memory_space<vmem>>, vector<4x128xbf16>,
    %48 = vector.extract_strided_slice %9 {offsets = [72, 0], sizes = [4, 128], strides = [1, 1]} : vector<256x128xbf16> to vector<4x128xbf16>
    %c116 = arith.constant 116 : index
    %c0_28 = arith.constant 0 : index
    %49 = vector.load %arg9[%c116, %c0_28] : memref<400x128xbf16, #tpu.memory_space<vmem>>, vector<4x128xbf16>
    tpu.vector_store %arg9[%c116, %c0_28], %48 {strides = array<i32>} : memref<400x128xbf16, #tpu.memory_space<vmem>>, vector<4x128xbf16>,
    %50 = vector.extract_strided_slice %9 {offsets = [76, 0], sizes = [4, 128], strides = [1, 1]} : vector<256x128xbf16> to vector<4x128xbf16>
    %c121 = arith.constant 121 : index
    %c0_29 = arith.constant 0 : index
    %51 = vector.load %arg9[%c121, %c0_29] : memref<400x128xbf16, #tpu.memory_space<vmem>>, vector<4x128xbf16>
    tpu.vector_store %arg9[%c121, %c0_29], %50 {strides = array<i32>} : memref<400x128xbf16, #tpu.memory_space<vmem>>, vector<4x128xbf16>,
    %52 = vector.extract_strided_slice %9 {offsets = [80, 0], sizes = [4, 128], strides = [1, 1]} : vector<256x128xbf16> to vector<4x128xbf16>
    %c131 = arith.constant 131 : index
    %c0_30 = arith.constant 0 : index
    %53 = vector.load %arg9[%c131, %c0_30] : memref<400x128xbf16, #tpu.memory_space<vmem>>, vector<4x128xbf16>
    tpu.vector_store %arg9[%c131, %c0_30], %52 {strides = array<i32>} : memref<400x128xbf16, #tpu.memory_space<vmem>>, vector<4x128xbf16>,
    %54 = vector.extract_strided_slice %9 {offsets = [84, 0], sizes = [4, 128], strides = [1, 1]} : vector<256x128xbf16> to vector<4x128xbf16>
    %c136 = arith.constant 136 : index
    %c0_31 = arith.constant 0 : index
    %55 = vector.load %arg9[%c136, %c0_31] : memref<400x128xbf16, #tpu.memory_space<vmem>>, vector<4x128xbf16>
    tpu.vector_store %arg9[%c136, %c0_31], %54 {strides = array<i32>} : memref<400x128xbf16, #tpu.memory_space<vmem>>, vector<4x128xbf16>,
    %56 = vector.extract_strided_slice %9 {offsets = [88, 0], sizes = [4, 128], strides = [1, 1]} : vector<256x128xbf16> to vector<4x128xbf16>
    %c141 = arith.constant 141 : index
    %c0_32 = arith.constant 0 : index
    %57 = vector.load %arg9[%c141, %c0_32] : memref<400x128xbf16, #tpu.memory_space<vmem>>, vector<4x128xbf16>
    tpu.vector_store %arg9[%c141, %c0_32], %56 {strides = array<i32>} : memref<400x128xbf16, #tpu.memory_space<vmem>>, vector<4x128xbf16>,
    %58 = vector.extract_strided_slice %9 {offsets = [92, 0], sizes = [4, 128], strides = [1, 1]} : vector<256x128xbf16> to vector<4x128xbf16>
    %c146 = arith.constant 146 : index
    %c0_33 = arith.constant 0 : index
    %59 = vector.load %arg9[%c146, %c0_33] : memref<400x128xbf16, #tpu.memory_space<vmem>>, vector<4x128xbf16>
    tpu.vector_store %arg9[%c146, %c0_33], %58 {strides = array<i32>} : memref<400x128xbf16, #tpu.memory_space<vmem>>, vector<4x128xbf16>,
    %60 = vector.extract_strided_slice %9 {offsets = [96, 0], sizes = [4, 128], strides = [1, 1]} : vector<256x128xbf16> to vector<4x128xbf16>
    %c155 = arith.constant 155 : index
    %c0_34 = arith.constant 0 : index
    %61 = vector.load %arg9[%c155, %c0_34] : memref<400x128xbf16, #tpu.memory_space<vmem>>, vector<4x128xbf16>
    tpu.vector_store %arg9[%c155, %c0_34], %60 {strides = array<i32>} : memref<400x128xbf16, #tpu.memory_space<vmem>>, vector<4x128xbf16>,
    %62 = vector.extract_strided_slice %9 {offsets = [100, 0], sizes = [4, 128], strides = [1, 1]} : vector<256x128xbf16> to vector<4x128xbf16>
    %c160 = arith.constant 160 : index
    %c0_35 = arith.constant 0 : index
    %63 = vector.load %arg9[%c160, %c0_35] : memref<400x128xbf16, #tpu.memory_space<vmem>>, vector<4x128xbf16>
    tpu.vector_store %arg9[%c160, %c0_35], %62 {strides = array<i32>} : memref<400x128xbf16, #tpu.memory_space<vmem>>, vector<4x128xbf16>,
    %64 = vector.extract_strided_slice %9 {offsets = [104, 0], sizes = [4, 128], strides = [1, 1]} : vector<256x128xbf16> to vector<4x128xbf16>
    %c165 = arith.constant 165 : index
    %c0_36 = arith.constant 0 : index
    %65 = vector.load %arg9[%c165, %c0_36] : memref<400x128xbf16, #tpu.memory_space<vmem>>, vector<4x128xbf16>
    tpu.vector_store %arg9[%c165, %c0_36], %64 {strides = array<i32>} : memref<400x128xbf16, #tpu.memory_space<vmem>>, vector<4x128xbf16>,
    %66 = vector.extract_strided_slice %9 {offsets = [108, 0], sizes = [4, 128], strides = [1, 1]} : vector<256x128xbf16> to vector<4x128xbf16>
    %c170 = arith.constant 170 : index
    %c0_37 = arith.constant 0 : index
    %67 = vector.load %arg9[%c170, %c0_37] : memref<400x128xbf16, #tpu.memory_space<vmem>>, vector<4x128xbf16>
    tpu.vector_store %arg9[%c170, %c0_37], %66 {strides = array<i32>} : memref<400x128xbf16, #tpu.memory_space<vmem>>, vector<4x128xbf16>,
    %68 = vector.extract_strided_slice %9 {offsets = [112, 0], sizes = [4, 128], strides = [1, 1]} : vector<256x128xbf16> to vector<4x128xbf16>
    %c180 = arith.constant 180 : index
    %c0_38 = arith.constant 0 : index
    %69 = vector.load %arg9[%c180, %c0_38] : memref<400x128xbf16, #tpu.memory_space<vmem>>, vector<4x128xbf16>
    tpu.vector_store %arg9[%c180, %c0_38], %68 {strides = array<i32>} : memref<400x128xbf16, #tpu.memory_space<vmem>>, vector<4x128xbf16>,
    %70 = vector.extract_strided_slice %9 {offsets = [116, 0], sizes = [4, 128], strides = [1, 1]} : vector<256x128xbf16> to vector<4x128xbf16>
    %c185 = arith.constant 185 : index
    %c0_39 = arith.constant 0 : index
    %71 = vector.load %arg9[%c185, %c0_39] : memref<400x128xbf16, #tpu.memory_space<vmem>>, vector<4x128xbf16>
    tpu.vector_store %arg9[%c185, %c0_39], %70 {strides = array<i32>} : memref<400x128xbf16, #tpu.memory_space<vmem>>, vector<4x128xbf16>,
    %72 = vector.extract_strided_slice %9 {offsets = [120, 0], sizes = [4, 128], strides = [1, 1]} : vector<256x128xbf16> to vector<4x128xbf16>
    %c190 = arith.constant 190 : index
    %c0_40 = arith.constant 0 : index
    %73 = vector.load %arg9[%c190, %c0_40] : memref<400x128xbf16, #tpu.memory_space<vmem>>, vector<4x128xbf16>
    tpu.vector_store %arg9[%c190, %c0_40], %72 {strides = array<i32>} : memref<400x128xbf16, #tpu.memory_space<vmem>>, vector<4x128xbf16>,
    %74 = vector.extract_strided_slice %9 {offsets = [124, 0], sizes = [4, 128], strides = [1, 1]} : vector<256x128xbf16> to vector<4x128xbf16>
    %c195 = arith.constant 195 : index
    %c0_41 = arith.constant 0 : index
    %75 = vector.load %arg9[%c195, %c0_41] : memref<400x128xbf16, #tpu.memory_space<vmem>>, vector<4x128xbf16>
    tpu.vector_store %arg9[%c195, %c0_41], %74 {strides = array<i32>} : memref<400x128xbf16, #tpu.memory_space<vmem>>, vector<4x128xbf16>,
    %76 = vector.extract_strided_slice %9 {offsets = [128, 0], sizes = [4, 128], strides = [1, 1]} : vector<256x128xbf16> to vector<4x128xbf16>
    %c201 = arith.constant 201 : index
    %c0_42 = arith.constant 0 : index
    %77 = vector.load %arg9[%c201, %c0_42] : memref<400x128xbf16, #tpu.memory_space<vmem>>, vector<4x128xbf16>
    tpu.vector_store %arg9[%c201, %c0_42], %76 {strides = array<i32>} : memref<400x128xbf16, #tpu.memory_space<vmem>>, vector<4x128xbf16>,
    %78 = vector.extract_strided_slice %9 {offsets = [132, 0], sizes = [4, 128], strides = [1, 1]} : vector<256x128xbf16> to vector<4x128xbf16>
    %c206 = arith.constant 206 : index
    %c0_43 = arith.constant 0 : index
    %79 = vector.load %arg9[%c206, %c0_43] : memref<400x128xbf16, #tpu.memory_space<vmem>>, vector<4x128xbf16>
    tpu.vector_store %arg9[%c206, %c0_43], %78 {strides = array<i32>} : memref<400x128xbf16, #tpu.memory_space<vmem>>, vector<4x128xbf16>,
    %80 = vector.extract_strided_slice %9 {offsets = [136, 0], sizes = [4, 128], strides = [1, 1]} : vector<256x128xbf16> to vector<4x128xbf16>
    %c211 = arith.constant 211 : index
    %c0_44 = arith.constant 0 : index
    %81 = vector.load %arg9[%c211, %c0_44] : memref<400x128xbf16, #tpu.memory_space<vmem>>, vector<4x128xbf16>
    tpu.vector_store %arg9[%c211, %c0_44], %80 {strides = array<i32>} : memref<400x128xbf16, #tpu.memory_space<vmem>>, vector<4x128xbf16>,
    %82 = vector.extract_strided_slice %9 {offsets = [140, 0], sizes = [4, 128], strides = [1, 1]} : vector<256x128xbf16> to vector<4x128xbf16>
    %c216 = arith.constant 216 : index
    %c0_45 = arith.constant 0 : index
    %83 = vector.load %arg9[%c216, %c0_45] : memref<400x128xbf16, #tpu.memory_space<vmem>>, vector<4x128xbf16>
    tpu.vector_store %arg9[%c216, %c0_45], %82 {strides = array<i32>} : memref<400x128xbf16, #tpu.memory_space<vmem>>, vector<4x128xbf16>,
    %84 = vector.extract_strided_slice %9 {offsets = [144, 0], sizes = [4, 128], strides = [1, 1]} : vector<256x128xbf16> to vector<4x128xbf16>
    %c226 = arith.constant 226 : index
    %c0_46 = arith.constant 0 : index
    %85 = vector.load %arg9[%c226, %c0_46] : memref<400x128xbf16, #tpu.memory_space<vmem>>, vector<4x128xbf16>
    tpu.vector_store %arg9[%c226, %c0_46], %84 {strides = array<i32>} : memref<400x128xbf16, #tpu.memory_space<vmem>>, vector<4x128xbf16>,
    %86 = vector.extract_strided_slice %9 {offsets = [148, 0], sizes = [4, 128], strides = [1, 1]} : vector<256x128xbf16> to vector<4x128xbf16>
    %c231 = arith.constant 231 : index
    %c0_47 = arith.constant 0 : index
    %87 = vector.load %arg9[%c231, %c0_47] : memref<400x128xbf16, #tpu.memory_space<vmem>>, vector<4x128xbf16>
    tpu.vector_store %arg9[%c231, %c0_47], %86 {strides = array<i32>} : memref<400x128xbf16, #tpu.memory_space<vmem>>, vector<4x128xbf16>,
    %88 = vector.extract_strided_slice %9 {offsets = [152, 0], sizes = [4, 128], strides = [1, 1]} : vector<256x128xbf16> to vector<4x128xbf16>
    %c236 = arith.constant 236 : index
    %c0_48 = arith.constant 0 : index
    %89 = vector.load %arg9[%c236, %c0_48] : memref<400x128xbf16, #tpu.memory_space<vmem>>, vector<4x128xbf16>
    tpu.vector_store %arg9[%c236, %c0_48], %88 {strides = array<i32>} : memref<400x128xbf16, #tpu.memory_space<vmem>>, vector<4x128xbf16>,
    %90 = vector.extract_strided_slice %9 {offsets = [156, 0], sizes = [4, 128], strides = [1, 1]} : vector<256x128xbf16> to vector<4x128xbf16>
    %c241 = arith.constant 241 : index
    %c0_49 = arith.constant 0 : index
    %91 = vector.load %arg9[%c241, %c0_49] : memref<400x128xbf16, #tpu.memory_space<vmem>>, vector<4x128xbf16>
    tpu.vector_store %arg9[%c241, %c0_49], %90 {strides = array<i32>} : memref<400x128xbf16, #tpu.memory_space<vmem>>, vector<4x128xbf16>,
    %92 = vector.extract_strided_slice %9 {offsets = [160, 0], sizes = [4, 128], strides = [1, 1]} : vector<256x128xbf16> to vector<4x128xbf16>
    %c250 = arith.constant 250 : index
    %c0_50 = arith.constant 0 : index
    %93 = vector.load %arg9[%c250, %c0_50] : memref<400x128xbf16, #tpu.memory_space<vmem>>, vector<4x128xbf16>
    tpu.vector_store %arg9[%c250, %c0_50], %92 {strides = array<i32>} : memref<400x128xbf16, #tpu.memory_space<vmem>>, vector<4x128xbf16>,
    %94 = vector.extract_strided_slice %9 {offsets = [164, 0], sizes = [4, 128], strides = [1, 1]} : vector<256x128xbf16> to vector<4x128xbf16>
    %c255 = arith.constant 255 : index
    %c0_51 = arith.constant 0 : index
    %95 = vector.load %arg9[%c255, %c0_51] : memref<400x128xbf16, #tpu.memory_space<vmem>>, vector<4x128xbf16>
    tpu.vector_store %arg9[%c255, %c0_51], %94 {strides = array<i32>} : memref<400x128xbf16, #tpu.memory_space<vmem>>, vector<4x128xbf16>,
    %96 = vector.extract_strided_slice %9 {offsets = [168, 0], sizes = [4, 128], strides = [1, 1]} : vector<256x128xbf16> to vector<4x128xbf16>
    %c260 = arith.constant 260 : index
    %c0_52 = arith.constant 0 : index
    %97 = vector.load %arg9[%c260, %c0_52] : memref<400x128xbf16, #tpu.memory_space<vmem>>, vector<4x128xbf16>
    tpu.vector_store %arg9[%c260, %c0_52], %96 {strides = array<i32>} : memref<400x128xbf16, #tpu.memory_space<vmem>>, vector<4x128xbf16>,
    %98 = vector.extract_strided_slice %9 {offsets = [172, 0], sizes = [4, 128], strides = [1, 1]} : vector<256x128xbf16> to vector<4x128xbf16>
    %c265 = arith.constant 265 : index
    %c0_53 = arith.constant 0 : index
    %99 = vector.load %arg9[%c265, %c0_53] : memref<400x128xbf16, #tpu.memory_space<vmem>>, vector<4x128xbf16>
    tpu.vector_store %arg9[%c265, %c0_53], %98 {strides = array<i32>} : memref<400x128xbf16, #tpu.memory_space<vmem>>, vector<4x128xbf16>,
    %100 = vector.extract_strided_slice %9 {offsets = [176, 0], sizes = [4, 128], strides = [1, 1]} : vector<256x128xbf16> to vector<4x128xbf16>
    %c275 = arith.constant 275 : index
    %c0_54 = arith.constant 0 : index
    %101 = vector.load %arg9[%c275, %c0_54] : memref<400x128xbf16, #tpu.memory_space<vmem>>, vector<4x128xbf16>
    tpu.vector_store %arg9[%c275, %c0_54], %100 {strides = array<i32>} : memref<400x128xbf16, #tpu.memory_space<vmem>>, vector<4x128xbf16>,
    %102 = vector.extract_strided_slice %9 {offsets = [180, 0], sizes = [4, 128], strides = [1, 1]} : vector<256x128xbf16> to vector<4x128xbf16>
    %c280 = arith.constant 280 : index
    %c0_55 = arith.constant 0 : index
    %103 = vector.load %arg9[%c280, %c0_55] : memref<400x128xbf16, #tpu.memory_space<vmem>>, vector<4x128xbf16>
    tpu.vector_store %arg9[%c280, %c0_55], %102 {strides = array<i32>} : memref<400x128xbf16, #tpu.memory_space<vmem>>, vector<4x128xbf16>,
    %104 = vector.extract_strided_slice %9 {offsets = [184, 0], sizes = [4, 128], strides = [1, 1]} : vector<256x128xbf16> to vector<4x128xbf16>
    %c285 = arith.constant 285 : index
    %c0_56 = arith.constant 0 : index
    %105 = vector.load %arg9[%c285, %c0_56] : memref<400x128xbf16, #tpu.memory_space<vmem>>, vector<4x128xbf16>
    tpu.vector_store %arg9[%c285, %c0_56], %104 {strides = array<i32>} : memref<400x128xbf16, #tpu.memory_space<vmem>>, vector<4x128xbf16>,
    %106 = vector.extract_strided_slice %9 {offsets = [188, 0], sizes = [4, 128], strides = [1, 1]} : vector<256x128xbf16> to vector<4x128xbf16>
    %c290 = arith.constant 290 : index
    %c0_57 = arith.constant 0 : index
    %107 = vector.load %arg9[%c290, %c0_57] : memref<400x128xbf16, #tpu.memory_space<vmem>>, vector<4x128xbf16>
    tpu.vector_store %arg9[%c290, %c0_57], %106 {strides = array<i32>} : memref<400x128xbf16, #tpu.memory_space<vmem>>, vector<4x128xbf16>,
    %108 = vector.extract_strided_slice %9 {offsets = [192, 0], sizes = [4, 128], strides = [1, 1]} : vector<256x128xbf16> to vector<4x128xbf16>
    %c301 = arith.constant 301 : index
    %c0_58 = arith.constant 0 : index
    %109 = vector.load %arg9[%c301, %c0_58] : memref<400x128xbf16, #tpu.memory_space<vmem>>, vector<4x128xbf16>
    tpu.vector_store %arg9[%c301, %c0_58], %108 {strides = array<i32>} : memref<400x128xbf16, #tpu.memory_space<vmem>>, vector<4x128xbf16>,
    %110 = vector.extract_strided_slice %9 {offsets = [196, 0], sizes = [4, 128], strides = [1, 1]} : vector<256x128xbf16> to vector<4x128xbf16>
    %c306 = arith.constant 306 : index
    %c0_59 = arith.constant 0 : index
    %111 = vector.load %arg9[%c306, %c0_59] : memref<400x128xbf16, #tpu.memory_space<vmem>>, vector<4x128xbf16>
    tpu.vector_store %arg9[%c306, %c0_59], %110 {strides = array<i32>} : memref<400x128xbf16, #tpu.memory_space<vmem>>, vector<4x128xbf16>,
    %112 = vector.extract_strided_slice %9 {offsets = [200, 0], sizes = [4, 128], strides = [1, 1]} : vector<256x128xbf16> to vector<4x128xbf16>
    %c311 = arith.constant 311 : index
    %c0_60 = arith.constant 0 : index
    %113 = vector.load %arg9[%c311, %c0_60] : memref<400x128xbf16, #tpu.memory_space<vmem>>, vector<4x128xbf16>
    tpu.vector_store %arg9[%c311, %c0_60], %112 {strides = array<i32>} : memref<400x128xbf16, #tpu.memory_space<vmem>>, vector<4x128xbf16>,
    %114 = vector.extract_strided_slice %9 {offsets = [204, 0], sizes = [4, 128], strides = [1, 1]} : vector<256x128xbf16> to vector<4x128xbf16>
    %c316 = arith.constant 316 : index
    %c0_61 = arith.constant 0 : index
    %115 = vector.load %arg9[%c316, %c0_61] : memref<400x128xbf16, #tpu.memory_space<vmem>>, vector<4x128xbf16>
    tpu.vector_store %arg9[%c316, %c0_61], %114 {strides = array<i32>} : memref<400x128xbf16, #tpu.memory_space<vmem>>, vector<4x128xbf16>,
    %116 = vector.extract_strided_slice %9 {offsets = [208, 0], sizes = [4, 128], strides = [1, 1]} : vector<256x128xbf16> to vector<4x128xbf16>
    %c326 = arith.constant 326 : index
    %c0_62 = arith.constant 0 : index
    %117 = vector.load %arg9[%c326, %c0_62] : memref<400x128xbf16, #tpu.memory_space<vmem>>, vector<4x128xbf16>
    tpu.vector_store %arg9[%c326, %c0_62], %116 {strides = array<i32>} : memref<400x128xbf16, #tpu.memory_space<vmem>>, vector<4x128xbf16>,
    %118 = vector.extract_strided_slice %9 {offsets = [212, 0], sizes = [4, 128], strides = [1, 1]} : vector<256x128xbf16> to vector<4x128xbf16>
    %c331 = arith.constant 331 : index
    %c0_63 = arith.constant 0 : index
    %119 = vector.load %arg9[%c331, %c0_63] : memref<400x128xbf16, #tpu.memory_space<vmem>>, vector<4x128xbf16>
    tpu.vector_store %arg9[%c331, %c0_63], %118 {strides = array<i32>} : memref<400x128xbf16, #tpu.memory_space<vmem>>, vector<4x128xbf16>,
    %120 = vector.extract_strided_slice %9 {offsets = [216, 0], sizes = [4, 128], strides = [1, 1]} : vector<256x128xbf16> to vector<4x128xbf16>
    %c336 = arith.constant 336 : index
    %c0_64 = arith.constant 0 : index
    %121 = vector.load %arg9[%c336, %c0_64] : memref<400x128xbf16, #tpu.memory_space<vmem>>, vector<4x128xbf16>
    tpu.vector_store %arg9[%c336, %c0_64], %120 {strides = array<i32>} : memref<400x128xbf16, #tpu.memory_space<vmem>>, vector<4x128xbf16>,
    %122 = vector.extract_strided_slice %9 {offsets = [220, 0], sizes = [4, 128], strides = [1, 1]} : vector<256x128xbf16> to vector<4x128xbf16>
    %c341 = arith.constant 341 : index
    %c0_65 = arith.constant 0 : index
    %123 = vector.load %arg9[%c341, %c0_65] : memref<400x128xbf16, #tpu.memory_space<vmem>>, vector<4x128xbf16>
    tpu.vector_store %arg9[%c341, %c0_65], %122 {strides = array<i32>} : memref<400x128xbf16, #tpu.memory_space<vmem>>, vector<4x128xbf16>,
    %124 = vector.extract_strided_slice %9 {offsets = [224, 0], sizes = [4, 128], strides = [1, 1]} : vector<256x128xbf16> to vector<4x128xbf16>
    %c350 = arith.constant 350 : index
    %c0_66 = arith.constant 0 : index
    %125 = vector.load %arg9[%c350, %c0_66] : memref<400x128xbf16, #tpu.memory_space<vmem>>, vector<4x128xbf16>
    tpu.vector_store %arg9[%c350, %c0_66], %124 {strides = array<i32>} : memref<400x128xbf16, #tpu.memory_space<vmem>>, vector<4x128xbf16>,
    %126 = vector.extract_strided_slice %9 {offsets = [228, 0], sizes = [4, 128], strides = [1, 1]} : vector<256x128xbf16> to vector<4x128xbf16>
    %c355 = arith.constant 355 : index
    %c0_67 = arith.constant 0 : index
    %127 = vector.load %arg9[%c355, %c0_67] : memref<400x128xbf16, #tpu.memory_space<vmem>>, vector<4x128xbf16>
    tpu.vector_store %arg9[%c355, %c0_67], %126 {strides = array<i32>} : memref<400x128xbf16, #tpu.memory_space<vmem>>, vector<4x128xbf16>,
    %128 = vector.extract_strided_slice %9 {offsets = [232, 0], sizes = [4, 128], strides = [1, 1]} : vector<256x128xbf16> to vector<4x128xbf16>
    %c360 = arith.constant 360 : index
    %c0_68 = arith.constant 0 : index
    %129 = vector.load %arg9[%c360, %c0_68] : memref<400x128xbf16, #tpu.memory_space<vmem>>, vector<4x128xbf16>
    tpu.vector_store %arg9[%c360, %c0_68], %128 {strides = array<i32>} : memref<400x128xbf16, #tpu.memory_space<vmem>>, vector<4x128xbf16>,
    %130 = vector.extract_strided_slice %9 {offsets = [236, 0], sizes = [4, 128], strides = [1, 1]} : vector<256x128xbf16> to vector<4x128xbf16>
    %c365 = arith.constant 365 : index
    %c0_69 = arith.constant 0 : index
    %131 = vector.load %arg9[%c365, %c0_69] : memref<400x128xbf16, #tpu.memory_space<vmem>>, vector<4x128xbf16>
    tpu.vector_store %arg9[%c365, %c0_69], %130 {strides = array<i32>} : memref<400x128xbf16, #tpu.memory_space<vmem>>, vector<4x128xbf16>,
    %132 = vector.extract_strided_slice %9 {offsets = [240, 0], sizes = [4, 128], strides = [1, 1]} : vector<256x128xbf16> to vector<4x128xbf16>
    %c375 = arith.constant 375 : index
    %c0_70 = arith.constant 0 : index
    %133 = vector.load %arg9[%c375, %c0_70] : memref<400x128xbf16, #tpu.memory_space<vmem>>, vector<4x128xbf16>
    tpu.vector_store %arg9[%c375, %c0_70], %132 {strides = array<i32>} : memref<400x128xbf16, #tpu.memory_space<vmem>>, vector<4x128xbf16>,
    %134 = vector.extract_strided_slice %9 {offsets = [244, 0], sizes = [4, 128], strides = [1, 1]} : vector<256x128xbf16> to vector<4x128xbf16>
    %c380 = arith.constant 380 : index
    %c0_71 = arith.constant 0 : index
    %135 = vector.load %arg9[%c380, %c0_71] : memref<400x128xbf16, #tpu.memory_space<vmem>>, vector<4x128xbf16>
    tpu.vector_store %arg9[%c380, %c0_71], %134 {strides = array<i32>} : memref<400x128xbf16, #tpu.memory_space<vmem>>, vector<4x128xbf16>,
    %136 = vector.extract_strided_slice %9 {offsets = [248, 0], sizes = [4, 128], strides = [1, 1]} : vector<256x128xbf16> to vector<4x128xbf16>
    %c385 = arith.constant 385 : index
    %c0_72 = arith.constant 0 : index
    %137 = vector.load %arg9[%c385, %c0_72] : memref<400x128xbf16, #tpu.memory_space<vmem>>, vector<4x128xbf16>
    tpu.vector_store %arg9[%c385, %c0_72], %136 {strides = array<i32>} : memref<400x128xbf16, #tpu.memory_space<vmem>>, vector<4x128xbf16>,
    %138 = vector.extract_strided_slice %9 {offsets = [252, 0], sizes = [4, 128], strides = [1, 1]} : vector<256x128xbf16> to vector<4x128xbf16>
    %c390 = arith.constant 390 : index
    %c0_73 = arith.constant 0 : index
    %139 = vector.load %arg9[%c390, %c0_73] : memref<400x128xbf16, #tpu.memory_space<vmem>>, vector<4x128xbf16>
    tpu.vector_store %arg9[%c390, %c0_73], %138 {strides = array<i32>} : memref<400x128xbf16, #tpu.memory_space<vmem>>, vector<4x128xbf16>,
    %cst_74 = arith.constant 0.000000e+00 : f32
    %140 = vector.broadcast %cst_74 : f32 to vector<16x128xf32>
    %c0_75 = arith.constant 0 : index
    %c0_76 = arith.constant 0 : index
    %141 = vector.load %arg9[%c0_75, %c0_76] : memref<400x128xbf16, #tpu.memory_space<vmem>>, vector<4x128xbf16>
    %c0_77 = arith.constant 0 : index
    %c0_78 = arith.constant 0 : index
    %142 = vector.load %arg10[%c0_77, %c0_78] : memref<16x128xbf16, #tpu.memory_space<vmem>>, vector<4x128xbf16>
    tpu.vector_store %arg10[%c0_77, %c0_78], %141 {strides = array<i32>} : memref<16x128xbf16, #tpu.memory_space<vmem>>, vector<4x128xbf16>,
    %c5 = arith.constant 5 : index
    %c0_79 = arith.constant 0 : index
    %143 = vector.load %arg9[%c5, %c0_79] : memref<400x128xbf16, #tpu.memory_space<vmem>>, vector<4x128xbf16>
    %c4 = arith.constant 4 : index
    %c0_80 = arith.constant 0 : index
    %144 = vector.load %arg10[%c4, %c0_80] : memref<16x128xbf16, #tpu.memory_space<vmem>>, vector<4x128xbf16>
    tpu.vector_store %arg10[%c4, %c0_80], %143 {strides = array<i32>} : memref<16x128xbf16, #tpu.memory_space<vmem>>, vector<4x128xbf16>,
    %c10 = arith.constant 10 : index
    %c0_81 = arith.constant 0 : index
    %145 = vector.load %arg9[%c10, %c0_81] : memref<400x128xbf16, #tpu.memory_space<vmem>>, vector<4x128xbf16>
    %c8 = arith.constant 8 : index
    %c0_82 = arith.constant 0 : index
    %146 = vector.load %arg10[%c8, %c0_82] : memref<16x128xbf16, #tpu.memory_space<vmem>>, vector<4x128xbf16>
    tpu.vector_store %arg10[%c8, %c0_82], %145 {strides = array<i32>} : memref<16x128xbf16, #tpu.memory_space<vmem>>, vector<4x128xbf16>,
    %c15 = arith.constant 15 : index
    %c0_83 = arith.constant 0 : index
    %147 = vector.load %arg9[%c15, %c0_83] : memref<400x128xbf16, #tpu.memory_space<vmem>>, vector<4x128xbf16>
    %c12 = arith.constant 12 : index
    %c0_84 = arith.constant 0 : index
    %148 = vector.load %arg10[%c12, %c0_84] : memref<16x128xbf16, #tpu.memory_space<vmem>>, vector<4x128xbf16>
    tpu.vector_store %arg10[%c12, %c0_84], %147 {strides = array<i32>} : memref<16x128xbf16, #tpu.memory_space<vmem>>, vector<4x128xbf16>,
    %c0_85 = arith.constant 0 : index
    %c0_86 = arith.constant 0 : index
    %149 = vector.load %arg10[%c0_85, %c0_86] : memref<16x128xbf16, #tpu.memory_space<vmem>>, vector<16x128xbf16>
    %c0_87 = arith.constant 0 : index
    %c0_88 = arith.constant 0 : index
    %150 = vector.load %arg4[%c0_87, %c0_88] : memref<3200x128xbf16, #tpu.memory_space<vmem>>, vector<128x128xbf16>
    %cst_89 = arith.constant dense<0.000000e+00> : vector<16x128xf32>
    %151 = tpu.matmul %149, %150, %cst_89 {dimension_numbers = #tpu.dot_dimension_numbers<[1], [0], [0], [1], [0, 0, 1, 1], [], []>} : vector<16x128xbf16>, vector<128x128xbf16>, vector<16x128xf32> -> vector<16x128xf32>
    %152 = arith.addf %140, %151 : vector<16x128xf32>
    %c25 = arith.constant 25 : index
    %c0_90 = arith.constant 0 : index
    %153 = vector.load %arg9[%c25, %c0_90] : memref<400x128xbf16, #tpu.memory_space<vmem>>, vector<4x128xbf16>
    %c0_91 = arith.constant 0 : index
    %c0_92 = arith.constant 0 : index
    %154 = vector.load %arg10[%c0_91, %c0_92] : memref<16x128xbf16, #tpu.memory_space<vmem>>, vector<4x128xbf16>
    tpu.vector_store %arg10[%c0_91, %c0_92], %153 {strides = array<i32>} : memref<16x128xbf16, #tpu.memory_space<vmem>>, vector<4x128xbf16>,
    %c30 = arith.constant 30 : index
    %c0_93 = arith.constant 0 : index
    %155 = vector.load %arg9[%c30, %c0_93] : memref<400x128xbf16, #tpu.memory_space<vmem>>, vector<4x128xbf16>
    %c4_94 = arith.constant 4 : index
    %c0_95 = arith.constant 0 : index
    %156 = vector.load %arg10[%c4_94, %c0_95] : memref<16x128xbf16, #tpu.memory_space<vmem>>, vector<4x128xbf16>
    tpu.vector_store %arg10[%c4_94, %c0_95], %155 {strides = array<i32>} : memref<16x128xbf16, #tpu.memory_space<vmem>>, vector<4x128xbf16>,
    %c35 = arith.constant 35 : index
    %c0_96 = arith.constant 0 : index
    %157 = vector.load %arg9[%c35, %c0_96] : memref<400x128xbf16, #tpu.memory_space<vmem>>, vector<4x128xbf16>
    %c8_97 = arith.constant 8 : index
    %c0_98 = arith.constant 0 : index
    %158 = vector.load %arg10[%c8_97, %c0_98] : memref<16x128xbf16, #tpu.memory_space<vmem>>, vector<4x128xbf16>
    tpu.vector_store %arg10[%c8_97, %c0_98], %157 {strides = array<i32>} : memref<16x128xbf16, #tpu.memory_space<vmem>>, vector<4x128xbf16>,
    %c40 = arith.constant 40 : index
    %c0_99 = arith.constant 0 : index
    %159 = vector.load %arg9[%c40, %c0_99] : memref<400x128xbf16, #tpu.memory_space<vmem>>, vector<4x128xbf16>
    %c12_100 = arith.constant 12 : index
    %c0_101 = arith.constant 0 : index
    %160 = vector.load %arg10[%c12_100, %c0_101] : memref<16x128xbf16, #tpu.memory_space<vmem>>, vector<4x128xbf16>
    tpu.vector_store %arg10[%c12_100, %c0_101], %159 {strides = array<i32>} : memref<16x128xbf16, #tpu.memory_space<vmem>>, vector<4x128xbf16>,
    %c0_102 = arith.constant 0 : index
    %c0_103 = arith.constant 0 : index
    %161 = vector.load %arg10[%c0_102, %c0_103] : memref<16x128xbf16, #tpu.memory_space<vmem>>, vector<16x128xbf16>
    %c128 = arith.constant 128 : index
    %c0_104 = arith.constant 0 : index
    %162 = vector.load %arg4[%c128, %c0_104] : memref<3200x128xbf16, #tpu.memory_space<vmem>>, vector<128x128xbf16>
    %cst_105 = arith.constant dense<0.000000e+00> : vector<16x128xf32>
    %163 = tpu.matmul %161, %162, %cst_105 {dimension_numbers = #tpu.dot_dimension_numbers<[1], [0], [0], [1], [0, 0, 1, 1], [], []>} : vector<16x128xbf16>, vector<128x128xbf16>, vector<16x128xf32> -> vector<16x128xf32>
    %164 = arith.addf %152, %163 : vector<16x128xf32>
    %c50 = arith.constant 50 : index
    %c0_106 = arith.constant 0 : index
    %165 = vector.load %arg9[%c50, %c0_106] : memref<400x128xbf16, #tpu.memory_space<vmem>>, vector<4x128xbf16>
    %c0_107 = arith.constant 0 : index
    %c0_108 = arith.constant 0 : index
    %166 = vector.load %arg10[%c0_107, %c0_108] : memref<16x128xbf16, #tpu.memory_space<vmem>>, vector<4x128xbf16>
    tpu.vector_store %arg10[%c0_107, %c0_108], %165 {strides = array<i32>} : memref<16x128xbf16, #tpu.memory_space<vmem>>, vector<4x128xbf16>,
    %c55_109 = arith.constant 55 : index
    %c0_110 = arith.constant 0 : index
    %167 = vector.load %arg9[%c55_109, %c0_110] : memref<400x128xbf16, #tpu.memory_space<vmem>>, vector<4x128xbf16>
    %c4_111 = arith.constant 4 : index
    %c0_112 = arith.constant 0 : index
    %168 = vector.load %arg10[%c4_111, %c0_112] : memref<16x128xbf16, #tpu.memory_space<vmem>>, vector<4x128xbf16>
    tpu.vector_store %arg10[%c4_111, %c0_112], %167 {strides = array<i32>} : memref<16x128xbf16, #tpu.memory_space<vmem>>, vector<4x128xbf16>,
    %c60_113 = arith.constant 60 : index
    %c0_114 = arith.constant 0 : index
    %169 = vector.load %arg9[%c60_113, %c0_114] : memref<400x128xbf16, #tpu.memory_space<vmem>>, vector<4x128xbf16>
    %c8_115 = arith.constant 8 : index
    %c0_116 = arith.constant 0 : index
    %170 = vector.load %arg10[%c8_115, %c0_116] : memref<16x128xbf16, #tpu.memory_space<vmem>>, vector<4x128xbf16>
    tpu.vector_store %arg10[%c8_115, %c0_116], %169 {strides = array<i32>} : memref<16x128xbf16, #tpu.memory_space<vmem>>, vector<4x128xbf16>,
    %c65_117 = arith.constant 65 : index
    %c0_118 = arith.constant 0 : index
    %171 = vector.load %arg9[%c65_117, %c0_118] : memref<400x128xbf16, #tpu.memory_space<vmem>>, vector<4x128xbf16>
    %c12_119 = arith.constant 12 : index
    %c0_120 = arith.constant 0 : index
    %172 = vector.load %arg10[%c12_119, %c0_120] : memref<16x128xbf16, #tpu.memory_space<vmem>>, vector<4x128xbf16>
    tpu.vector_store %arg10[%c12_119, %c0_120], %171 {strides = array<i32>} : memref<16x128xbf16, #tpu.memory_space<vmem>>, vector<4x128xbf16>,
    %c0_121 = arith.constant 0 : index
    %c0_122 = arith.constant 0 : index
    %173 = vector.load %arg10[%c0_121, %c0_122] : memref<16x128xbf16, #tpu.memory_space<vmem>>, vector<16x128xbf16>
    %c256 = arith.constant 256 : index
    %c0_123 = arith.constant 0 : index
    %174 = vector.load %arg4[%c256, %c0_123] : memref<3200x128xbf16, #tpu.memory_space<vmem>>, vector<128x128xbf16>
    %cst_124 = arith.constant dense<0.000000e+00> : vector<16x128xf32>
    %175 = tpu.matmul %173, %174, %cst_124 {dimension_numbers = #tpu.dot_dimension_numbers<[1], [0], [0], [1], [0, 0, 1, 1], [], []>} : vector<16x128xbf16>, vector<128x128xbf16>, vector<16x128xf32> -> vector<16x128xf32>
    %176 = arith.addf %164, %175 : vector<16x128xf32>
    %c75 = arith.constant 75 : index
    %c0_125 = arith.constant 0 : index
    %177 = vector.load %arg9[%c75, %c0_125] : memref<400x128xbf16, #tpu.memory_space<vmem>>, vector<4x128xbf16>
    %c0_126 = arith.constant 0 : index
    %c0_127 = arith.constant 0 : index
    %178 = vector.load %arg10[%c0_126, %c0_127] : memref<16x128xbf16, #tpu.memory_space<vmem>>, vector<4x128xbf16>
    tpu.vector_store %arg10[%c0_126, %c0_127], %177 {strides = array<i32>} : memref<16x128xbf16, #tpu.memory_space<vmem>>, vector<4x128xbf16>,
    %c80_128 = arith.constant 80 : index
    %c0_129 = arith.constant 0 : index
    %179 = vector.load %arg9[%c80_128, %c0_129] : memref<400x128xbf16, #tpu.memory_space<vmem>>, vector<4x128xbf16>
    %c4_130 = arith.constant 4 : index
    %c0_131 = arith.constant 0 : index
    %180 = vector.load %arg10[%c4_130, %c0_131] : memref<16x128xbf16, #tpu.memory_space<vmem>>, vector<4x128xbf16>
    tpu.vector_store %arg10[%c4_130, %c0_131], %179 {strides = array<i32>} : memref<16x128xbf16, #tpu.memory_space<vmem>>, vector<4x128xbf16>,
    %c85_132 = arith.constant 85 : index
    %c0_133 = arith.constant 0 : index
    %181 = vector.load %arg9[%c85_132, %c0_133] : memref<400x128xbf16, #tpu.memory_space<vmem>>, vector<4x128xbf16>
    %c8_134 = arith.constant 8 : index
    %c0_135 = arith.constant 0 : index
    %182 = vector.load %arg10[%c8_134, %c0_135] : memref<16x128xbf16, #tpu.memory_space<vmem>>, vector<4x128xbf16>
    tpu.vector_store %arg10[%c8_134, %c0_135], %181 {strides = array<i32>} : memref<16x128xbf16, #tpu.memory_space<vmem>>, vector<4x128xbf16>,
    %c90_136 = arith.constant 90 : index
    %c0_137 = arith.constant 0 : index
    %183 = vector.load %arg9[%c90_136, %c0_137] : memref<400x128xbf16, #tpu.memory_space<vmem>>, vector<4x128xbf16>
    %c12_138 = arith.constant 12 : index
    %c0_139 = arith.constant 0 : index
    %184 = vector.load %arg10[%c12_138, %c0_139] : memref<16x128xbf16, #tpu.memory_space<vmem>>, vector<4x128xbf16>
    tpu.vector_store %arg10[%c12_138, %c0_139], %183 {strides = array<i32>} : memref<16x128xbf16, #tpu.memory_space<vmem>>, vector<4x128xbf16>,
    %c0_140 = arith.constant 0 : index
    %c0_141 = arith.constant 0 : index
    %185 = vector.load %arg10[%c0_140, %c0_141] : memref<16x128xbf16, #tpu.memory_space<vmem>>, vector<16x128xbf16>
    %c384 = arith.constant 384 : index
    %c0_142 = arith.constant 0 : index
    %186 = vector.load %arg4[%c384, %c0_142] : memref<3200x128xbf16, #tpu.memory_space<vmem>>, vector<128x128xbf16>
    %cst_143 = arith.constant dense<0.000000e+00> : vector<16x128xf32>
    %187 = tpu.matmul %185, %186, %cst_143 {dimension_numbers = #tpu.dot_dimension_numbers<[1], [0], [0], [1], [0, 0, 1, 1], [], []>} : vector<16x128xbf16>, vector<128x128xbf16>, vector<16x128xf32> -> vector<16x128xf32>
    %188 = arith.addf %176, %187 : vector<16x128xf32>
    %c1 = arith.constant 1 : index
    %c0_144 = arith.constant 0 : index
    %189 = vector.load %arg9[%c1, %c0_144] : memref<400x128xbf16, #tpu.memory_space<vmem>>, vector<4x128xbf16>
    %c0_145 = arith.constant 0 : index
    %c0_146 = arith.constant 0 : index
    %190 = vector.load %arg10[%c0_145, %c0_146] : memref<16x128xbf16, #tpu.memory_space<vmem>>, vector<4x128xbf16>
    tpu.vector_store %arg10[%c0_145, %c0_146], %189 {strides = array<i32>} : memref<16x128xbf16, #tpu.memory_space<vmem>>, vector<4x128xbf16>,
    %c6_147 = arith.constant 6 : index
    %c0_148 = arith.constant 0 : index
    %191 = vector.load %arg9[%c6_147, %c0_148] : memref<400x128xbf16, #tpu.memory_space<vmem>>, vector<4x128xbf16>
    %c4_149 = arith.constant 4 : index
    %c0_150 = arith.constant 0 : index
    %192 = vector.load %arg10[%c4_149, %c0_150] : memref<16x128xbf16, #tpu.memory_space<vmem>>, vector<4x128xbf16>
    tpu.vector_store %arg10[%c4_149, %c0_150], %191 {strides = array<i32>} : memref<16x128xbf16, #tpu.memory_space<vmem>>, vector<4x128xbf16>,
    %c11_151 = arith.constant 11 : index
    %c0_152 = arith.constant 0 : index
    %193 = vector.load %arg9[%c11_151, %c0_152] : memref<400x128xbf16, #tpu.memory_space<vmem>>, vector<4x128xbf16>
    %c8_153 = arith.constant 8 : index
    %c0_154 = arith.constant 0 : index
    %194 = vector.load %arg10[%c8_153, %c0_154] : memref<16x128xbf16, #tpu.memory_space<vmem>>, vector<4x128xbf16>
    tpu.vector_store %arg10[%c8_153, %c0_154], %193 {strides = array<i32>} : memref<16x128xbf16, #tpu.memory_space<vmem>>, vector<4x128xbf16>,
    %c16_155 = arith.constant 16 : index
    %c0_156 = arith.constant 0 : index
    %195 = vector.load %arg9[%c16_155, %c0_156] : memref<400x128xbf16, #tpu.memory_space<vmem>>, vector<4x128xbf16>
    %c12_157 = arith.constant 12 : index
    %c0_158 = arith.constant 0 : index
    %196 = vector.load %arg10[%c12_157, %c0_158] : memref<16x128xbf16, #tpu.memory_space<vmem>>, vector<4x128xbf16>
    tpu.vector_store %arg10[%c12_157, %c0_158], %195 {strides = array<i32>} : memref<16x128xbf16, #tpu.memory_space<vmem>>, vector<4x128xbf16>,
    %c0_159 = arith.constant 0 : index
    %c0_160 = arith.constant 0 : index
    %197 = vector.load %arg10[%c0_159, %c0_160] : memref<16x128xbf16, #tpu.memory_space<vmem>>, vector<16x128xbf16>
    %c512 = arith.constant 512 : index
    %c0_161 = arith.constant 0 : index
    %198 = vector.load %arg4[%c512, %c0_161] : memref<3200x128xbf16, #tpu.memory_space<vmem>>, vector<128x128xbf16>
    %cst_162 = arith.constant dense<0.000000e+00> : vector<16x128xf32>
    %199 = tpu.matmul %197, %198, %cst_162 {dimension_numbers = #tpu.dot_dimension_numbers<[1], [0], [0], [1], [0, 0, 1, 1], [], []>} : vector<16x128xbf16>, vector<128x128xbf16>, vector<16x128xf32> -> vector<16x128xf32>
    %200 = arith.addf %188, %199 : vector<16x128xf32>
    %c100 = arith.constant 100 : index
    %c0_163 = arith.constant 0 : index
    %201 = vector.load %arg9[%c100, %c0_163] : memref<400x128xbf16, #tpu.memory_space<vmem>>, vector<4x128xbf16>
    %c0_164 = arith.constant 0 : index
    %c0_165 = arith.constant 0 : index
    %202 = vector.load %arg10[%c0_164, %c0_165] : memref<16x128xbf16, #tpu.memory_space<vmem>>, vector<4x128xbf16>
    tpu.vector_store %arg10[%c0_164, %c0_165], %201 {strides = array<i32>} : memref<16x128xbf16, #tpu.memory_space<vmem>>, vector<4x128xbf16>,
    %c105 = arith.constant 105 : index
    %c0_166 = arith.constant 0 : index
    %203 = vector.load %arg9[%c105, %c0_166] : memref<400x128xbf16, #tpu.memory_space<vmem>>, vector<4x128xbf16>
    %c4_167 = arith.constant 4 : index
    %c0_168 = arith.constant 0 : index
    %204 = vector.load %arg10[%c4_167, %c0_168] : memref<16x128xbf16, #tpu.memory_space<vmem>>, vector<4x128xbf16>
    tpu.vector_store %arg10[%c4_167, %c0_168], %203 {strides = array<i32>} : memref<16x128xbf16, #tpu.memory_space<vmem>>, vector<4x128xbf16>,
    %c110 = arith.constant 110 : index
    %c0_169 = arith.constant 0 : index
    %205 = vector.load %arg9[%c110, %c0_169] : memref<400x128xbf16, #tpu.memory_space<vmem>>, vector<4x128xbf16>
    %c8_170 = arith.constant 8 : index
    %c0_171 = arith.constant 0 : index
    %206 = vector.load %arg10[%c8_170, %c0_171] : memref<16x128xbf16, #tpu.memory_space<vmem>>, vector<4x128xbf16>
    tpu.vector_store %arg10[%c8_170, %c0_171], %205 {strides = array<i32>} : memref<16x128xbf16, #tpu.memory_space<vmem>>, vector<4x128xbf16>,
    %c115 = arith.constant 115 : index
    %c0_172 = arith.constant 0 : index
    %207 = vector.load %arg9[%c115, %c0_172] : memref<400x128xbf16, #tpu.memory_space<vmem>>, vector<4x128xbf16>
    %c12_173 = arith.constant 12 : index
    %c0_174 = arith.constant 0 : index
    %208 = vector.load %arg10[%c12_173, %c0_174] : memref<16x128xbf16, #tpu.memory_space<vmem>>, vector<4x128xbf16>
    tpu.vector_store %arg10[%c12_173, %c0_174], %207 {strides = array<i32>} : memref<16x128xbf16, #tpu.memory_space<vmem>>, vector<4x128xbf16>,
    %c0_175 = arith.constant 0 : index
    %c0_176 = arith.constant 0 : index
    %209 = vector.load %arg10[%c0_175, %c0_176] : memref<16x128xbf16, #tpu.memory_space<vmem>>, vector<16x128xbf16>
    %c640 = arith.constant 640 : index
    %c0_177 = arith.constant 0 : index
    %210 = vector.load %arg4[%c640, %c0_177] : memref<3200x128xbf16, #tpu.memory_space<vmem>>, vector<128x128xbf16>
    %cst_178 = arith.constant dense<0.000000e+00> : vector<16x128xf32>
    %211 = tpu.matmul %209, %210, %cst_178 {dimension_numbers = #tpu.dot_dimension_numbers<[1], [0], [0], [1], [0, 0, 1, 1], [], []>} : vector<16x128xbf16>, vector<128x128xbf16>, vector<16x128xf32> -> vector<16x128xf32>
    %212 = arith.addf %200, %211 : vector<16x128xf32>
    %c125 = arith.constant 125 : index
    %c0_179 = arith.constant 0 : index
    %213 = vector.load %arg9[%c125, %c0_179] : memref<400x128xbf16, #tpu.memory_space<vmem>>, vector<4x128xbf16>
    %c0_180 = arith.constant 0 : index
    %c0_181 = arith.constant 0 : index
    %214 = vector.load %arg10[%c0_180, %c0_181] : memref<16x128xbf16, #tpu.memory_space<vmem>>, vector<4x128xbf16>
    tpu.vector_store %arg10[%c0_180, %c0_181], %213 {strides = array<i32>} : memref<16x128xbf16, #tpu.memory_space<vmem>>, vector<4x128xbf16>,
    %c130 = arith.constant 130 : index
    %c0_182 = arith.constant 0 : index
    %215 = vector.load %arg9[%c130, %c0_182] : memref<400x128xbf16, #tpu.memory_space<vmem>>, vector<4x128xbf16>
    %c4_183 = arith.constant 4 : index
    %c0_184 = arith.constant 0 : index
    %216 = vector.load %arg10[%c4_183, %c0_184] : memref<16x128xbf16, #tpu.memory_space<vmem>>, vector<4x128xbf16>
    tpu.vector_store %arg10[%c4_183, %c0_184], %215 {strides = array<i32>} : memref<16x128xbf16, #tpu.memory_space<vmem>>, vector<4x128xbf16>,
    %c135 = arith.constant 135 : index
    %c0_185 = arith.constant 0 : index
    %217 = vector.load %arg9[%c135, %c0_185] : memref<400x128xbf16, #tpu.memory_space<vmem>>, vector<4x128xbf16>
    %c8_186 = arith.constant 8 : index
    %c0_187 = arith.constant 0 : index
    %218 = vector.load %arg10[%c8_186, %c0_187] : memref<16x128xbf16, #tpu.memory_space<vmem>>, vector<4x128xbf16>
    tpu.vector_store %arg10[%c8_186, %c0_187], %217 {strides = array<i32>} : memref<16x128xbf16, #tpu.memory_space<vmem>>, vector<4x128xbf16>,
    %c140 = arith.constant 140 : index
    %c0_188 = arith.constant 0 : index
    %219 = vector.load %arg9[%c140, %c0_188] : memref<400x128xbf16, #tpu.memory_space<vmem>>, vector<4x128xbf16>
    %c12_189 = arith.constant 12 : index
    %c0_190 = arith.constant 0 : index
    %220 = vector.load %arg10[%c12_189, %c0_190] : memref<16x128xbf16, #tpu.memory_space<vmem>>, vector<4x128xbf16>
    tpu.vector_store %arg10[%c12_189, %c0_190], %219 {strides = array<i32>} : memref<16x128xbf16, #tpu.memory_space<vmem>>, vector<4x128xbf16>,
    %c0_191 = arith.constant 0 : index
    %c0_192 = arith.constant 0 : index
    %221 = vector.load %arg10[%c0_191, %c0_192] : memref<16x128xbf16, #tpu.memory_space<vmem>>, vector<16x128xbf16>
    %c768 = arith.constant 768 : index
    %c0_193 = arith.constant 0 : index
    %222 = vector.load %arg4[%c768, %c0_193] : memref<3200x128xbf16, #tpu.memory_space<vmem>>, vector<128x128xbf16>
    %cst_194 = arith.constant dense<0.000000e+00> : vector<16x128xf32>
    %223 = tpu.matmul %221, %222, %cst_194 {dimension_numbers = #tpu.dot_dimension_numbers<[1], [0], [0], [1], [0, 0, 1, 1], [], []>} : vector<16x128xbf16>, vector<128x128xbf16>, vector<16x128xf32> -> vector<16x128xf32>
    %224 = arith.addf %212, %223 : vector<16x128xf32>
    %c150 = arith.constant 150 : index
    %c0_195 = arith.constant 0 : index
    %225 = vector.load %arg9[%c150, %c0_195] : memref<400x128xbf16, #tpu.memory_space<vmem>>, vector<4x128xbf16>
    %c0_196 = arith.constant 0 : index
    %c0_197 = arith.constant 0 : index
    %226 = vector.load %arg10[%c0_196, %c0_197] : memref<16x128xbf16, #tpu.memory_space<vmem>>, vector<4x128xbf16>
    tpu.vector_store %arg10[%c0_196, %c0_197], %225 {strides = array<i32>} : memref<16x128xbf16, #tpu.memory_space<vmem>>, vector<4x128xbf16>,
    %c155_198 = arith.constant 155 : index
    %c0_199 = arith.constant 0 : index
    %227 = vector.load %arg9[%c155_198, %c0_199] : memref<400x128xbf16, #tpu.memory_space<vmem>>, vector<4x128xbf16>
    %c4_200 = arith.constant 4 : index
    %c0_201 = arith.constant 0 : index
    %228 = vector.load %arg10[%c4_200, %c0_201] : memref<16x128xbf16, #tpu.memory_space<vmem>>, vector<4x128xbf16>
    tpu.vector_store %arg10[%c4_200, %c0_201], %227 {strides = array<i32>} : memref<16x128xbf16, #tpu.memory_space<vmem>>, vector<4x128xbf16>,
    %c160_202 = arith.constant 160 : index
    %c0_203 = arith.constant 0 : index
    %229 = vector.load %arg9[%c160_202, %c0_203] : memref<400x128xbf16, #tpu.memory_space<vmem>>, vector<4x128xbf16>
    %c8_204 = arith.constant 8 : index
    %c0_205 = arith.constant 0 : index
    %230 = vector.load %arg10[%c8_204, %c0_205] : memref<16x128xbf16, #tpu.memory_space<vmem>>, vector<4x128xbf16>
    tpu.vector_store %arg10[%c8_204, %c0_205], %229 {strides = array<i32>} : memref<16x128xbf16, #tpu.memory_space<vmem>>, vector<4x128xbf16>,
    %c165_206 = arith.constant 165 : index
    %c0_207 = arith.constant 0 : index
    %231 = vector.load %arg9[%c165_206, %c0_207] : memref<400x128xbf16, #tpu.memory_space<vmem>>, vector<4x128xbf16>
    %c12_208 = arith.constant 12 : index
    %c0_209 = arith.constant 0 : index
    %232 = vector.load %arg10[%c12_208, %c0_209] : memref<16x128xbf16, #tpu.memory_space<vmem>>, vector<4x128xbf16>
    tpu.vector_store %arg10[%c12_208, %c0_209], %231 {strides = array<i32>} : memref<16x128xbf16, #tpu.memory_space<vmem>>, vector<4x128xbf16>,
    %c0_210 = arith.constant 0 : index
    %c0_211 = arith.constant 0 : index
    %233 = vector.load %arg10[%c0_210, %c0_211] : memref<16x128xbf16, #tpu.memory_space<vmem>>, vector<16x128xbf16>
    %c896 = arith.constant 896 : index
    %c0_212 = arith.constant 0 : index
    %234 = vector.load %arg4[%c896, %c0_212] : memref<3200x128xbf16, #tpu.memory_space<vmem>>, vector<128x128xbf16>
    %cst_213 = arith.constant dense<0.000000e+00> : vector<16x128xf32>
    %235 = tpu.matmul %233, %234, %cst_213 {dimension_numbers = #tpu.dot_dimension_numbers<[1], [0], [0], [1], [0, 0, 1, 1], [], []>} : vector<16x128xbf16>, vector<128x128xbf16>, vector<16x128xf32> -> vector<16x128xf32>
    %236 = arith.addf %224, %235 : vector<16x128xf32>
    %c175 = arith.constant 175 : index
    %c0_214 = arith.constant 0 : index
    %237 = vector.load %arg9[%c175, %c0_214] : memref<400x128xbf16, #tpu.memory_space<vmem>>, vector<4x128xbf16>
    %c0_215 = arith.constant 0 : index
    %c0_216 = arith.constant 0 : index
    %238 = vector.load %arg10[%c0_215, %c0_216] : memref<16x128xbf16, #tpu.memory_space<vmem>>, vector<4x128xbf16>
    tpu.vector_store %arg10[%c0_215, %c0_216], %237 {strides = array<i32>} : memref<16x128xbf16, #tpu.memory_space<vmem>>, vector<4x128xbf16>,
    %c180_217 = arith.constant 180 : index
    %c0_218 = arith.constant 0 : index
    %239 = vector.load %arg9[%c180_217, %c0_218] : memref<400x128xbf16, #tpu.memory_space<vmem>>, vector<4x128xbf16>
    %c4_219 = arith.constant 4 : index
    %c0_220 = arith.constant 0 : index
    %240 = vector.load %arg10[%c4_219, %c0_220] : memref<16x128xbf16, #tpu.memory_space<vmem>>, vector<4x128xbf16>
    tpu.vector_store %arg10[%c4_219, %c0_220], %239 {strides = array<i32>} : memref<16x128xbf16, #tpu.memory_space<vmem>>, vector<4x128xbf16>,
    %c185_221 = arith.constant 185 : index
    %c0_222 = arith.constant 0 : index
    %241 = vector.load %arg9[%c185_221, %c0_222] : memref<400x128xbf16, #tpu.memory_space<vmem>>, vector<4x128xbf16>
    %c8_223 = arith.constant 8 : index
    %c0_224 = arith.constant 0 : index
    %242 = vector.load %arg10[%c8_223, %c0_224] : memref<16x128xbf16, #tpu.memory_space<vmem>>, vector<4x128xbf16>
    tpu.vector_store %arg10[%c8_223, %c0_224], %241 {strides = array<i32>} : memref<16x128xbf16, #tpu.memory_space<vmem>>, vector<4x128xbf16>,
    %c190_225 = arith.constant 190 : index
    %c0_226 = arith.constant 0 : index
    %243 = vector.load %arg9[%c190_225, %c0_226] : memref<400x128xbf16, #tpu.memory_space<vmem>>, vector<4x128xbf16>
    %c12_227 = arith.constant 12 : index
    %c0_228 = arith.constant 0 : index
    %244 = vector.load %arg10[%c12_227, %c0_228] : memref<16x128xbf16, #tpu.memory_space<vmem>>, vector<4x128xbf16>
    tpu.vector_store %arg10[%c12_227, %c0_228], %243 {strides = array<i32>} : memref<16x128xbf16, #tpu.memory_space<vmem>>, vector<4x128xbf16>,
    %c0_229 = arith.constant 0 : index
    %c0_230 = arith.constant 0 : index
    %245 = vector.load %arg10[%c0_229, %c0_230] : memref<16x128xbf16, #tpu.memory_space<vmem>>, vector<16x128xbf16>
    %c1024 = arith.constant 1024 : index
    %c0_231 = arith.constant 0 : index
    %246 = vector.load %arg4[%c1024, %c0_231] : memref<3200x128xbf16, #tpu.memory_space<vmem>>, vector<128x128xbf16>
    %cst_232 = arith.constant dense<0.000000e+00> : vector<16x128xf32>
    %247 = tpu.matmul %245, %246, %cst_232 {dimension_numbers = #tpu.dot_dimension_numbers<[1], [0], [0], [1], [0, 0, 1, 1], [], []>} : vector<16x128xbf16>, vector<128x128xbf16>, vector<16x128xf32> -> vector<16x128xf32>
    %248 = arith.addf %236, %247 : vector<16x128xf32>
    %c101 = arith.constant 101 : index
    %c0_233 = arith.constant 0 : index
    %249 = vector.load %arg9[%c101, %c0_233] : memref<400x128xbf16, #tpu.memory_space<vmem>>, vector<4x128xbf16>
    %c0_234 = arith.constant 0 : index
    %c0_235 = arith.constant 0 : index
    %250 = vector.load %arg10[%c0_234, %c0_235] : memref<16x128xbf16, #tpu.memory_space<vmem>>, vector<4x128xbf16>
    tpu.vector_store %arg10[%c0_234, %c0_235], %249 {strides = array<i32>} : memref<16x128xbf16, #tpu.memory_space<vmem>>, vector<4x128xbf16>,
    %c106_236 = arith.constant 106 : index
    %c0_237 = arith.constant 0 : index
    %251 = vector.load %arg9[%c106_236, %c0_237] : memref<400x128xbf16, #tpu.memory_space<vmem>>, vector<4x128xbf16>
    %c4_238 = arith.constant 4 : index
    %c0_239 = arith.constant 0 : index
    %252 = vector.load %arg10[%c4_238, %c0_239] : memref<16x128xbf16, #tpu.memory_space<vmem>>, vector<4x128xbf16>
    tpu.vector_store %arg10[%c4_238, %c0_239], %251 {strides = array<i32>} : memref<16x128xbf16, #tpu.memory_space<vmem>>, vector<4x128xbf16>,
    %c111_240 = arith.constant 111 : index
    %c0_241 = arith.constant 0 : index
    %253 = vector.load %arg9[%c111_240, %c0_241] : memref<400x128xbf16, #tpu.memory_space<vmem>>, vector<4x128xbf16>
    %c8_242 = arith.constant 8 : index
    %c0_243 = arith.constant 0 : index
    %254 = vector.load %arg10[%c8_242, %c0_243] : memref<16x128xbf16, #tpu.memory_space<vmem>>, vector<4x128xbf16>
    tpu.vector_store %arg10[%c8_242, %c0_243], %253 {strides = array<i32>} : memref<16x128xbf16, #tpu.memory_space<vmem>>, vector<4x128xbf16>,
    %c116_244 = arith.constant 116 : index
    %c0_245 = arith.constant 0 : index
    %255 = vector.load %arg9[%c116_244, %c0_245] : memref<400x128xbf16, #tpu.memory_space<vmem>>, vector<4x128xbf16>
    %c12_246 = arith.constant 12 : index
    %c0_247 = arith.constant 0 : index
    %256 = vector.load %arg10[%c12_246, %c0_247] : memref<16x128xbf16, #tpu.memory_space<vmem>>, vector<4x128xbf16>
    tpu.vector_store %arg10[%c12_246, %c0_247], %255 {strides = array<i32>} : memref<16x128xbf16, #tpu.memory_space<vmem>>, vector<4x128xbf16>,
    %c0_248 = arith.constant 0 : index
    %c0_249 = arith.constant 0 : index
    %257 = vector.load %arg10[%c0_248, %c0_249] : memref<16x128xbf16, #tpu.memory_space<vmem>>, vector<16x128xbf16>
    %c1152 = arith.constant 1152 : index
    %c0_250 = arith.constant 0 : index
    %258 = vector.load %arg4[%c1152, %c0_250] : memref<3200x128xbf16, #tpu.memory_space<vmem>>, vector<128x128xbf16>
    %cst_251 = arith.constant dense<0.000000e+00> : vector<16x128xf32>
    %259 = tpu.matmul %257, %258, %cst_251 {dimension_numbers = #tpu.dot_dimension_numbers<[1], [0], [0], [1], [0, 0, 1, 1], [], []>} : vector<16x128xbf16>, vector<128x128xbf16>, vector<16x128xf32> -> vector<16x128xf32>
    %260 = arith.addf %248, %259 : vector<16x128xf32>
    %c200 = arith.constant 200 : index
    %c0_252 = arith.constant 0 : index
    %261 = vector.load %arg9[%c200, %c0_252] : memref<400x128xbf16, #tpu.memory_space<vmem>>, vector<4x128xbf16>
    %c0_253 = arith.constant 0 : index
    %c0_254 = arith.constant 0 : index
    %262 = vector.load %arg10[%c0_253, %c0_254] : memref<16x128xbf16, #tpu.memory_space<vmem>>, vector<4x128xbf16>
    tpu.vector_store %arg10[%c0_253, %c0_254], %261 {strides = array<i32>} : memref<16x128xbf16, #tpu.memory_space<vmem>>, vector<4x128xbf16>,
    %c205 = arith.constant 205 : index
    %c0_255 = arith.constant 0 : index
    %263 = vector.load %arg9[%c205, %c0_255] : memref<400x128xbf16, #tpu.memory_space<vmem>>, vector<4x128xbf16>
    %c4_256 = arith.constant 4 : index
    %c0_257 = arith.constant 0 : index
    %264 = vector.load %arg10[%c4_256, %c0_257] : memref<16x128xbf16, #tpu.memory_space<vmem>>, vector<4x128xbf16>
    tpu.vector_store %arg10[%c4_256, %c0_257], %263 {strides = array<i32>} : memref<16x128xbf16, #tpu.memory_space<vmem>>, vector<4x128xbf16>,
    %c210 = arith.constant 210 : index
    %c0_258 = arith.constant 0 : index
    %265 = vector.load %arg9[%c210, %c0_258] : memref<400x128xbf16, #tpu.memory_space<vmem>>, vector<4x128xbf16>
    %c8_259 = arith.constant 8 : index
    %c0_260 = arith.constant 0 : index
    %266 = vector.load %arg10[%c8_259, %c0_260] : memref<16x128xbf16, #tpu.memory_space<vmem>>, vector<4x128xbf16>
    tpu.vector_store %arg10[%c8_259, %c0_260], %265 {strides = array<i32>} : memref<16x128xbf16, #tpu.memory_space<vmem>>, vector<4x128xbf16>,
    %c215 = arith.constant 215 : index
    %c0_261 = arith.constant 0 : index
    %267 = vector.load %arg9[%c215, %c0_261] : memref<400x128xbf16, #tpu.memory_space<vmem>>, vector<4x128xbf16>
    %c12_262 = arith.constant 12 : index
    %c0_263 = arith.constant 0 : index
    %268 = vector.load %arg10[%c12_262, %c0_263] : memref<16x128xbf16, #tpu.memory_space<vmem>>, vector<4x128xbf16>
    tpu.vector_store %arg10[%c12_262, %c0_263], %267 {strides = array<i32>} : memref<16x128xbf16, #tpu.memory_space<vmem>>, vector<4x128xbf16>,
    %c0_264 = arith.constant 0 : index
    %c0_265 = arith.constant 0 : index
    %269 = vector.load %arg10[%c0_264, %c0_265] : memref<16x128xbf16, #tpu.memory_space<vmem>>, vector<16x128xbf16>
    %c1280 = arith.constant 1280 : index
    %c0_266 = arith.constant 0 : index
    %270 = vector.load %arg4[%c1280, %c0_266] : memref<3200x128xbf16, #tpu.memory_space<vmem>>, vector<128x128xbf16>
    %cst_267 = arith.constant dense<0.000000e+00> : vector<16x128xf32>
    %271 = tpu.matmul %269, %270, %cst_267 {dimension_numbers = #tpu.dot_dimension_numbers<[1], [0], [0], [1], [0, 0, 1, 1], [], []>} : vector<16x128xbf16>, vector<128x128xbf16>, vector<16x128xf32> -> vector<16x128xf32>
    %272 = arith.addf %260, %271 : vector<16x128xf32>
    %c225 = arith.constant 225 : index
    %c0_268 = arith.constant 0 : index
    %273 = vector.load %arg9[%c225, %c0_268] : memref<400x128xbf16, #tpu.memory_space<vmem>>, vector<4x128xbf16>
    %c0_269 = arith.constant 0 : index
    %c0_270 = arith.constant 0 : index
    %274 = vector.load %arg10[%c0_269, %c0_270] : memref<16x128xbf16, #tpu.memory_space<vmem>>, vector<4x128xbf16>
    tpu.vector_store %arg10[%c0_269, %c0_270], %273 {strides = array<i32>} : memref<16x128xbf16, #tpu.memory_space<vmem>>, vector<4x128xbf16>,
    %c230 = arith.constant 230 : index
    %c0_271 = arith.constant 0 : index
    %275 = vector.load %arg9[%c230, %c0_271] : memref<400x128xbf16, #tpu.memory_space<vmem>>, vector<4x128xbf16>
    %c4_272 = arith.constant 4 : index
    %c0_273 = arith.constant 0 : index
    %276 = vector.load %arg10[%c4_272, %c0_273] : memref<16x128xbf16, #tpu.memory_space<vmem>>, vector<4x128xbf16>
    tpu.vector_store %arg10[%c4_272, %c0_273], %275 {strides = array<i32>} : memref<16x128xbf16, #tpu.memory_space<vmem>>, vector<4x128xbf16>,
    %c235 = arith.constant 235 : index
    %c0_274 = arith.constant 0 : index
    %277 = vector.load %arg9[%c235, %c0_274] : memref<400x128xbf16, #tpu.memory_space<vmem>>, vector<4x128xbf16>
    %c8_275 = arith.constant 8 : index
    %c0_276 = arith.constant 0 : index
    %278 = vector.load %arg10[%c8_275, %c0_276] : memref<16x128xbf16, #tpu.memory_space<vmem>>, vector<4x128xbf16>
    tpu.vector_store %arg10[%c8_275, %c0_276], %277 {strides = array<i32>} : memref<16x128xbf16, #tpu.memory_space<vmem>>, vector<4x128xbf16>,
    %c240 = arith.constant 240 : index
    %c0_277 = arith.constant 0 : index
    %279 = vector.load %arg9[%c240, %c0_277] : memref<400x128xbf16, #tpu.memory_space<vmem>>, vector<4x128xbf16>
    %c12_278 = arith.constant 12 : index
    %c0_279 = arith.constant 0 : index
    %280 = vector.load %arg10[%c12_278, %c0_279] : memref<16x128xbf16, #tpu.memory_space<vmem>>, vector<4x128xbf16>
    tpu.vector_store %arg10[%c12_278, %c0_279], %279 {strides = array<i32>} : memref<16x128xbf16, #tpu.memory_space<vmem>>, vector<4x128xbf16>,
    %c0_280 = arith.constant 0 : index
    %c0_281 = arith.constant 0 : index
    %281 = vector.load %arg10[%c0_280, %c0_281] : memref<16x128xbf16, #tpu.memory_space<vmem>>, vector<16x128xbf16>
    %c1408 = arith.constant 1408 : index
    %c0_282 = arith.constant 0 : index
    %282 = vector.load %arg4[%c1408, %c0_282] : memref<3200x128xbf16, #tpu.memory_space<vmem>>, vector<128x128xbf16>
    %cst_283 = arith.constant dense<0.000000e+00> : vector<16x128xf32>
    %283 = tpu.matmul %281, %282, %cst_283 {dimension_numbers = #tpu.dot_dimension_numbers<[1], [0], [0], [1], [0, 0, 1, 1], [], []>} : vector<16x128xbf16>, vector<128x128xbf16>, vector<16x128xf32> -> vector<16x128xf32>
    %284 = arith.addf %272, %283 : vector<16x128xf32>
    %c250_284 = arith.constant 250 : index
    %c0_285 = arith.constant 0 : index
    %285 = vector.load %arg9[%c250_284, %c0_285] : memref<400x128xbf16, #tpu.memory_space<vmem>>, vector<4x128xbf16>
    %c0_286 = arith.constant 0 : index
    %c0_287 = arith.constant 0 : index
    %286 = vector.load %arg10[%c0_286, %c0_287] : memref<16x128xbf16, #tpu.memory_space<vmem>>, vector<4x128xbf16>
    tpu.vector_store %arg10[%c0_286, %c0_287], %285 {strides = array<i32>} : memref<16x128xbf16, #tpu.memory_space<vmem>>, vector<4x128xbf16>,
    %c255_288 = arith.constant 255 : index
    %c0_289 = arith.constant 0 : index
    %287 = vector.load %arg9[%c255_288, %c0_289] : memref<400x128xbf16, #tpu.memory_space<vmem>>, vector<4x128xbf16>
    %c4_290 = arith.constant 4 : index
    %c0_291 = arith.constant 0 : index
    %288 = vector.load %arg10[%c4_290, %c0_291] : memref<16x128xbf16, #tpu.memory_space<vmem>>, vector<4x128xbf16>
    tpu.vector_store %arg10[%c4_290, %c0_291], %287 {strides = array<i32>} : memref<16x128xbf16, #tpu.memory_space<vmem>>, vector<4x128xbf16>,
    %c260_292 = arith.constant 260 : index
    %c0_293 = arith.constant 0 : index
    %289 = vector.load %arg9[%c260_292, %c0_293] : memref<400x128xbf16, #tpu.memory_space<vmem>>, vector<4x128xbf16>
    %c8_294 = arith.constant 8 : index
    %c0_295 = arith.constant 0 : index
    %290 = vector.load %arg10[%c8_294, %c0_295] : memref<16x128xbf16, #tpu.memory_space<vmem>>, vector<4x128xbf16>
    tpu.vector_store %arg10[%c8_294, %c0_295], %289 {strides = array<i32>} : memref<16x128xbf16, #tpu.memory_space<vmem>>, vector<4x128xbf16>,
    %c265_296 = arith.constant 265 : index
    %c0_297 = arith.constant 0 : index
    %291 = vector.load %arg9[%c265_296, %c0_297] : memref<400x128xbf16, #tpu.memory_space<vmem>>, vector<4x128xbf16>
    %c12_298 = arith.constant 12 : index
    %c0_299 = arith.constant 0 : index
    %292 = vector.load %arg10[%c12_298, %c0_299] : memref<16x128xbf16, #tpu.memory_space<vmem>>, vector<4x128xbf16>
    tpu.vector_store %arg10[%c12_298, %c0_299], %291 {strides = array<i32>} : memref<16x128xbf16, #tpu.memory_space<vmem>>, vector<4x128xbf16>,
    %c0_300 = arith.constant 0 : index
    %c0_301 = arith.constant 0 : index
    %293 = vector.load %arg10[%c0_300, %c0_301] : memref<16x128xbf16, #tpu.memory_space<vmem>>, vector<16x128xbf16>
    %c1536 = arith.constant 1536 : index
    %c0_302 = arith.constant 0 : index
    %294 = vector.load %arg4[%c1536, %c0_302] : memref<3200x128xbf16, #tpu.memory_space<vmem>>, vector<128x128xbf16>
    %cst_303 = arith.constant dense<0.000000e+00> : vector<16x128xf32>
    %295 = tpu.matmul %293, %294, %cst_303 {dimension_numbers = #tpu.dot_dimension_numbers<[1], [0], [0], [1], [0, 0, 1, 1], [], []>} : vector<16x128xbf16>, vector<128x128xbf16>, vector<16x128xf32> -> vector<16x128xf32>
    %296 = arith.addf %284, %295 : vector<16x128xf32>
    %c275_304 = arith.constant 275 : index
    %c0_305 = arith.constant 0 : index
    %297 = vector.load %arg9[%c275_304, %c0_305] : memref<400x128xbf16, #tpu.memory_space<vmem>>, vector<4x128xbf16>
    %c0_306 = arith.constant 0 : index
    %c0_307 = arith.constant 0 : index
    %298 = vector.load %arg10[%c0_306, %c0_307] : memref<16x128xbf16, #tpu.memory_space<vmem>>, vector<4x128xbf16>
    tpu.vector_store %arg10[%c0_306, %c0_307], %297 {strides = array<i32>} : memref<16x128xbf16, #tpu.memory_space<vmem>>, vector<4x128xbf16>,
    %c280_308 = arith.constant 280 : index
    %c0_309 = arith.constant 0 : index
    %299 = vector.load %arg9[%c280_308, %c0_309] : memref<400x128xbf16, #tpu.memory_space<vmem>>, vector<4x128xbf16>
    %c4_310 = arith.constant 4 : index
    %c0_311 = arith.constant 0 : index
    %300 = vector.load %arg10[%c4_310, %c0_311] : memref<16x128xbf16, #tpu.memory_space<vmem>>, vector<4x128xbf16>
    tpu.vector_store %arg10[%c4_310, %c0_311], %299 {strides = array<i32>} : memref<16x128xbf16, #tpu.memory_space<vmem>>, vector<4x128xbf16>,
    %c285_312 = arith.constant 285 : index
    %c0_313 = arith.constant 0 : index
    %301 = vector.load %arg9[%c285_312, %c0_313] : memref<400x128xbf16, #tpu.memory_space<vmem>>, vector<4x128xbf16>
    %c8_314 = arith.constant 8 : index
    %c0_315 = arith.constant 0 : index
    %302 = vector.load %arg10[%c8_314, %c0_315] : memref<16x128xbf16, #tpu.memory_space<vmem>>, vector<4x128xbf16>
    tpu.vector_store %arg10[%c8_314, %c0_315], %301 {strides = array<i32>} : memref<16x128xbf16, #tpu.memory_space<vmem>>, vector<4x128xbf16>,
    %c290_316 = arith.constant 290 : index
    %c0_317 = arith.constant 0 : index
    %303 = vector.load %arg9[%c290_316, %c0_317] : memref<400x128xbf16, #tpu.memory_space<vmem>>, vector<4x128xbf16>
    %c12_318 = arith.constant 12 : index
    %c0_319 = arith.constant 0 : index
    %304 = vector.load %arg10[%c12_318, %c0_319] : memref<16x128xbf16, #tpu.memory_space<vmem>>, vector<4x128xbf16>
    tpu.vector_store %arg10[%c12_318, %c0_319], %303 {strides = array<i32>} : memref<16x128xbf16, #tpu.memory_space<vmem>>, vector<4x128xbf16>,
    %c0_320 = arith.constant 0 : index
    %c0_321 = arith.constant 0 : index
    %305 = vector.load %arg10[%c0_320, %c0_321] : memref<16x128xbf16, #tpu.memory_space<vmem>>, vector<16x128xbf16>
    %c1664 = arith.constant 1664 : index
    %c0_322 = arith.constant 0 : index
    %306 = vector.load %arg4[%c1664, %c0_322] : memref<3200x128xbf16, #tpu.memory_space<vmem>>, vector<128x128xbf16>
    %cst_323 = arith.constant dense<0.000000e+00> : vector<16x128xf32>
    %307 = tpu.matmul %305, %306, %cst_323 {dimension_numbers = #tpu.dot_dimension_numbers<[1], [0], [0], [1], [0, 0, 1, 1], [], []>} : vector<16x128xbf16>, vector<128x128xbf16>, vector<16x128xf32> -> vector<16x128xf32>
    %308 = arith.addf %296, %307 : vector<16x128xf32>
    %c201_324 = arith.constant 201 : index
    %c0_325 = arith.constant 0 : index
    %309 = vector.load %arg9[%c201_324, %c0_325] : memref<400x128xbf16, #tpu.memory_space<vmem>>, vector<4x128xbf16>
    %c0_326 = arith.constant 0 : index
    %c0_327 = arith.constant 0 : index
    %310 = vector.load %arg10[%c0_326, %c0_327] : memref<16x128xbf16, #tpu.memory_space<vmem>>, vector<4x128xbf16>
    tpu.vector_store %arg10[%c0_326, %c0_327], %309 {strides = array<i32>} : memref<16x128xbf16, #tpu.memory_space<vmem>>, vector<4x128xbf16>,
    %c206_328 = arith.constant 206 : index
    %c0_329 = arith.constant 0 : index
    %311 = vector.load %arg9[%c206_328, %c0_329] : memref<400x128xbf16, #tpu.memory_space<vmem>>, vector<4x128xbf16>
    %c4_330 = arith.constant 4 : index
    %c0_331 = arith.constant 0 : index
    %312 = vector.load %arg10[%c4_330, %c0_331] : memref<16x128xbf16, #tpu.memory_space<vmem>>, vector<4x128xbf16>
    tpu.vector_store %arg10[%c4_330, %c0_331], %311 {strides = array<i32>} : memref<16x128xbf16, #tpu.memory_space<vmem>>, vector<4x128xbf16>,
    %c211_332 = arith.constant 211 : index
    %c0_333 = arith.constant 0 : index
    %313 = vector.load %arg9[%c211_332, %c0_333] : memref<400x128xbf16, #tpu.memory_space<vmem>>, vector<4x128xbf16>
    %c8_334 = arith.constant 8 : index
    %c0_335 = arith.constant 0 : index
    %314 = vector.load %arg10[%c8_334, %c0_335] : memref<16x128xbf16, #tpu.memory_space<vmem>>, vector<4x128xbf16>
    tpu.vector_store %arg10[%c8_334, %c0_335], %313 {strides = array<i32>} : memref<16x128xbf16, #tpu.memory_space<vmem>>, vector<4x128xbf16>,
    %c216_336 = arith.constant 216 : index
    %c0_337 = arith.constant 0 : index
    %315 = vector.load %arg9[%c216_336, %c0_337] : memref<400x128xbf16, #tpu.memory_space<vmem>>, vector<4x128xbf16>
    %c12_338 = arith.constant 12 : index
    %c0_339 = arith.constant 0 : index
    %316 = vector.load %arg10[%c12_338, %c0_339] : memref<16x128xbf16, #tpu.memory_space<vmem>>, vector<4x128xbf16>
    tpu.vector_store %arg10[%c12_338, %c0_339], %315 {strides = array<i32>} : memref<16x128xbf16, #tpu.memory_space<vmem>>, vector<4x128xbf16>,
    %c0_340 = arith.constant 0 : index
    %c0_341 = arith.constant 0 : index
    %317 = vector.load %arg10[%c0_340, %c0_341] : memref<16x128xbf16, #tpu.memory_space<vmem>>, vector<16x128xbf16>
    %c1792 = arith.constant 1792 : index
    %c0_342 = arith.constant 0 : index
    %318 = vector.load %arg4[%c1792, %c0_342] : memref<3200x128xbf16, #tpu.memory_space<vmem>>, vector<128x128xbf16>
    %cst_343 = arith.constant dense<0.000000e+00> : vector<16x128xf32>
    %319 = tpu.matmul %317, %318, %cst_343 {dimension_numbers = #tpu.dot_dimension_numbers<[1], [0], [0], [1], [0, 0, 1, 1], [], []>} : vector<16x128xbf16>, vector<128x128xbf16>, vector<16x128xf32> -> vector<16x128xf32>
    %320 = arith.addf %308, %319 : vector<16x128xf32>
    %c300 = arith.constant 300 : index
    %c0_344 = arith.constant 0 : index
    %321 = vector.load %arg9[%c300, %c0_344] : memref<400x128xbf16, #tpu.memory_space<vmem>>, vector<4x128xbf16>
    %c0_345 = arith.constant 0 : index
    %c0_346 = arith.constant 0 : index
    %322 = vector.load %arg10[%c0_345, %c0_346] : memref<16x128xbf16, #tpu.memory_space<vmem>>, vector<4x128xbf16>
    tpu.vector_store %arg10[%c0_345, %c0_346], %321 {strides = array<i32>} : memref<16x128xbf16, #tpu.memory_space<vmem>>, vector<4x128xbf16>,
    %c305 = arith.constant 305 : index
    %c0_347 = arith.constant 0 : index
    %323 = vector.load %arg9[%c305, %c0_347] : memref<400x128xbf16, #tpu.memory_space<vmem>>, vector<4x128xbf16>
    %c4_348 = arith.constant 4 : index
    %c0_349 = arith.constant 0 : index
    %324 = vector.load %arg10[%c4_348, %c0_349] : memref<16x128xbf16, #tpu.memory_space<vmem>>, vector<4x128xbf16>
    tpu.vector_store %arg10[%c4_348, %c0_349], %323 {strides = array<i32>} : memref<16x128xbf16, #tpu.memory_space<vmem>>, vector<4x128xbf16>,
    %c310 = arith.constant 310 : index
    %c0_350 = arith.constant 0 : index
    %325 = vector.load %arg9[%c310, %c0_350] : memref<400x128xbf16, #tpu.memory_space<vmem>>, vector<4x128xbf16>
    %c8_351 = arith.constant 8 : index
    %c0_352 = arith.constant 0 : index
    %326 = vector.load %arg10[%c8_351, %c0_352] : memref<16x128xbf16, #tpu.memory_space<vmem>>, vector<4x128xbf16>
    tpu.vector_store %arg10[%c8_351, %c0_352], %325 {strides = array<i32>} : memref<16x128xbf16, #tpu.memory_space<vmem>>, vector<4x128xbf16>,
    %c315 = arith.constant 315 : index
    %c0_353 = arith.constant 0 : index
    %327 = vector.load %arg9[%c315, %c0_353] : memref<400x128xbf16, #tpu.memory_space<vmem>>, vector<4x128xbf16>
    %c12_354 = arith.constant 12 : index
    %c0_355 = arith.constant 0 : index
    %328 = vector.load %arg10[%c12_354, %c0_355] : memref<16x128xbf16, #tpu.memory_space<vmem>>, vector<4x128xbf16>
    tpu.vector_store %arg10[%c12_354, %c0_355], %327 {strides = array<i32>} : memref<16x128xbf16, #tpu.memory_space<vmem>>, vector<4x128xbf16>,
    %c0_356 = arith.constant 0 : index
    %c0_357 = arith.constant 0 : index
    %329 = vector.load %arg10[%c0_356, %c0_357] : memref<16x128xbf16, #tpu.memory_space<vmem>>, vector<16x128xbf16>
    %c1920 = arith.constant 1920 : index
    %c0_358 = arith.constant 0 : index
    %330 = vector.load %arg4[%c1920, %c0_358] : memref<3200x128xbf16, #tpu.memory_space<vmem>>, vector<128x128xbf16>
    %cst_359 = arith.constant dense<0.000000e+00> : vector<16x128xf32>
    %331 = tpu.matmul %329, %330, %cst_359 {dimension_numbers = #tpu.dot_dimension_numbers<[1], [0], [0], [1], [0, 0, 1, 1], [], []>} : vector<16x128xbf16>, vector<128x128xbf16>, vector<16x128xf32> -> vector<16x128xf32>
    %332 = arith.addf %320, %331 : vector<16x128xf32>
    %c325 = arith.constant 325 : index
    %c0_360 = arith.constant 0 : index
    %333 = vector.load %arg9[%c325, %c0_360] : memref<400x128xbf16, #tpu.memory_space<vmem>>, vector<4x128xbf16>
    %c0_361 = arith.constant 0 : index
    %c0_362 = arith.constant 0 : index
    %334 = vector.load %arg10[%c0_361, %c0_362] : memref<16x128xbf16, #tpu.memory_space<vmem>>, vector<4x128xbf16>
    tpu.vector_store %arg10[%c0_361, %c0_362], %333 {strides = array<i32>} : memref<16x128xbf16, #tpu.memory_space<vmem>>, vector<4x128xbf16>,
    %c330 = arith.constant 330 : index
    %c0_363 = arith.constant 0 : index
    %335 = vector.load %arg9[%c330, %c0_363] : memref<400x128xbf16, #tpu.memory_space<vmem>>, vector<4x128xbf16>
    %c4_364 = arith.constant 4 : index
    %c0_365 = arith.constant 0 : index
    %336 = vector.load %arg10[%c4_364, %c0_365] : memref<16x128xbf16, #tpu.memory_space<vmem>>, vector<4x128xbf16>
    tpu.vector_store %arg10[%c4_364, %c0_365], %335 {strides = array<i32>} : memref<16x128xbf16, #tpu.memory_space<vmem>>, vector<4x128xbf16>,
    %c335 = arith.constant 335 : index
    %c0_366 = arith.constant 0 : index
    %337 = vector.load %arg9[%c335, %c0_366] : memref<400x128xbf16, #tpu.memory_space<vmem>>, vector<4x128xbf16>
    %c8_367 = arith.constant 8 : index
    %c0_368 = arith.constant 0 : index
    %338 = vector.load %arg10[%c8_367, %c0_368] : memref<16x128xbf16, #tpu.memory_space<vmem>>, vector<4x128xbf16>
    tpu.vector_store %arg10[%c8_367, %c0_368], %337 {strides = array<i32>} : memref<16x128xbf16, #tpu.memory_space<vmem>>, vector<4x128xbf16>,
    %c340 = arith.constant 340 : index
    %c0_369 = arith.constant 0 : index
    %339 = vector.load %arg9[%c340, %c0_369] : memref<400x128xbf16, #tpu.memory_space<vmem>>, vector<4x128xbf16>
    %c12_370 = arith.constant 12 : index
    %c0_371 = arith.constant 0 : index
    %340 = vector.load %arg10[%c12_370, %c0_371] : memref<16x128xbf16, #tpu.memory_space<vmem>>, vector<4x128xbf16>
    tpu.vector_store %arg10[%c12_370, %c0_371], %339 {strides = array<i32>} : memref<16x128xbf16, #tpu.memory_space<vmem>>, vector<4x128xbf16>,
    %c0_372 = arith.constant 0 : index
    %c0_373 = arith.constant 0 : index
    %341 = vector.load %arg10[%c0_372, %c0_373] : memref<16x128xbf16, #tpu.memory_space<vmem>>, vector<16x128xbf16>
    %c2048 = arith.constant 2048 : index
    %c0_374 = arith.constant 0 : index
    %342 = vector.load %arg4[%c2048, %c0_374] : memref<3200x128xbf16, #tpu.memory_space<vmem>>, vector<128x128xbf16>
    %cst_375 = arith.constant dense<0.000000e+00> : vector<16x128xf32>
    %343 = tpu.matmul %341, %342, %cst_375 {dimension_numbers = #tpu.dot_dimension_numbers<[1], [0], [0], [1], [0, 0, 1, 1], [], []>} : vector<16x128xbf16>, vector<128x128xbf16>, vector<16x128xf32> -> vector<16x128xf32>
    %344 = arith.addf %332, %343 : vector<16x128xf32>
    %c350_376 = arith.constant 350 : index
    %c0_377 = arith.constant 0 : index
    %345 = vector.load %arg9[%c350_376, %c0_377] : memref<400x128xbf16, #tpu.memory_space<vmem>>, vector<4x128xbf16>
    %c0_378 = arith.constant 0 : index
    %c0_379 = arith.constant 0 : index
    %346 = vector.load %arg10[%c0_378, %c0_379] : memref<16x128xbf16, #tpu.memory_space<vmem>>, vector<4x128xbf16>
    tpu.vector_store %arg10[%c0_378, %c0_379], %345 {strides = array<i32>} : memref<16x128xbf16, #tpu.memory_space<vmem>>, vector<4x128xbf16>,
    %c355_380 = arith.constant 355 : index
    %c0_381 = arith.constant 0 : index
    %347 = vector.load %arg9[%c355_380, %c0_381] : memref<400x128xbf16, #tpu.memory_space<vmem>>, vector<4x128xbf16>
    %c4_382 = arith.constant 4 : index
    %c0_383 = arith.constant 0 : index
    %348 = vector.load %arg10[%c4_382, %c0_383] : memref<16x128xbf16, #tpu.memory_space<vmem>>, vector<4x128xbf16>
    tpu.vector_store %arg10[%c4_382, %c0_383], %347 {strides = array<i32>} : memref<16x128xbf16, #tpu.memory_space<vmem>>, vector<4x128xbf16>,
    %c360_384 = arith.constant 360 : index
    %c0_385 = arith.constant 0 : index
    %349 = vector.load %arg9[%c360_384, %c0_385] : memref<400x128xbf16, #tpu.memory_space<vmem>>, vector<4x128xbf16>
    %c8_386 = arith.constant 8 : index
    %c0_387 = arith.constant 0 : index
    %350 = vector.load %arg10[%c8_386, %c0_387] : memref<16x128xbf16, #tpu.memory_space<vmem>>, vector<4x128xbf16>
    tpu.vector_store %arg10[%c8_386, %c0_387], %349 {strides = array<i32>} : memref<16x128xbf16, #tpu.memory_space<vmem>>, vector<4x128xbf16>,
    %c365_388 = arith.constant 365 : index
    %c0_389 = arith.constant 0 : index
    %351 = vector.load %arg9[%c365_388, %c0_389] : memref<400x128xbf16, #tpu.memory_space<vmem>>, vector<4x128xbf16>
    %c12_390 = arith.constant 12 : index
    %c0_391 = arith.constant 0 : index
    %352 = vector.load %arg10[%c12_390, %c0_391] : memref<16x128xbf16, #tpu.memory_space<vmem>>, vector<4x128xbf16>
    tpu.vector_store %arg10[%c12_390, %c0_391], %351 {strides = array<i32>} : memref<16x128xbf16, #tpu.memory_space<vmem>>, vector<4x128xbf16>,
    %c0_392 = arith.constant 0 : index
    %c0_393 = arith.constant 0 : index
    %353 = vector.load %arg10[%c0_392, %c0_393] : memref<16x128xbf16, #tpu.memory_space<vmem>>, vector<16x128xbf16>
    %c2176 = arith.constant 2176 : index
    %c0_394 = arith.constant 0 : index
    %354 = vector.load %arg4[%c2176, %c0_394] : memref<3200x128xbf16, #tpu.memory_space<vmem>>, vector<128x128xbf16>
    %cst_395 = arith.constant dense<0.000000e+00> : vector<16x128xf32>
    %355 = tpu.matmul %353, %354, %cst_395 {dimension_numbers = #tpu.dot_dimension_numbers<[1], [0], [0], [1], [0, 0, 1, 1], [], []>} : vector<16x128xbf16>, vector<128x128xbf16>, vector<16x128xf32> -> vector<16x128xf32>
    %356 = arith.addf %344, %355 : vector<16x128xf32>
    %c375_396 = arith.constant 375 : index
    %c0_397 = arith.constant 0 : index
    %357 = vector.load %arg9[%c375_396, %c0_397] : memref<400x128xbf16, #tpu.memory_space<vmem>>, vector<4x128xbf16>
    %c0_398 = arith.constant 0 : index
    %c0_399 = arith.constant 0 : index
    %358 = vector.load %arg10[%c0_398, %c0_399] : memref<16x128xbf16, #tpu.memory_space<vmem>>, vector<4x128xbf16>
    tpu.vector_store %arg10[%c0_398, %c0_399], %357 {strides = array<i32>} : memref<16x128xbf16, #tpu.memory_space<vmem>>, vector<4x128xbf16>,
    %c380_400 = arith.constant 380 : index
    %c0_401 = arith.constant 0 : index
    %359 = vector.load %arg9[%c380_400, %c0_401] : memref<400x128xbf16, #tpu.memory_space<vmem>>, vector<4x128xbf16>
    %c4_402 = arith.constant 4 : index
    %c0_403 = arith.constant 0 : index
    %360 = vector.load %arg10[%c4_402, %c0_403] : memref<16x128xbf16, #tpu.memory_space<vmem>>, vector<4x128xbf16>
    tpu.vector_store %arg10[%c4_402, %c0_403], %359 {strides = array<i32>} : memref<16x128xbf16, #tpu.memory_space<vmem>>, vector<4x128xbf16>,
    %c385_404 = arith.constant 385 : index
    %c0_405 = arith.constant 0 : index
    %361 = vector.load %arg9[%c385_404, %c0_405] : memref<400x128xbf16, #tpu.memory_space<vmem>>, vector<4x128xbf16>
    %c8_406 = arith.constant 8 : index
    %c0_407 = arith.constant 0 : index
    %362 = vector.load %arg10[%c8_406, %c0_407] : memref<16x128xbf16, #tpu.memory_space<vmem>>, vector<4x128xbf16>
    tpu.vector_store %arg10[%c8_406, %c0_407], %361 {strides = array<i32>} : memref<16x128xbf16, #tpu.memory_space<vmem>>, vector<4x128xbf16>,
    %c390_408 = arith.constant 390 : index
    %c0_409 = arith.constant 0 : index
    %363 = vector.load %arg9[%c390_408, %c0_409] : memref<400x128xbf16, #tpu.memory_space<vmem>>, vector<4x128xbf16>
    %c12_410 = arith.constant 12 : index
    %c0_411 = arith.constant 0 : index
    %364 = vector.load %arg10[%c12_410, %c0_411] : memref<16x128xbf16, #tpu.memory_space<vmem>>, vector<4x128xbf16>
    tpu.vector_store %arg10[%c12_410, %c0_411], %363 {strides = array<i32>} : memref<16x128xbf16, #tpu.memory_space<vmem>>, vector<4x128xbf16>,
    %c0_412 = arith.constant 0 : index
    %c0_413 = arith.constant 0 : index
    %365 = vector.load %arg10[%c0_412, %c0_413] : memref<16x128xbf16, #tpu.memory_space<vmem>>, vector<16x128xbf16>
    %c2304 = arith.constant 2304 : index
    %c0_414 = arith.constant 0 : index
    %366 = vector.load %arg4[%c2304, %c0_414] : memref<3200x128xbf16, #tpu.memory_space<vmem>>, vector<128x128xbf16>
    %cst_415 = arith.constant dense<0.000000e+00> : vector<16x128xf32>
    %367 = tpu.matmul %365, %366, %cst_415 {dimension_numbers = #tpu.dot_dimension_numbers<[1], [0], [0], [1], [0, 0, 1, 1], [], []>} : vector<16x128xbf16>, vector<128x128xbf16>, vector<16x128xf32> -> vector<16x128xf32>
    %368 = arith.addf %356, %367 : vector<16x128xf32>
    %c301_416 = arith.constant 301 : index
    %c0_417 = arith.constant 0 : index
    %369 = vector.load %arg9[%c301_416, %c0_417] : memref<400x128xbf16, #tpu.memory_space<vmem>>, vector<4x128xbf16>
    %c0_418 = arith.constant 0 : index
    %c0_419 = arith.constant 0 : index
    %370 = vector.load %arg10[%c0_418, %c0_419] : memref<16x128xbf16, #tpu.memory_space<vmem>>, vector<4x128xbf16>
    tpu.vector_store %arg10[%c0_418, %c0_419], %369 {strides = array<i32>} : memref<16x128xbf16, #tpu.memory_space<vmem>>, vector<4x128xbf16>,
    %c306_420 = arith.constant 306 : index
    %c0_421 = arith.constant 0 : index
    %371 = vector.load %arg9[%c306_420, %c0_421] : memref<400x128xbf16, #tpu.memory_space<vmem>>, vector<4x128xbf16>
    %c4_422 = arith.constant 4 : index
    %c0_423 = arith.constant 0 : index
    %372 = vector.load %arg10[%c4_422, %c0_423] : memref<16x128xbf16, #tpu.memory_space<vmem>>, vector<4x128xbf16>
    tpu.vector_store %arg10[%c4_422, %c0_423], %371 {strides = array<i32>} : memref<16x128xbf16, #tpu.memory_space<vmem>>, vector<4x128xbf16>,
    %c311_424 = arith.constant 311 : index
    %c0_425 = arith.constant 0 : index
    %373 = vector.load %arg9[%c311_424, %c0_425] : memref<400x128xbf16, #tpu.memory_space<vmem>>, vector<4x128xbf16>
    %c8_426 = arith.constant 8 : index
    %c0_427 = arith.constant 0 : index
    %374 = vector.load %arg10[%c8_426, %c0_427] : memref<16x128xbf16, #tpu.memory_space<vmem>>, vector<4x128xbf16>
    tpu.vector_store %arg10[%c8_426, %c0_427], %373 {strides = array<i32>} : memref<16x128xbf16, #tpu.memory_space<vmem>>, vector<4x128xbf16>,
    %c316_428 = arith.constant 316 : index
    %c0_429 = arith.constant 0 : index
    %375 = vector.load %arg9[%c316_428, %c0_429] : memref<400x128xbf16, #tpu.memory_space<vmem>>, vector<4x128xbf16>
    %c12_430 = arith.constant 12 : index
    %c0_431 = arith.constant 0 : index
    %376 = vector.load %arg10[%c12_430, %c0_431] : memref<16x128xbf16, #tpu.memory_space<vmem>>, vector<4x128xbf16>
    tpu.vector_store %arg10[%c12_430, %c0_431], %375 {strides = array<i32>} : memref<16x128xbf16, #tpu.memory_space<vmem>>, vector<4x128xbf16>,
    %c0_432 = arith.constant 0 : index
    %c0_433 = arith.constant 0 : index
    %377 = vector.load %arg10[%c0_432, %c0_433] : memref<16x128xbf16, #tpu.memory_space<vmem>>, vector<16x128xbf16>
    %c2432 = arith.constant 2432 : index
    %c0_434 = arith.constant 0 : index
    %378 = vector.load %arg4[%c2432, %c0_434] : memref<3200x128xbf16, #tpu.memory_space<vmem>>, vector<128x128xbf16>
    %cst_435 = arith.constant dense<0.000000e+00> : vector<16x128xf32>
    %379 = tpu.matmul %377, %378, %cst_435 {dimension_numbers = #tpu.dot_dimension_numbers<[1], [0], [0], [1], [0, 0, 1, 1], [], []>} : vector<16x128xbf16>, vector<128x128xbf16>, vector<16x128xf32> -> vector<16x128xf32>
    %380 = arith.addf %368, %379 : vector<16x128xf32>
    %c5_436 = arith.constant 5 : index
    %c0_437 = arith.constant 0 : index
    %381 = vector.load %arg9[%c5_436, %c0_437] : memref<400x128xbf16, #tpu.memory_space<vmem>>, vector<4x128xbf16>
    %c0_438 = arith.constant 0 : index
    %c0_439 = arith.constant 0 : index
    %382 = vector.load %arg10[%c0_438, %c0_439] : memref<16x128xbf16, #tpu.memory_space<vmem>>, vector<4x128xbf16>
    tpu.vector_store %arg10[%c0_438, %c0_439], %381 {strides = array<i32>} : memref<16x128xbf16, #tpu.memory_space<vmem>>, vector<4x128xbf16>,
    %c10_440 = arith.constant 10 : index
    %c0_441 = arith.constant 0 : index
    %383 = vector.load %arg9[%c10_440, %c0_441] : memref<400x128xbf16, #tpu.memory_space<vmem>>, vector<4x128xbf16>
    %c4_442 = arith.constant 4 : index
    %c0_443 = arith.constant 0 : index
    %384 = vector.load %arg10[%c4_442, %c0_443] : memref<16x128xbf16, #tpu.memory_space<vmem>>, vector<4x128xbf16>
    tpu.vector_store %arg10[%c4_442, %c0_443], %383 {strides = array<i32>} : memref<16x128xbf16, #tpu.memory_space<vmem>>, vector<4x128xbf16>,
    %c15_444 = arith.constant 15 : index
    %c0_445 = arith.constant 0 : index
    %385 = vector.load %arg9[%c15_444, %c0_445] : memref<400x128xbf16, #tpu.memory_space<vmem>>, vector<4x128xbf16>
    %c8_446 = arith.constant 8 : index
    %c0_447 = arith.constant 0 : index
    %386 = vector.load %arg10[%c8_446, %c0_447] : memref<16x128xbf16, #tpu.memory_space<vmem>>, vector<4x128xbf16>
    tpu.vector_store %arg10[%c8_446, %c0_447], %385 {strides = array<i32>} : memref<16x128xbf16, #tpu.memory_space<vmem>>, vector<4x128xbf16>,
    %c20 = arith.constant 20 : index
    %c0_448 = arith.constant 0 : index
    %387 = vector.load %arg9[%c20, %c0_448] : memref<400x128xbf16, #tpu.memory_space<vmem>>, vector<4x128xbf16>
    %c12_449 = arith.constant 12 : index
    %c0_450 = arith.constant 0 : index
    %388 = vector.load %arg10[%c12_449, %c0_450] : memref<16x128xbf16, #tpu.memory_space<vmem>>, vector<4x128xbf16>
    tpu.vector_store %arg10[%c12_449, %c0_450], %387 {strides = array<i32>} : memref<16x128xbf16, #tpu.memory_space<vmem>>, vector<4x128xbf16>,
    %c0_451 = arith.constant 0 : index
    %c0_452 = arith.constant 0 : index
    %389 = vector.load %arg10[%c0_451, %c0_452] : memref<16x128xbf16, #tpu.memory_space<vmem>>, vector<16x128xbf16>
    %c2560 = arith.constant 2560 : index
    %c0_453 = arith.constant 0 : index
    %390 = vector.load %arg4[%c2560, %c0_453] : memref<3200x128xbf16, #tpu.memory_space<vmem>>, vector<128x128xbf16>
    %cst_454 = arith.constant dense<0.000000e+00> : vector<16x128xf32>
    %391 = tpu.matmul %389, %390, %cst_454 {dimension_numbers = #tpu.dot_dimension_numbers<[1], [0], [0], [1], [0, 0, 1, 1], [], []>} : vector<16x128xbf16>, vector<128x128xbf16>, vector<16x128xf32> -> vector<16x128xf32>
    %392 = arith.addf %380, %391 : vector<16x128xf32>
    %c30_455 = arith.constant 30 : index
    %c0_456 = arith.constant 0 : index
    %393 = vector.load %arg9[%c30_455, %c0_456] : memref<400x128xbf16, #tpu.memory_space<vmem>>, vector<4x128xbf16>
    %c0_457 = arith.constant 0 : index
    %c0_458 = arith.constant 0 : index
    %394 = vector.load %arg10[%c0_457, %c0_458] : memref<16x128xbf16, #tpu.memory_space<vmem>>, vector<4x128xbf16>
    tpu.vector_store %arg10[%c0_457, %c0_458], %393 {strides = array<i32>} : memref<16x128xbf16, #tpu.memory_space<vmem>>, vector<4x128xbf16>,
    %c35_459 = arith.constant 35 : index
    %c0_460 = arith.constant 0 : index
    %395 = vector.load %arg9[%c35_459, %c0_460] : memref<400x128xbf16, #tpu.memory_space<vmem>>, vector<4x128xbf16>
    %c4_461 = arith.constant 4 : index
    %c0_462 = arith.constant 0 : index
    %396 = vector.load %arg10[%c4_461, %c0_462] : memref<16x128xbf16, #tpu.memory_space<vmem>>, vector<4x128xbf16>
    tpu.vector_store %arg10[%c4_461, %c0_462], %395 {strides = array<i32>} : memref<16x128xbf16, #tpu.memory_space<vmem>>, vector<4x128xbf16>,
    %c40_463 = arith.constant 40 : index
    %c0_464 = arith.constant 0 : index
    %397 = vector.load %arg9[%c40_463, %c0_464] : memref<400x128xbf16, #tpu.memory_space<vmem>>, vector<4x128xbf16>
    %c8_465 = arith.constant 8 : index
    %c0_466 = arith.constant 0 : index
    %398 = vector.load %arg10[%c8_465, %c0_466] : memref<16x128xbf16, #tpu.memory_space<vmem>>, vector<4x128xbf16>
    tpu.vector_store %arg10[%c8_465, %c0_466], %397 {strides = array<i32>} : memref<16x128xbf16, #tpu.memory_space<vmem>>, vector<4x128xbf16>,
    %c45 = arith.constant 45 : index
    %c0_467 = arith.constant 0 : index
    %399 = vector.load %arg9[%c45, %c0_467] : memref<400x128xbf16, #tpu.memory_space<vmem>>, vector<4x128xbf16>
    %c12_468 = arith.constant 12 : index
    %c0_469 = arith.constant 0 : index
    %400 = vector.load %arg10[%c12_468, %c0_469] : memref<16x128xbf16, #tpu.memory_space<vmem>>, vector<4x128xbf16>
    tpu.vector_store %arg10[%c12_468, %c0_469], %399 {strides = array<i32>} : memref<16x128xbf16, #tpu.memory_space<vmem>>, vector<4x128xbf16>,
    %c0_470 = arith.constant 0 : index
    %c0_471 = arith.constant 0 : index
    %401 = vector.load %arg10[%c0_470, %c0_471] : memref<16x128xbf16, #tpu.memory_space<vmem>>, vector<16x128xbf16>
    %c2688 = arith.constant 2688 : index
    %c0_472 = arith.constant 0 : index
    %402 = vector.load %arg4[%c2688, %c0_472] : memref<3200x128xbf16, #tpu.memory_space<vmem>>, vector<128x128xbf16>
    %cst_473 = arith.constant dense<0.000000e+00> : vector<16x128xf32>
    %403 = tpu.matmul %401, %402, %cst_473 {dimension_numbers = #tpu.dot_dimension_numbers<[1], [0], [0], [1], [0, 0, 1, 1], [], []>} : vector<16x128xbf16>, vector<128x128xbf16>, vector<16x128xf32> -> vector<16x128xf32>
    %404 = arith.addf %392, %403 : vector<16x128xf32>
    %c55_474 = arith.constant 55 : index
    %c0_475 = arith.constant 0 : index
    %405 = vector.load %arg9[%c55_474, %c0_475] : memref<400x128xbf16, #tpu.memory_space<vmem>>, vector<4x128xbf16>
    %c0_476 = arith.constant 0 : index
    %c0_477 = arith.constant 0 : index
    %406 = vector.load %arg10[%c0_476, %c0_477] : memref<16x128xbf16, #tpu.memory_space<vmem>>, vector<4x128xbf16>
    tpu.vector_store %arg10[%c0_476, %c0_477], %405 {strides = array<i32>} : memref<16x128xbf16, #tpu.memory_space<vmem>>, vector<4x128xbf16>,
    %c60_478 = arith.constant 60 : index
    %c0_479 = arith.constant 0 : index
    %407 = vector.load %arg9[%c60_478, %c0_479] : memref<400x128xbf16, #tpu.memory_space<vmem>>, vector<4x128xbf16>
    %c4_480 = arith.constant 4 : index
    %c0_481 = arith.constant 0 : index
    %408 = vector.load %arg10[%c4_480, %c0_481] : memref<16x128xbf16, #tpu.memory_space<vmem>>, vector<4x128xbf16>
    tpu.vector_store %arg10[%c4_480, %c0_481], %407 {strides = array<i32>} : memref<16x128xbf16, #tpu.memory_space<vmem>>, vector<4x128xbf16>,
    %c65_482 = arith.constant 65 : index
    %c0_483 = arith.constant 0 : index
    %409 = vector.load %arg9[%c65_482, %c0_483] : memref<400x128xbf16, #tpu.memory_space<vmem>>, vector<4x128xbf16>
    %c8_484 = arith.constant 8 : index
    %c0_485 = arith.constant 0 : index
    %410 = vector.load %arg10[%c8_484, %c0_485] : memref<16x128xbf16, #tpu.memory_space<vmem>>, vector<4x128xbf16>
    tpu.vector_store %arg10[%c8_484, %c0_485], %409 {strides = array<i32>} : memref<16x128xbf16, #tpu.memory_space<vmem>>, vector<4x128xbf16>,
    %c70_486 = arith.constant 70 : index
    %c0_487 = arith.constant 0 : index
    %411 = vector.load %arg9[%c70_486, %c0_487] : memref<400x128xbf16, #tpu.memory_space<vmem>>, vector<4x128xbf16>
    %c12_488 = arith.constant 12 : index
    %c0_489 = arith.constant 0 : index
    %412 = vector.load %arg10[%c12_488, %c0_489] : memref<16x128xbf16, #tpu.memory_space<vmem>>, vector<4x128xbf16>
    tpu.vector_store %arg10[%c12_488, %c0_489], %411 {strides = array<i32>} : memref<16x128xbf16, #tpu.memory_space<vmem>>, vector<4x128xbf16>,
    %c0_490 = arith.constant 0 : index
    %c0_491 = arith.constant 0 : index
    %413 = vector.load %arg10[%c0_490, %c0_491] : memref<16x128xbf16, #tpu.memory_space<vmem>>, vector<16x128xbf16>
    %c2816 = arith.constant 2816 : index
    %c0_492 = arith.constant 0 : index
    %414 = vector.load %arg4[%c2816, %c0_492] : memref<3200x128xbf16, #tpu.memory_space<vmem>>, vector<128x128xbf16>
    %cst_493 = arith.constant dense<0.000000e+00> : vector<16x128xf32>
    %415 = tpu.matmul %413, %414, %cst_493 {dimension_numbers = #tpu.dot_dimension_numbers<[1], [0], [0], [1], [0, 0, 1, 1], [], []>} : vector<16x128xbf16>, vector<128x128xbf16>, vector<16x128xf32> -> vector<16x128xf32>
    %416 = arith.addf %404, %415 : vector<16x128xf32>
    %c80_494 = arith.constant 80 : index
    %c0_495 = arith.constant 0 : index
    %417 = vector.load %arg9[%c80_494, %c0_495] : memref<400x128xbf16, #tpu.memory_space<vmem>>, vector<4x128xbf16>
    %c0_496 = arith.constant 0 : index
    %c0_497 = arith.constant 0 : index
    %418 = vector.load %arg10[%c0_496, %c0_497] : memref<16x128xbf16, #tpu.memory_space<vmem>>, vector<4x128xbf16>
    tpu.vector_store %arg10[%c0_496, %c0_497], %417 {strides = array<i32>} : memref<16x128xbf16, #tpu.memory_space<vmem>>, vector<4x128xbf16>,
    %c85_498 = arith.constant 85 : index
    %c0_499 = arith.constant 0 : index
    %419 = vector.load %arg9[%c85_498, %c0_499] : memref<400x128xbf16, #tpu.memory_space<vmem>>, vector<4x128xbf16>
    %c4_500 = arith.constant 4 : index
    %c0_501 = arith.constant 0 : index
    %420 = vector.load %arg10[%c4_500, %c0_501] : memref<16x128xbf16, #tpu.memory_space<vmem>>, vector<4x128xbf16>
    tpu.vector_store %arg10[%c4_500, %c0_501], %419 {strides = array<i32>} : memref<16x128xbf16, #tpu.memory_space<vmem>>, vector<4x128xbf16>,
    %c90_502 = arith.constant 90 : index
    %c0_503 = arith.constant 0 : index
    %421 = vector.load %arg9[%c90_502, %c0_503] : memref<400x128xbf16, #tpu.memory_space<vmem>>, vector<4x128xbf16>
    %c8_504 = arith.constant 8 : index
    %c0_505 = arith.constant 0 : index
    %422 = vector.load %arg10[%c8_504, %c0_505] : memref<16x128xbf16, #tpu.memory_space<vmem>>, vector<4x128xbf16>
    tpu.vector_store %arg10[%c8_504, %c0_505], %421 {strides = array<i32>} : memref<16x128xbf16, #tpu.memory_space<vmem>>, vector<4x128xbf16>,
    %c95_506 = arith.constant 95 : index
    %c0_507 = arith.constant 0 : index
    %423 = vector.load %arg9[%c95_506, %c0_507] : memref<400x128xbf16, #tpu.memory_space<vmem>>, vector<4x128xbf16>
    %c12_508 = arith.constant 12 : index
    %c0_509 = arith.constant 0 : index
    %424 = vector.load %arg10[%c12_508, %c0_509] : memref<16x128xbf16, #tpu.memory_space<vmem>>, vector<4x128xbf16>
    tpu.vector_store %arg10[%c12_508, %c0_509], %423 {strides = array<i32>} : memref<16x128xbf16, #tpu.memory_space<vmem>>, vector<4x128xbf16>,
    %c0_510 = arith.constant 0 : index
    %c0_511 = arith.constant 0 : index
    %425 = vector.load %arg10[%c0_510, %c0_511] : memref<16x128xbf16, #tpu.memory_space<vmem>>, vector<16x128xbf16>
    %c2944 = arith.constant 2944 : index
    %c0_512 = arith.constant 0 : index
    %426 = vector.load %arg4[%c2944, %c0_512] : memref<3200x128xbf16, #tpu.memory_space<vmem>>, vector<128x128xbf16>
    %cst_513 = arith.constant dense<0.000000e+00> : vector<16x128xf32>
    %427 = tpu.matmul %425, %426, %cst_513 {dimension_numbers = #tpu.dot_dimension_numbers<[1], [0], [0], [1], [0, 0, 1, 1], [], []>} : vector<16x128xbf16>, vector<128x128xbf16>, vector<16x128xf32> -> vector<16x128xf32>
    %428 = arith.addf %416, %427 : vector<16x128xf32>
    %c6_514 = arith.constant 6 : index
    %c0_515 = arith.constant 0 : index
    %429 = vector.load %arg9[%c6_514, %c0_515] : memref<400x128xbf16, #tpu.memory_space<vmem>>, vector<4x128xbf16>
    %c0_516 = arith.constant 0 : index
    %c0_517 = arith.constant 0 : index
    %430 = vector.load %arg10[%c0_516, %c0_517] : memref<16x128xbf16, #tpu.memory_space<vmem>>, vector<4x128xbf16>
    tpu.vector_store %arg10[%c0_516, %c0_517], %429 {strides = array<i32>} : memref<16x128xbf16, #tpu.memory_space<vmem>>, vector<4x128xbf16>,
    %c11_518 = arith.constant 11 : index
    %c0_519 = arith.constant 0 : index
    %431 = vector.load %arg9[%c11_518, %c0_519] : memref<400x128xbf16, #tpu.memory_space<vmem>>, vector<4x128xbf16>
    %c4_520 = arith.constant 4 : index
    %c0_521 = arith.constant 0 : index
    %432 = vector.load %arg10[%c4_520, %c0_521] : memref<16x128xbf16, #tpu.memory_space<vmem>>, vector<4x128xbf16>
    tpu.vector_store %arg10[%c4_520, %c0_521], %431 {strides = array<i32>} : memref<16x128xbf16, #tpu.memory_space<vmem>>, vector<4x128xbf16>,
    %c16_522 = arith.constant 16 : index
    %c0_523 = arith.constant 0 : index
    %433 = vector.load %arg9[%c16_522, %c0_523] : memref<400x128xbf16, #tpu.memory_space<vmem>>, vector<4x128xbf16>
    %c8_524 = arith.constant 8 : index
    %c0_525 = arith.constant 0 : index
    %434 = vector.load %arg10[%c8_524, %c0_525] : memref<16x128xbf16, #tpu.memory_space<vmem>>, vector<4x128xbf16>
    tpu.vector_store %arg10[%c8_524, %c0_525], %433 {strides = array<i32>} : memref<16x128xbf16, #tpu.memory_space<vmem>>, vector<4x128xbf16>,
    %c21_526 = arith.constant 21 : index
    %c0_527 = arith.constant 0 : index
    %435 = vector.load %arg9[%c21_526, %c0_527] : memref<400x128xbf16, #tpu.memory_space<vmem>>, vector<4x128xbf16>
    %c12_528 = arith.constant 12 : index
    %c0_529 = arith.constant 0 : index
    %436 = vector.load %arg10[%c12_528, %c0_529] : memref<16x128xbf16, #tpu.memory_space<vmem>>, vector<4x128xbf16>
    tpu.vector_store %arg10[%c12_528, %c0_529], %435 {strides = array<i32>} : memref<16x128xbf16, #tpu.memory_space<vmem>>, vector<4x128xbf16>,
    %c0_530 = arith.constant 0 : index
    %c0_531 = arith.constant 0 : index
    %437 = vector.load %arg10[%c0_530, %c0_531] : memref<16x128xbf16, #tpu.memory_space<vmem>>, vector<16x128xbf16>
    %c3072 = arith.constant 3072 : index
    %c0_532 = arith.constant 0 : index
    %438 = vector.load %arg4[%c3072, %c0_532] : memref<3200x128xbf16, #tpu.memory_space<vmem>>, vector<128x128xbf16>
    %cst_533 = arith.constant dense<0.000000e+00> : vector<16x128xf32>
    %439 = tpu.matmul %437, %438, %cst_533 {dimension_numbers = #tpu.dot_dimension_numbers<[1], [0], [0], [1], [0, 0, 1, 1], [], []>} : vector<16x128xbf16>, vector<128x128xbf16>, vector<16x128xf32> -> vector<16x128xf32>
    %440 = arith.addf %428, %439 : vector<16x128xf32>
    %c0_534 = arith.constant 0 : index
    %c0_535 = arith.constant 0 : index
    %441 = vector.load %arg5[%c0_534, %c0_535] : memref<1x128xf32, #tpu.memory_space<vmem>>, vector<1x128xf32>
    %442 = vector.broadcast %441 : vector<1x128xf32> to vector<16x128xf32>
    %443 = arith.addf %440, %442 : vector<16x128xf32>
    %cst_536 = arith.constant 0.000000e+00 : f32
    %444 = vector.broadcast %cst_536 : f32 to vector<16x128xf32>
    %445 = arith.maximumf %443, %444 : vector<16x128xf32>
    %446 = arith.truncf %445 : vector<16x128xf32> to vector<16x128xbf16>
    %cst_537 = arith.constant 0.000000e+00 : f32
    %447 = vector.broadcast %cst_537 : f32 to vector<1x128xf32>
    %448 = vector.extract_strided_slice %446 {offsets = [0, 0], sizes = [1, 128], strides = [1, 1]} : vector<16x128xbf16> to vector<1x128xbf16>
    %c0_538 = arith.constant 0 : index
    %c0_539 = arith.constant 0 : index
    %449 = vector.load %arg6[%c0_538, %c0_539] : memref<2048x128xbf16, #tpu.memory_space<vmem>>, vector<128x128xbf16>
    %cst_540 = arith.constant dense<0.000000e+00> : vector<1x128xf32>
    %450 = tpu.matmul %448, %449, %cst_540 {dimension_numbers = #tpu.dot_dimension_numbers<[1], [0], [0], [1], [0, 0, 1, 1], [], []>} : vector<1x128xbf16>, vector<128x128xbf16>, vector<1x128xf32> -> vector<1x128xf32>
    %451 = arith.addf %447, %450 : vector<1x128xf32>
    %452 = vector.extract_strided_slice %446 {offsets = [1, 0], sizes = [1, 128], strides = [1, 1]} : vector<16x128xbf16> to vector<1x128xbf16>
    %c128_541 = arith.constant 128 : index
    %c0_542 = arith.constant 0 : index
    %453 = vector.load %arg6[%c128_541, %c0_542] : memref<2048x128xbf16, #tpu.memory_space<vmem>>, vector<128x128xbf16>
    %cst_543 = arith.constant dense<0.000000e+00> : vector<1x128xf32>
    %454 = tpu.matmul %452, %453, %cst_543 {dimension_numbers = #tpu.dot_dimension_numbers<[1], [0], [0], [1], [0, 0, 1, 1], [], []>} : vector<1x128xbf16>, vector<128x128xbf16>, vector<1x128xf32> -> vector<1x128xf32>
    %455 = arith.addf %451, %454 : vector<1x128xf32>
    %456 = vector.extract_strided_slice %446 {offsets = [2, 0], sizes = [1, 128], strides = [1, 1]} : vector<16x128xbf16> to vector<1x128xbf16>
    %c256_544 = arith.constant 256 : index
    %c0_545 = arith.constant 0 : index
    %457 = vector.load %arg6[%c256_544, %c0_545] : memref<2048x128xbf16, #tpu.memory_space<vmem>>, vector<128x128xbf16>
    %cst_546 = arith.constant dense<0.000000e+00> : vector<1x128xf32>
    %458 = tpu.matmul %456, %457, %cst_546 {dimension_numbers = #tpu.dot_dimension_numbers<[1], [0], [0], [1], [0, 0, 1, 1], [], []>} : vector<1x128xbf16>, vector<128x128xbf16>, vector<1x128xf32> -> vector<1x128xf32>
    %459 = arith.addf %455, %458 : vector<1x128xf32>
    %460 = vector.extract_strided_slice %446 {offsets = [3, 0], sizes = [1, 128], strides = [1, 1]} : vector<16x128xbf16> to vector<1x128xbf16>
    %c384_547 = arith.constant 384 : index
    %c0_548 = arith.constant 0 : index
    %461 = vector.load %arg6[%c384_547, %c0_548] : memref<2048x128xbf16, #tpu.memory_space<vmem>>, vector<128x128xbf16>
    %cst_549 = arith.constant dense<0.000000e+00> : vector<1x128xf32>
    %462 = tpu.matmul %460, %461, %cst_549 {dimension_numbers = #tpu.dot_dimension_numbers<[1], [0], [0], [1], [0, 0, 1, 1], [], []>} : vector<1x128xbf16>, vector<128x128xbf16>, vector<1x128xf32> -> vector<1x128xf32>
    %463 = arith.addf %459, %462 : vector<1x128xf32>
    %464 = vector.extract_strided_slice %446 {offsets = [4, 0], sizes = [1, 128], strides = [1, 1]} : vector<16x128xbf16> to vector<1x128xbf16>
    %c512_550 = arith.constant 512 : index
    %c0_551 = arith.constant 0 : index
    %465 = vector.load %arg6[%c512_550, %c0_551] : memref<2048x128xbf16, #tpu.memory_space<vmem>>, vector<128x128xbf16>
    %cst_552 = arith.constant dense<0.000000e+00> : vector<1x128xf32>
    %466 = tpu.matmul %464, %465, %cst_552 {dimension_numbers = #tpu.dot_dimension_numbers<[1], [0], [0], [1], [0, 0, 1, 1], [], []>} : vector<1x128xbf16>, vector<128x128xbf16>, vector<1x128xf32> -> vector<1x128xf32>
    %467 = arith.addf %463, %466 : vector<1x128xf32>
    %468 = vector.extract_strided_slice %446 {offsets = [5, 0], sizes = [1, 128], strides = [1, 1]} : vector<16x128xbf16> to vector<1x128xbf16>
    %c640_553 = arith.constant 640 : index
    %c0_554 = arith.constant 0 : index
    %469 = vector.load %arg6[%c640_553, %c0_554] : memref<2048x128xbf16, #tpu.memory_space<vmem>>, vector<128x128xbf16>
    %cst_555 = arith.constant dense<0.000000e+00> : vector<1x128xf32>
    %470 = tpu.matmul %468, %469, %cst_555 {dimension_numbers = #tpu.dot_dimension_numbers<[1], [0], [0], [1], [0, 0, 1, 1], [], []>} : vector<1x128xbf16>, vector<128x128xbf16>, vector<1x128xf32> -> vector<1x128xf32>
    %471 = arith.addf %467, %470 : vector<1x128xf32>
    %472 = vector.extract_strided_slice %446 {offsets = [6, 0], sizes = [1, 128], strides = [1, 1]} : vector<16x128xbf16> to vector<1x128xbf16>
    %c768_556 = arith.constant 768 : index
    %c0_557 = arith.constant 0 : index
    %473 = vector.load %arg6[%c768_556, %c0_557] : memref<2048x128xbf16, #tpu.memory_space<vmem>>, vector<128x128xbf16>
    %cst_558 = arith.constant dense<0.000000e+00> : vector<1x128xf32>
    %474 = tpu.matmul %472, %473, %cst_558 {dimension_numbers = #tpu.dot_dimension_numbers<[1], [0], [0], [1], [0, 0, 1, 1], [], []>} : vector<1x128xbf16>, vector<128x128xbf16>, vector<1x128xf32> -> vector<1x128xf32>
    %475 = arith.addf %471, %474 : vector<1x128xf32>
    %476 = vector.extract_strided_slice %446 {offsets = [7, 0], sizes = [1, 128], strides = [1, 1]} : vector<16x128xbf16> to vector<1x128xbf16>
    %c896_559 = arith.constant 896 : index
    %c0_560 = arith.constant 0 : index
    %477 = vector.load %arg6[%c896_559, %c0_560] : memref<2048x128xbf16, #tpu.memory_space<vmem>>, vector<128x128xbf16>
    %cst_561 = arith.constant dense<0.000000e+00> : vector<1x128xf32>
    %478 = tpu.matmul %476, %477, %cst_561 {dimension_numbers = #tpu.dot_dimension_numbers<[1], [0], [0], [1], [0, 0, 1, 1], [], []>} : vector<1x128xbf16>, vector<128x128xbf16>, vector<1x128xf32> -> vector<1x128xf32>
    %479 = arith.addf %475, %478 : vector<1x128xf32>
    %480 = vector.extract_strided_slice %446 {offsets = [8, 0], sizes = [1, 128], strides = [1, 1]} : vector<16x128xbf16> to vector<1x128xbf16>
    %c1024_562 = arith.constant 1024 : index
    %c0_563 = arith.constant 0 : index
    %481 = vector.load %arg6[%c1024_562, %c0_563] : memref<2048x128xbf16, #tpu.memory_space<vmem>>, vector<128x128xbf16>
    %cst_564 = arith.constant dense<0.000000e+00> : vector<1x128xf32>
    %482 = tpu.matmul %480, %481, %cst_564 {dimension_numbers = #tpu.dot_dimension_numbers<[1], [0], [0], [1], [0, 0, 1, 1], [], []>} : vector<1x128xbf16>, vector<128x128xbf16>, vector<1x128xf32> -> vector<1x128xf32>
    %483 = arith.addf %479, %482 : vector<1x128xf32>
    %484 = vector.extract_strided_slice %446 {offsets = [9, 0], sizes = [1, 128], strides = [1, 1]} : vector<16x128xbf16> to vector<1x128xbf16>
    %c1152_565 = arith.constant 1152 : index
    %c0_566 = arith.constant 0 : index
    %485 = vector.load %arg6[%c1152_565, %c0_566] : memref<2048x128xbf16, #tpu.memory_space<vmem>>, vector<128x128xbf16>
    %cst_567 = arith.constant dense<0.000000e+00> : vector<1x128xf32>
    %486 = tpu.matmul %484, %485, %cst_567 {dimension_numbers = #tpu.dot_dimension_numbers<[1], [0], [0], [1], [0, 0, 1, 1], [], []>} : vector<1x128xbf16>, vector<128x128xbf16>, vector<1x128xf32> -> vector<1x128xf32>
    %487 = arith.addf %483, %486 : vector<1x128xf32>
    %488 = vector.extract_strided_slice %446 {offsets = [10, 0], sizes = [1, 128], strides = [1, 1]} : vector<16x128xbf16> to vector<1x128xbf16>
    %c1280_568 = arith.constant 1280 : index
    %c0_569 = arith.constant 0 : index
    %489 = vector.load %arg6[%c1280_568, %c0_569] : memref<2048x128xbf16, #tpu.memory_space<vmem>>, vector<128x128xbf16>
    %cst_570 = arith.constant dense<0.000000e+00> : vector<1x128xf32>
    %490 = tpu.matmul %488, %489, %cst_570 {dimension_numbers = #tpu.dot_dimension_numbers<[1], [0], [0], [1], [0, 0, 1, 1], [], []>} : vector<1x128xbf16>, vector<128x128xbf16>, vector<1x128xf32> -> vector<1x128xf32>
    %491 = arith.addf %487, %490 : vector<1x128xf32>
    %492 = vector.extract_strided_slice %446 {offsets = [11, 0], sizes = [1, 128], strides = [1, 1]} : vector<16x128xbf16> to vector<1x128xbf16>
    %c1408_571 = arith.constant 1408 : index
    %c0_572 = arith.constant 0 : index
    %493 = vector.load %arg6[%c1408_571, %c0_572] : memref<2048x128xbf16, #tpu.memory_space<vmem>>, vector<128x128xbf16>
    %cst_573 = arith.constant dense<0.000000e+00> : vector<1x128xf32>
    %494 = tpu.matmul %492, %493, %cst_573 {dimension_numbers = #tpu.dot_dimension_numbers<[1], [0], [0], [1], [0, 0, 1, 1], [], []>} : vector<1x128xbf16>, vector<128x128xbf16>, vector<1x128xf32> -> vector<1x128xf32>
    %495 = arith.addf %491, %494 : vector<1x128xf32>
    %496 = vector.extract_strided_slice %446 {offsets = [12, 0], sizes = [1, 128], strides = [1, 1]} : vector<16x128xbf16> to vector<1x128xbf16>
    %c1536_574 = arith.constant 1536 : index
    %c0_575 = arith.constant 0 : index
    %497 = vector.load %arg6[%c1536_574, %c0_575] : memref<2048x128xbf16, #tpu.memory_space<vmem>>, vector<128x128xbf16>
    %cst_576 = arith.constant dense<0.000000e+00> : vector<1x128xf32>
    %498 = tpu.matmul %496, %497, %cst_576 {dimension_numbers = #tpu.dot_dimension_numbers<[1], [0], [0], [1], [0, 0, 1, 1], [], []>} : vector<1x128xbf16>, vector<128x128xbf16>, vector<1x128xf32> -> vector<1x128xf32>
    %499 = arith.addf %495, %498 : vector<1x128xf32>
    %500 = vector.extract_strided_slice %446 {offsets = [13, 0], sizes = [1, 128], strides = [1, 1]} : vector<16x128xbf16> to vector<1x128xbf16>
    %c1664_577 = arith.constant 1664 : index
    %c0_578 = arith.constant 0 : index
    %501 = vector.load %arg6[%c1664_577, %c0_578] : memref<2048x128xbf16, #tpu.memory_space<vmem>>, vector<128x128xbf16>
    %cst_579 = arith.constant dense<0.000000e+00> : vector<1x128xf32>
    %502 = tpu.matmul %500, %501, %cst_579 {dimension_numbers = #tpu.dot_dimension_numbers<[1], [0], [0], [1], [0, 0, 1, 1], [], []>} : vector<1x128xbf16>, vector<128x128xbf16>, vector<1x128xf32> -> vector<1x128xf32>
    %503 = arith.addf %499, %502 : vector<1x128xf32>
    %504 = vector.extract_strided_slice %446 {offsets = [14, 0], sizes = [1, 128], strides = [1, 1]} : vector<16x128xbf16> to vector<1x128xbf16>
    %c1792_580 = arith.constant 1792 : index
    %c0_581 = arith.constant 0 : index
    %505 = vector.load %arg6[%c1792_580, %c0_581] : memref<2048x128xbf16, #tpu.memory_space<vmem>>, vector<128x128xbf16>
    %cst_582 = arith.constant dense<0.000000e+00> : vector<1x128xf32>
    %506 = tpu.matmul %504, %505, %cst_582 {dimension_numbers = #tpu.dot_dimension_numbers<[1], [0], [0], [1], [0, 0, 1, 1], [], []>} : vector<1x128xbf16>, vector<128x128xbf16>, vector<1x128xf32> -> vector<1x128xf32>
    %507 = arith.addf %503, %506 : vector<1x128xf32>
    %508 = vector.extract_strided_slice %446 {offsets = [15, 0], sizes = [1, 128], strides = [1, 1]} : vector<16x128xbf16> to vector<1x128xbf16>
    %c1920_583 = arith.constant 1920 : index
    %c0_584 = arith.constant 0 : index
    %509 = vector.load %arg6[%c1920_583, %c0_584] : memref<2048x128xbf16, #tpu.memory_space<vmem>>, vector<128x128xbf16>
    %cst_585 = arith.constant dense<0.000000e+00> : vector<1x128xf32>
    %510 = tpu.matmul %508, %509, %cst_585 {dimension_numbers = #tpu.dot_dimension_numbers<[1], [0], [0], [1], [0, 0, 1, 1], [], []>} : vector<1x128xbf16>, vector<128x128xbf16>, vector<1x128xf32> -> vector<1x128xf32>
    %511 = arith.addf %507, %510 : vector<1x128xf32>
    %c0_586 = arith.constant 0 : index
    %c0_587 = arith.constant 0 : index
    %512 = vector.load %arg7[%c0_586, %c0_587] : memref<1x128xf32, #tpu.memory_space<vmem>>, vector<1x128xf32>
    %513 = arith.addf %511, %512 : vector<1x128xf32>
    %514 = vector.shape_cast %513 : vector<1x128xf32> to vector<1x128xf32>
    %515 = vector.broadcast %514 : vector<1x128xf32> to vector<8x128xf32>
    %c0_588 = arith.constant 0 : index
    %c0_589 = arith.constant 0 : index
    %c0_590 = arith.constant 0 : index
    %516 = vector.load %arg8[%c0_588, %c0_589, %c0_590] : memref<1x8x128xf32, #tpu.memory_space<vmem>>, vector<1x8x128xf32>
    %517 = vector.shape_cast %516 : vector<1x8x128xf32> to vector<8x128xf32>
    %518 = vector.shape_cast %515 : vector<8x128xf32> to vector<1x8x128xf32>
    tpu.vector_store %arg8[%c0_588, %c0_589, %c0_590], %518 {strides = array<i32>} : memref<1x8x128xf32, #tpu.memory_space<vmem>>, vector<1x8x128xf32>,
    return
  }
  func.func @transform_0(%arg0: i32) -> (i32, i32, i32) {
    %c0_i32 = arith.constant 0 : i32
    %c0_i32_0 = arith.constant 0 : i32
    %c0_i32_1 = arith.constant 0 : i32
    return %arg0, %c0_i32, %c0_i32_0 : i32, i32, i32
  }
  func.func @transform_1(%arg0: i32) -> (i32, i32) {
    %c0_i32 = arith.constant 0 : i32
    %c0_i32_0 = arith.constant 0 : i32
    %c0_i32_1 = arith.constant 0 : i32
    return %c0_i32, %c0_i32_0 : i32, i32
  }
  func.func @transform_2(%arg0: i32) -> (i32, i32) {
    %c0_i32 = arith.constant 0 : i32
    %c0_i32_0 = arith.constant 0 : i32
    %c0_i32_1 = arith.constant 0 : i32
    return %c0_i32, %c0_i32_0 : i32, i32
  }
  func.func @transform_3(%arg0: i32) -> (i32, i32) {
    %c0_i32 = arith.constant 0 : i32
    %c0_i32_0 = arith.constant 0 : i32
    %c0_i32_1 = arith.constant 0 : i32
    return %c0_i32, %c0_i32_0 : i32, i32
  }
  func.func @transform_4(%arg0: i32) -> (i32, i32) {
    %c0_i32 = arith.constant 0 : i32
    %c0_i32_0 = arith.constant 0 : i32
    %c0_i32_1 = arith.constant 0 : i32
    return %c0_i32, %c0_i32_0 : i32, i32
  }
  func.func @transform_5(%arg0: i32) -> (i32, i32) {
    %c0_i32 = arith.constant 0 : i32
    %c0_i32_0 = arith.constant 0 : i32
    %c0_i32_1 = arith.constant 0 : i32
    return %c0_i32, %c0_i32_0 : i32, i32
  }
  func.func @transform_6(%arg0: i32) -> (i32, i32) {
    %c0_i32 = arith.constant 0 : i32
    %c0_i32_0 = arith.constant 0 : i32
    %c0_i32_1 = arith.constant 0 : i32
    return %c0_i32, %c0_i32_0 : i32, i32
  }
  func.func @transform_7(%arg0: i32) -> (i32, i32, i32) {
    %c0_i32 = arith.constant 0 : i32
    %c0_i32_0 = arith.constant 0 : i32
    %c0_i32_1 = arith.constant 0 : i32
    return %arg0, %c0_i32, %c0_i32_0 : i32, i32, i32
  }
}

</mosaic_0001>

<bundles_post_ra>
// kernel: parameter_estimator_light_forward.1
= control target key start
LH: loop header
LB: loop body
LE: loop exit
PB: predicated region body
PF: predicated region fallthrough
CT: control target
= control target key end

     0   :  { %s8575_s24 = smov 0   ;;  %s10730_s0 = inlined_call_operand.vmem [shape: bf16[2,256,128], index: 0, kind: input, shape index: {}]   ;;  %s10731_s1 = inlined_call_operand.vmem [shape: bf16[128,128], index: 1, kind: input, shape index: {}]   ;;  %s10732_s2 = inlined_call_operand.vmem [shape: f32[1,128], index: 2, kind: input, shape index: {}]   ;;  %s10733_s3 = inlined_call_operand.vmem [shape: bf16[3200,128], index: 3, kind: input, shape index: {}]   ;;  %s10734_s4 = inlined_call_operand.vmem [shape: f32[1,128], index: 4, kind: input, shape index: {}]   ;;  %s10735_s5 = inlined_call_operand.vmem [shape: bf16[2048,128], index: 5, kind: input, shape index: {}]   ;;  %s10736_s6 = inlined_call_operand.vmem [shape: f32[1,128], index: 6, kind: input, shape index: {}]   ;;  %s10737_s7 = inlined_call_operand.vmem [shape: f32[2,8,128], index: 7, kind: output, shape index: {}]  }
   0x1 LB: > { %s6534_s25 = sadd.s32 4294967295, %s8530_s24   ;;  %p6538_p0 = scmp.ge.s32.totalorder %s8530_s24, 1  ;;  %s8530_s24 = sphi %s8575_s24, %s17_s24  }
   0x2   : > { %p237_p1 = scmp.lt.s32.totalorder %s8530_s24, 3 }
   0x4   : > { %p238_p2 = pnand %p6538_p0, %p237_p1 }
   0x5   : > { %v8171_v0 = vld [vmem:[%s10731_s1] sm:$0xff] (!%p238_p2)   ;;  %p268_p3 = scmp.lt.s32.totalorder (!%p238_p2), %s6534_s25, 1  ;;  %v8172_v1 = vld [vmem:[%s10731_s1 + $0x8] sm:$0xff] (!%p238_p2)   ;;  %v8173_v2 = vld [vmem:[%s10731_s1 + $0x10] sm:$0xff] (!%p238_p2)   ;;  %v8532_v24 = vmov (!%p238_p2), 0   ;;  %v8533_v25 = vmov (!%p238_p2), 0.0  }
   0x6   : > { %241 = sbr.rel (%p238_p2) target bundleno = 1358 (0x54e), region = 48  ;;  %7292 = vmatprep.subr.bf16.mxu0 (!%p238_p2), %v8171_v0  ;;  %v8174_v3 = vld [vmem:[%s10731_s1 + $0x18] sm:$0xff] (!%p238_p2)   ;;  %v8175_v5 = vld [vmem:[%s10731_s1 + $0x20] sm:$0xff] (!%p238_p2)   ;;  %v8176_v6 = vld [vmem:[%s10731_s1 + $0x28] sm:$0xff] (!%p238_p2)   ;;  %687 = vst [vmem:[#allocation2 + $0x8] sm:$0xff] (!%p238_p2), %v8532_v24  ;;  %7340 = vmatprep.subr.bf16.mxu1 (!%p238_p2), %v8533_v25  ;;  %vm8534_vm0 = vmmov (!%p238_p2), 0  }
   0x7   : > { %7293 = vmatpush3.bf16.msra.mxu0 (!%p238_p2), %v8171_v0  ;;  %v8177_v7 = vld [vmem:[%s10731_s1 + $0x30] sm:$0xff] (!%p238_p2)   ;;  %v8178_v8 = vld [vmem:[%s10731_s1 + $0x38] sm:$0xff] (!%p238_p2)   ;;  %688 = vst [vmem:[#allocation2 + $0x10] sm:$0xff] (!%p238_p2), %v8532_v24  ;;  %689 = vst [vmem:[#allocation2 + $0x18] sm:$0xff] (!%p238_p2), %v8532_v24  ;;  %7356 = vmatprep.mubr.msk.bf16.mxu1 (!%p238_p2), %vm8534_vm0, %v8533_v25  ;;  %vm752_vm1 = vcmask (!%p238_p2), 1047559   ;;  %vm758_vm3 = vcmask (!%p238_p2), 1041408  }
   0x8   : > { %7294 = vmatprep.subr.bf16.mxu0 (!%p238_p2), %v8172_v1  ;;  %686 = vst [vmem:[#allocation2] sm:$0xff] (!%p238_p2), %v8532_v24  ;;  %690 = vst [vmem:[#allocation2 + $0x20] sm:$0xff] (!%p238_p2), %v8532_v24  ;;  %v8195_v26 = vld [vmem:[%s10733_s3 + $0x40] sm:$0xff] (!%p238_p2)   ;;  %v8197_v28 = vld [vmem:[%s10733_s3 + $0x48] sm:$0xff] (!%p238_p2)   ;;  %vm753_vm2 = vsmask.f32 (!%p238_p2), 7966 }
   0x9   : > { %691 = vst [vmem:[#allocation2 + $0x28] sm:$0xff] (!%p238_p2), %v8532_v24  ;;  %692 = vst [vmem:[#allocation2 + $0x30] sm:$0xff] (!%p238_p2), %v8532_v24  ;;  %7341 = vmatpush3.bf16.msra.mxu1 (!%p238_p2), %v8195_v26  ;;  %v8196_v29 = vld [vmem:[%s10733_s3 + $0x80] sm:$0xff] (!%p238_p2)   ;;  %v8198_v30 = vld [vmem:[%s10733_s3 + $0x50] sm:$0xff] (!%p238_p2)   ;;  %vm759_vm4 = vsmask.f32 (!%p238_p2), 1280 }
   0xa   : > { %693 = vst [vmem:[#allocation2 + $0x38] sm:$0xff] (!%p238_p2), %v8532_v24  ;;  %694 = vst [vmem:[#allocation2 + $0x40] sm:$0xff] (!%p238_p2), %v8532_v24  ;;  %7342 = vmatprep.subr.bf16.mxu1 (!%p238_p2), %v8533_v25  ;;  %v8199_v31 = vld [vmem:[%s10733_s3 + $0x88] sm:$0xff] (!%p238_p2)   ;;  %v8200_v32 = vld [vmem:[%s10733_s3 + $0x58] sm:$0xff] (!%p238_p2)   ;;  %vm768_vm5 = vcmask (!%p238_p2), 1046532   ;;  %vm724_vm7 = vcmask (!%p238_p2), 1047557  }
   0xb   : > { %7295 = vmatpush3.bf16.msra.mxu0 (!%p238_p2), %v8172_v1  ;;  %695 = vst [vmem:[#allocation2 + $0x48] sm:$0xff] (!%p238_p2), %v8532_v24  ;;  %696 = vst [vmem:[#allocation2 + $0x50] sm:$0xff] (!%p238_p2), %v8532_v24  ;;  %v8201_v33 = vld [vmem:[%s10733_s3 + $0x60] sm:$0xff] (!%p238_p2)   ;;  %v8202_v34 = vld [vmem:[%s10733_s3 + $0x90] sm:$0xff] (!%p238_p2)   ;;  %vm769_vm6 = vsmask.f32 (!%p238_p2), 6418 }
   0xc   : > { %7296 = vmatprep.subr.bf16.mxu0 (!%p238_p2), %v8173_v2  ;;  %697 = vst [vmem:[#allocation2 + $0x58] sm:$0xff] (!%p238_p2), %v8532_v24  ;;  %698 = vst [vmem:[#allocation2 + $0x60] sm:$0xff] (!%p238_p2), %v8532_v24  ;;  %v8203_v35 = vld [vmem:[%s10733_s3 + $0x68] sm:$0xff] (!%p238_p2)   ;;  %v8204_v36 = vld [vmem:[%s10733_s3 + $0x98] sm:$0xff] (!%p238_p2)   ;;  %vm725_vm8 = vsmask.f32 (!%p238_p2), 7446 }
   0xd   : > { %s10777_s25 = smov (!%p268_p3, %s6534_s25), 1  ;;  %699 = vst [vmem:[#allocation2 + $0x68] sm:$0xff] %v8532_v24  ;;  %700 = vst [vmem:[#allocation2 + $0x70] sm:$0xff] %v8532_v24  ;;  %7343 = vmatpush3.bf16.msra.mxu1 %v8197_v28  ;;  %v8205_v37 = vld [vmem:[%s10733_s3 + $0x70] sm:$0xff]   ;;  %v8206_v38 = vld [vmem:[%s10733_s3 + $0xa0] sm:$0xff]   ;;  %vm737_vm10 = vcmask 1044482  }
   0xe   : > { %s6898_s9 = sshll.u32 %s10777_s25, 7  ;;  %701 = vst [vmem:[#allocation2 + $0x78] sm:$0xff] %v8532_v24  ;;  %702 = vst [vmem:[#allocation2 + $0x80] sm:$0xff] %v8532_v24  ;;  %7344 = vmatprep.subr.bf16.mxu1 %v8533_v25  ;;  %v8207_v39 = vld [vmem:[%s10733_s3 + $0x78] sm:$0xff]   ;;  %v8208_v40 = vld [vmem:[%s10733_s3 + $0xa8] sm:$0xff]   ;;  %s6541_s15 = sshll.u32 %s10777_s25, 3 }
   0xf   : > { %s8598_s12 = scalar_lea.vmem %s10730_s0, %s6898_s9  ;;  %7297 = vmatpush3.bf16.msra.mxu0 %v8173_v2  ;;  %703 = vst [vmem:[#allocation2 + $0x88] sm:$0xff] %v8532_v24  ;;  %704 = vst [vmem:[#allocation2 + $0x90] sm:$0xff] %v8532_v24  ;;  %v1179_v27 = vld [vmem:[#allocation2] sm:$0x3]  ;;  %v8210_v41 = vld [vmem:[%s10733_s3 + $0xb0] sm:$0xff]   ;;  %s276_s18 = scalar_lea.vmem %s10737_s7, %s6541_s15 }
  0x10   : > { %v8179_v4 = vld [vmem:[%s8598_s12] sm:$0xff]   ;;  %7298 = vmatprep.subr.bf16.mxu0 %v8174_v3  ;;  %v8180_v9 = vld [vmem:[%s8598_s12 + $0x8] sm:$0xff]   ;;  %v8181_v10 = vld [vmem:[%s8598_s12 + $0x10] sm:$0xff]   ;;  %705 = vst [vmem:[#allocation2 + $0x98] sm:$0xff] %v8532_v24  ;;  %vm738_vm9 = vsmask.f32 4362 }
  0x11   : > { %7308 = vmatprep.mubr.bf16.mxu0 %v8179_v4  ;;  %v8182_v11 = vld [vmem:[%s8598_s12 + $0x18] sm:$0xff]   ;;  %v8183_v12 = vld [vmem:[%s8598_s12 + $0x20] sm:$0xff]   ;;  %v8184_v13 = vld [vmem:[%s8598_s12 + $0x28] sm:$0xff]   ;;  %706 = vst [vmem:[#allocation2 + $0xa0] sm:$0xff] %v8532_v24  ;;  %7345 = vmatpush3.bf16.msra.mxu1 %v8198_v30 }
  0x12   : > { %v8185_v14 = vld [vmem:[%s8598_s12 + $0x30] sm:$0xff]   ;;  %v8186_v15 = vld [vmem:[%s8598_s12 + $0x38] sm:$0xff]   ;;  %v8187_v16 = vld [vmem:[%s8598_s12 + $0x40] sm:$0xff]   ;;  %707 = vst [vmem:[#allocation2 + $0xa8] sm:$0xff] %v8532_v24  ;;  %7346 = vmatprep.subr.bf16.mxu1 %v8533_v25 }
  0x13   : > { %7299 = vmatpush3.bf16.msra.mxu0 %v8174_v3  ;;  %v8188_v17 = vld [vmem:[%s8598_s12 + $0x48] sm:$0xff]   ;;  %v8189_v18 = vld [vmem:[%s8598_s12 + $0x50] sm:$0xff]   ;;  %v8190_v19 = vld [vmem:[%s8598_s12 + $0x58] sm:$0xff]   ;;  %708 = vst [vmem:[#allocation2 + $0xb0] sm:$0xff] %v8532_v24 }
  0x14   : > { %7300 = vmatprep.subr.bf16.mxu0 %v8175_v5  ;;  %v8191_v20 = vld [vmem:[%s8598_s12 + $0x60] sm:$0xff]   ;;  %v8192_v21 = vld [vmem:[%s8598_s12 + $0x68] sm:$0xff]   ;;  %v8193_v22 = vld [vmem:[%s8598_s12 + $0x70] sm:$0xff]   ;;  %709 = vst [vmem:[#allocation2 + $0xb8] sm:$0xff] %v8532_v24 }
  0x15   : > { %v8194_v23 = vld [vmem:[%s8598_s12 + $0x78] sm:$0xff]   ;;  %710 = vst [vmem:[#allocation2 + $0xc0] sm:$0xff] %v8532_v24  ;;  %1180 = vst [vmem:[#allocation3] sm:$0x3] %v1179_v27  ;;  %7347 = vmatpush3.bf16.msra.mxu1 %v8200_v32  ;;  %v8704_v43 = vld [vmem:[%s10732_s2] ss:$0 sm:$0xff] }
  0x16   : > { %7348 = vmatprep.subr.bf16.mxu1 %v8533_v25  ;;  %v8212_v42 = vld [vmem:[%s10733_s3 + $0xb8] sm:$0xff]   ;;  %vm8712_vm11 = vmand %vm752_vm1, %vm753_vm2  ;;  %v755_v62 = vld [vmem:[#allocation2 + $0x8] sm:$0x80]  ;;  %vm10738_vm1 = vsmask.f32 6400  ;;  %vm10739_vm2 = vcmask 1042432  }
  0x17   : > { %7301 = vmatpush3.bf16.msra.mxu0 %v8175_v5  ;;  %vm8719_vm12 = vmand %vm758_vm3, %vm759_vm4  ;;  %v761_v3 = vld [vmem:[#allocation2 + $0x10] sm:$0x3]  ;;  %v771_v4 = vld [vmem:[#allocation2 + $0x10] sm:$0x70]  ;;  %vm789_vm3 = vsmask.f32 5390 }
  0x18   : > { %7302 = vmatprep.subr.bf16.mxu0 %v8176_v6  ;;  %vm8725_vm13 = vmand %vm768_vm5, %vm769_vm6  ;;  %vm803_vm5 = vsmask.f32 2306  ;;  %vm788_vm6 = vcmask 1045507   ;;  %v1113_v61 = vld [vmem:[#allocation2 + $0xa0] sm:$0xe0] }
  0x19   : > { %7349 = vmatpush3.bf16.msra.mxu1 %v8201_v33  ;;  %vm8732_vm14 = vmand %vm724_vm7, %vm725_vm8 }
  0x1a   : > { %7350 = vmatprep.subr.bf16.mxu1 %v8533_v25  ;;  %vm8740_vm15 = vmand %vm737_vm10, %vm738_vm9  ;;  %vm10740_vm9 = vcmask 1040384   ;;  %vm877_vm10 = vcmask 1043457  }
  0x1b   : > { %7303 = vmatpush3.bf16.msra.mxu0 %v8176_v6  ;;  %vm8805_vm7 = vmand %vm788_vm6, %vm789_vm3  ;;  %vm878_vm3 = vsmask.f32 3334  ;;  %vm893_vm6 = vsmask.f32 7962 }
  0x1c   : > { %7304 = vmatprep.subr.bf16.mxu0 %v8177_v7  ;;  %vm8816_vm8 = vmand %vm10739_vm2, %vm803_vm5  ;;  %vm892_vm5 = vcmask 1047558  }
  0x1d   : > { %7351 = vmatpush3.bf16.msra.mxu1 %v8203_v35 }
  0x1e   : > { %7352 = vmatprep.subr.bf16.mxu1 %v8533_v25 }
  0x1f   : > { %7305 = vmatpush3.bf16.msra.mxu0 %v8177_v7 }
  0x20   : > { %7306 = vmatprep.subr.bf16.mxu0 %v8178_v8 }
  0x21   : > { %7353 = vmatpush3.bf16.msra.mxu1 %v8205_v37 }
  0x22   : > { %7354 = vmatprep.subr.bf16.mxu1 %v8533_v25 }
  0x23   : > { %7307 = vmatpush3.bf16.msra.mxu0 %v8178_v8 }
  0x24   : > { %7380 = vmatprep.subr.bf16.mxu0 %v8533_v25 }
  0x25   : > { %7355 = vmatpush3.bf16.msra.mxu1 %v8207_v39 }
  0x26   : > { %7309 = vmatmul.mubr.bf16.vlgmr.msra.gmra.mrb[0].mxu0 %v8180_v9  ;;  %7360 = vmatprep.subr.bf16.mxu1 %v8533_v25 }
  0x27   : > { %7312 = vmatprep.mubr.bf16.mxu0 %v8181_v10  ;;  %7381 = vmatpush3.bf16.msra.mxu0 %v8196_v29 }
  0x28   : > { %7382 = vmatprep.subr.bf16.mxu0 %v8533_v25 }
  0x2b   : > { %7383 = vmatpush3.bf16.msra.mxu0 %v8199_v31 }
  0x2c   : > { %7384 = vmatprep.subr.bf16.mxu0 %v8533_v25 }
  0x2e   : > { %7313 = vmatmul.mubr.bf16.gmra.mrb[4].mxu0 %v8182_v11 }
  0x2f   : > { %7316 = vmatprep.mubr.bf16.mxu0 %v8183_v12  ;;  %7385 = vmatpush3.bf16.msra.mxu0 %v8202_v34 }
  0x30   : > { %7386 = vmatprep.subr.bf16.mxu0 %v8533_v25 }
  0x33   : > { %7387 = vmatpush3.bf16.msra.mxu0 %v8204_v36 }
  0x34   : > { %7388 = vmatprep.subr.bf16.mxu0 %v8533_v25 }
  0x36   : > { %7317 = vmatmul.mubr.bf16.gmra.mrb[8].mxu0 %v8184_v13  ;;  %v727_v13 = vld [vmem:[#allocation2] sm:$0xe0] }
  0x37   : > { %7320 = vmatprep.mubr.bf16.mxu0 %v8185_v14  ;;  %7389 = vmatpush3.bf16.msra.mxu0 %v8206_v38 }
  0x38   : > { %7390 = vmatprep.subr.bf16.mxu0 %v8533_v25 }
  0x3b   : > { %7391 = vmatpush3.bf16.msra.mxu0 %v8208_v40 }
  0x3c   : > { %7392 = vmatprep.subr.bf16.mxu0 %v8533_v25 }
  0x3e   : > { %7321 = vmatmul.mubr.bf16.gmra.mrb[12].mxu0 %v8186_v15 }
  0x3f   : > { %7324 = vmatprep.mubr.bf16.mxu0 %v8187_v16  ;;  %7393 = vmatpush3.bf16.msra.mxu0 %v8210_v41 }
  0x40   : > { %7394 = vmatprep.subr.bf16.mxu0 %v8533_v25 }
  0x43   : > { %7395 = vmatpush3.bf16.msra.mxu0 %v8212_v42 }
  0x44   : > { %7420 = vmatprep.subr.bf16.mxu0 %v8533_v25 }
  0x46   : > { %7325 = vmatmul.mubr.bf16.gmra.mrb[16].mxu0 %v8188_v17 }
  0x47   : > { %7328 = vmatprep.mubr.bf16.mxu0 %v8189_v18 }
  0x4e   : > { %7329 = vmatmul.mubr.bf16.gmra.mrb[20].mxu0 %v8190_v19  ;;  %v8244_v19 = vld [vmem:[%s10733_s3 + $0x1b8] sm:$0xff]  }
  0x4f   : > { %7332 = vmatprep.mubr.bf16.mxu0 %v8191_v20 }
  0x56   : > { %7333 = vmatmul.mubr.bf16.gmra.mrb[24].mxu0 %v8192_v21 }
  0x57   : > { %7336 = vmatprep.mubr.bf16.mxu0 %v8193_v22  ;;  %v740_v22 = vld [vmem:[#allocation2 + $0x8] sm:$0x1c] }
  0x5e   : > { %7337 = vmatmul.mubr.bf16.gmra.mrb[28].mxu0 %v8194_v23 }
  0x5f   : > { %7396 = vmatprep.mubr.msk.bf16.mxu0 %vm8534_vm0, %v8533_v25 }
  0xf9   : > { %v7310_v44 = vpop.f32.mrb[0].mxu0 }
  0xfa   : > { %v520_v45 = vadd.f32 %v7310_v44, %v8704_v43  ;;  %v511_v46 = vpop.f32.mrb[1].mxu0 }
  0xfb   : > { %v512_v47 = vadd.f32 %v8704_v43, %v511_v46  ;;  %v7311_v48 = vpop.f32.mrb[2].mxu0 }
  0xfc   : > { %v523_v49 = vadd.f32 %v7311_v48, %v8704_v43  ;;  %v514_v50 = vpop.f32.mrb[3].mxu0  ;;  %v640_v52 = vmax.f32 %v520_v45, 0.0 }
  0xfd   : > { %v515_v51 = vadd.f32 %v8704_v43, %v514_v50  ;;  %v638_v54 = vmax.f32 %v512_v47, 0.0 }
  0xfe   : > { %v641_v53 = vmax.f32 %v523_v49, 0.0 }
  0xff   : > { %v639_v55 = vmax.f32 %v515_v51, 0.0 }
 0x100   : > { %v671_v56 = vpack.c.bf16 %v641_v53, %v640_v52 }
 0x101   : > { %v670_v57 = vpack.c.bf16 %v639_v55, %v638_v54  ;;  %v7314_v58 = vpop.f32.mrb[4].mxu0 }
 0x102   : > { %v744_v59 = vshll.u32 %v671_v56, 16  ;;  %v747_v60 = vshrl.u32 %v671_v56, 16  ;;  %764 = vst [vmem:[#allocation2 + $0x10] sm:$0xc] %v671_v56  ;;  %v775_v63 = vrot.slane %v671_v56, 7  ;;  %v536_v0 = vadd.f32 %v7314_v58, %v8704_v43  ;;  %v527_v1 = vpop.f32.mrb[5].mxu0 }
 0x103   : > { %v712_v5 = vrot.slane %v670_v57, 5  ;;  %v716_v6 = vshrl.u32 %v670_v57, 16  ;;  %v719_v7 = vshll.u32 %v670_v57, 16  ;;  %v730_v8 = vrot.slane %v670_v57, 4  ;;  %v7315_v9 = vpop.f32.mrb[6].mxu0 }
 0x104   : > { %v746_v10 = vrot.slane %v744_v59, 1  ;;  %v765_v11 = vrot.slane %v747_v60, 7  ;;  %777 = vst [vmem:[#allocation2 + $0x18] ss:$-4 sps:$4 sm:$0x81] %v775_v63   ;;  %v644_v14 = vmax.f32 %v536_v0, 0.0  ;;  %v528_v15 = vadd.f32 %v8704_v43, %v527_v1 }
 0x105   : > { %v530_v16 = vpop.f32.mrb[7].mxu0  ;;  %714 = vst [vmem:[#allocation2] sm:$0x18] %v712_v5  ;;  %v718_v17 = vrot.slane %v716_v6, 4  ;;  %v721_v18 = vrot.slane %v719_v7, 5  ;;  %v733_v20 = vrot.slane %v716_v6, 3  ;;  %v539_v31 = vadd.f32 %v7315_v9, %v8704_v43 }
 0x106   : > { %732 = vst [vmem:[#allocation2 + $0x8] sm:$0x3] %v730_v8  ;;  %v734_v21 = vrot.slane %v719_v7, 4  ;;  %v749_v23 = vor.u32 %v747_v60, %v746_v10  ;;  %v756_v24 = vsel %vm8712_vm11, %v746_v10, %v755_v62  ;;  %v766_v26 = vor.u32 %v765_v11, %v744_v59  ;;  %v8766_v7 = vld [vmem:[#allocation2 + $0x18] sm:$0x6] }
 0x107   : > { %v642_v28 = vmax.f32 %v528_v15, 0.0  ;;  %757 = vst [vmem:[#allocation2 + $0x8] sm:$0x80] %v756_v24  ;;  %v722_v29 = vor.u32 %v721_v18, %v718_v17  ;;  %v531_v32 = vadd.f32 %v8704_v43, %v530_v16  ;;  %v645_v37 = vmax.f32 %v539_v31, 0.0 }
 0x108   : > { %v735_v30 = vor.u32 %v734_v21, %v733_v20  ;;  %v762_v33 = vsel %vm8719_vm12, %v749_v23, %v761_v3  ;;  %v772_v34 = vsel %vm8725_vm13, %v766_v26, %v771_v4  ;;  %v1464_v21 = vrot.slane %v8766_v7, 1 }
 0x109   : > { %763 = vst [vmem:[#allocation2 + $0x10] sm:$0x3] %v762_v33  ;;  %773 = vst [vmem:[#allocation2 + $0x10] sm:$0x70] %v772_v34  ;;  %v728_v35 = vsel %vm8732_vm14, %v722_v29, %v727_v13  ;;  %v643_v38 = vmax.f32 %v531_v32, 0.0  ;;  %v7318_v39 = vpop.f32.mrb[8].mxu0  ;;  %v8756_v41 = vpack.c.bf16 %v645_v37, %v644_v14 }
 0x10a   : > { %v741_v36 = vsel %vm8740_vm15, %v735_v30, %v740_v22  ;;  %729 = vst [vmem:[#allocation2] sm:$0xe0] %v728_v35  ;;  %v8754_v40 = vpop.f32.mrb[9].mxu0 }
 0x10b   : > { %742 = vst [vmem:[#allocation2 + $0x8] sm:$0x1c] %v741_v36  ;;  %v8758_v42 = vpack.c.bf16 %v643_v38, %v642_v28  ;;  %v8760_v44 = vpop.f32.mrb[10].mxu0  ;;  %811 = vst [vmem:[#allocation2 + $0x28] sm:$0x3] %v8756_v41  ;;  %v813_v26 = vshrl.u32 %v8756_v41, 16  ;;  %v552_v28 = vadd.f32 %v7318_v39, %v8704_v43 }
 0x10c   : > { %v1181_v45 = vld [vmem:[#allocation2] sm:$0x1c]  ;;  %v8764_v6 = vpop.f32.mrb[11].mxu0  ;;  %v816_v32 = vshll.u32 %v8756_v41, 16  ;;  %v824_v33 = vrot.slane %v8756_v41, 7  ;;  %v544_v41 = vadd.f32 %v8704_v43, %v8754_v40 }
 0x10d   : > { %v1197_v46 = vld [vmem:[#allocation2 + $0x8] sm:$0x3]  ;;  %v1185_v47 = vshll.u32 %v1181_v45, 16  ;;  %v1183_v51 = vshrl.u32 %v1181_v45, 16  ;;  %v815_v36 = vrot.slane %v813_v26, 7  ;;  %v828_v37 = vrot.slane %v813_v26, 6 }
 0x10e   : > { %v1204_v48 = vshrl.u32 %v1197_v46, 16  ;;  %v1207_v49 = vshll.u32 %v1197_v46, 16  ;;  %v1242_v11 = vld [vmem:[#allocation2 + $0x8] sm:$0x80]  ;;  %v820_v39 = vld [vmem:[#allocation2 + $0x28] sm:$0x1c] }
 0x10f   : > { %v1187_v50 = vrot.slane %v1185_v47, 1  ;;  %v1246_v24 = vrot.slane %v1242_v11, 5  ;;  %v832_v38 = vld [vmem:[#allocation2 + $0x28] sm:$0x80]  ;;  %826 = vst [vmem:[#allocation2 + $0x28] sm:$0x60] %v824_v33  ;;  %v555_v47 = vadd.f32 %v8760_v44, %v8704_v43 }
 0x110   : > { %v1206_v54 = vrot.slane %v1204_v48, 1  ;;  %v1209_v55 = vrot.slane %v1207_v49, 2  ;;  %v1251_v57 = vld [vmem:[#allocation2 + $0x10] sm:$0xe]  ;;  %v1243_v8 = vld [vmem:[#allocation2 + $0x10] sm:$0x1]  ;;  %v818_v49 = vor.u32 %v816_v32, %v815_v36 }
 0x111   : > { %v1188_v52 = vor.u32 %v1187_v50, %v1183_v51  ;;  %v1191_v53 = vld [vmem:[#allocation2] sm:$0x60]  ;;  %v1196_v56 = vld [vmem:[#allocation2] sm:$0x80]  ;;  %v1253_v0 = vshrl.u32 %v1251_v57, 16  ;;  %v1256_v1 = vshll.u32 %v1251_v57, 16 }
 0x112   : > { %v1193_v58 = vrot.slane %v1191_v53, 1  ;;  %v1200_v59 = vshrl.u32 %v1196_v56, 16  ;;  %v1231_v60 = vld [vmem:[#allocation2 + $0x8] sm:$0x70]  ;;  %v1210_v63 = vor.u32 %v1209_v55, %v1206_v54  ;;  %v8768_v9 = vpop.f32.mrb[12].mxu0  ;;  %v1247_v20 = vrot.slane %v1243_v8, 5 }
 0x113   : > { %1190 = vst [vmem:[#allocation3] sm:$0xc] %v1188_v52  ;;  %v1233_v3 = vshrl.u32 %v1231_v60, 16  ;;  %v1236_v4 = vshll.u32 %v1231_v60, 16  ;;  %v1262_v10 = vld [vmem:[#allocation2 + $0x10] sm:$0x30]  ;;  %v821_v44 = vsel %vm8740_vm15, %v818_v49, %v820_v39 }
 0x114   : > { %1195 = vst [vmem:[#allocation3] sm:$0x30] %v1193_v58  ;;  %v1202_v62 = vrot.slane %v1200_v59, 1  ;;  %v8770_v13 = vpop.f32.mrb[13].mxu0  ;;  %v1255_v14 = vrot.slane %v1253_v0, 5  ;;  %v1258_v15 = vrot.slane %v1256_v1, 6  ;;  %v1248_v35 = vsel %vm10739_vm2, %v1246_v24, %v1247_v20 }
 0x115   : > { %v1235_v16 = vrot.slane %v1233_v3, 4  ;;  %v1238_v17 = vrot.slane %v1236_v4, 5  ;;  %v8772_v18 = vpop.f32.mrb[14].mxu0  ;;  %v1264_v23 = vrot.slane %v1262_v10, 6  ;;  %v827_v45 = vrot.slane %v816_v32, 7  ;;  %v8209_v20 = vld [vmem:[%s10733_s3] sm:$0xff]  }
 0x116   : > { %v1211_v5 = vsel %vm10738_vm1, %v1202_v62, %v1210_v63  ;;  %v8775_v22 = vpop.f32.mrb[15].mxu0  ;;  %v1259_v30 = vor.u32 %v1258_v15, %v1255_v14  ;;  %v780_v46 = vshrl.u32 %v8758_v42, 16  ;;  %v835_v50 = vld [vmem:[#allocation2 + $0x30] sm:$0x3]  ;;  %v783_v51 = vshll.u32 %v8758_v42, 16  ;;  %v8211_v39 = vld [vmem:[%s10733_s3 + $0x8] sm:$0xff]  }
 0x117   : > { %1213 = vst [vmem:[#allocation3] sm:$0xc0] %v1211_v5  ;;  %v1239_v31 = vor.u32 %v1238_v17, %v1235_v16  ;;  %v795_v52 = vrot.slane %v8758_v42, 4  ;;  %v648_v53 = vmax.f32 %v552_v28, 0.0  ;;  %v829_v55 = vor.u32 %v828_v37, %v827_v45  ;;  %v1602_v0 = vld [vmem:[#allocation2 + $0x20] sm:$0xe0] }
 0x118   : > { %v833_v56 = vsel %vm8712_vm11, %v827_v45, %v832_v38  ;;  %v782_v57 = vrot.slane %v780_v46, 4  ;;  %v798_v40 = vrot.slane %v780_v46, 3  ;;  %v785_v59 = vrot.slane %v783_v51, 5  ;;  %822 = vst [vmem:[#allocation2 + $0x28] sm:$0x1c] %v821_v44  ;;  %v8259_v60 = vld [vmem:[%s10733_s3 + $0x1c8] sm:$0xff]  }
 0x119   : > { %v8779_v29 = vpop.f32.mrb[16].mxu0  ;;  %834 = vst [vmem:[#allocation2 + $0x28] sm:$0x80] %v833_v56  ;;  %797 = vst [vmem:[#allocation2 + $0x18] sm:$0xc0] %v795_v52  ;;  %v799_v62 = vrot.slane %v783_v51, 4  ;;  %v836_v3 = vsel %vm8719_vm12, %v829_v55, %v835_v50  ;;  %v547_v17 = vadd.f32 %v8704_v43, %v8764_v6  ;;  %v8871_v55 = vadd.f32 %v8768_v9, %v8704_v43 }
 0x11a   : > { %v8791_v48 = vpop.f32.mrb[17].mxu0  ;;  %v808_v63 = vrot.slane %v8758_v42, 3  ;;  %v791_v4 = vld [vmem:[#allocation2 + $0x18] sm:$0x38]  ;;  %v805_v8 = vld [vmem:[#allocation2 + $0x20] sm:$0x7]  ;;  %v786_v42 = vor.u32 %v785_v59, %v782_v57 }
 0x11b   : > { %v8795_v54 = vpop.f32.mrb[18].mxu0  ;;  %v649_v10 = vmax.f32 %v555_v47, 0.0  ;;  %v8822_v14 = vld [vmem:[#allocation2] sm:$0x7]  ;;  %837 = vst [vmem:[#allocation2 + $0x30] sm:$0x3] %v836_v3  ;;  %v800_v15 = vor.u32 %v799_v62, %v798_v40  ;;  %v8881_v62 = vadd.f32 %v8704_v43, %v8770_v13 }
 0x11c   : > { %v8799_v58 = vpop.f32.mrb[19].mxu0  ;;  %810 = vst [vmem:[#allocation2 + $0x20] sm:$0x18] %v808_v63  ;;  %v646_v16 = vmax.f32 %v544_v41, 0.0  ;;  %v1604_v24 = vshrl.u32 %v1602_v0, 16  ;;  %v1607_v33 = vshll.u32 %v1602_v0, 16  ;;  %v8885_v63 = vadd.f32 %v8772_v18, %v8704_v43 }
 0x11d   : > { %v8831_v26 = vpack.c.bf16 %v649_v10, %v648_v53  ;;  %v806_v32 = vsel %vm8816_vm8, %v800_v15, %v805_v8  ;;  %v647_v6 = vmax.f32 %v547_v17, 0.0  ;;  %v8855_v45 = vld [vmem:[#allocation2 + $0x28] sm:$0x3]  ;;  %v8213_v51 = vld [vmem:[%s10733_s3 + $0x10] sm:$0xff]   ;;  %vm899_vm1 = vsmask.f32 256 }
 0x11e   : > { %v8783_v34 = vld [vmem:[#allocation3] sm:$0xff]  ;;  %807 = vst [vmem:[#allocation2 + $0x20] sm:$0x7] %v806_v32  ;;  %v8857_v41 = vrot.slane %v1604_v24, 5  ;;  %v8859_v47 = vrot.slane %v1607_v33, 6  ;;  %v8215_v13 = vld [vmem:[%s10733_s3 + $0x18] sm:$0xff]   ;;  %v8905_v33 = vadd.f32 %v8779_v29, %v8704_v43  ;;  %vm8915_vm2 = vmand %vm10740_vm9, %vm899_vm1 }
 0x11f   : > { %1241 = vst [vmem:[#allocation3] sm:$0x3] %v1239_v31  ;;  %1250 = vst [vmem:[#allocation3] sm:$0xc] %v1248_v35  ;;  %v792_v31 = vsel %vm8805_vm7, %v786_v42, %v791_v4  ;;  %v1746_v35 = vshll.u32 %v8822_v14, 16  ;;  %v884_v37 = vrot.slane %v8831_v26, 6  ;;  %v8845_v38 = vpack.c.bf16 %v647_v6, %v646_v16 }
 0x120   : > { %1261 = vst [vmem:[#allocation3] sm:$0x30] %v1259_v30  ;;  %1266 = vst [vmem:[#allocation3] sm:$0xc0] %v1264_v23  ;;  %v1618_v52 = vld [vmem:[#allocation2 + $0x28] sm:$0x1c] }
 0x121   : > { %v8810_v1 = vpop.f32.mrb[20].mxu0  ;;  %793 = vst [vmem:[#allocation2 + $0x18] sm:$0x38] %v792_v31  ;;  %886 = vst [vmem:[#allocation2 + $0x40] sm:$0x30] %v884_v37  ;;  %v8862_v50 = vrot.slane %v1746_v35, 1 }
 0x122   : > { %v8820_v11 = vpop.f32.mrb[21].mxu0  ;;  %v8875_v57 = vld [vmem:[#allocation2 + $0x28] sm:$0x60]  ;;  %v1620_v0 = vshrl.u32 %v1618_v52, 16  ;;  %v1623_v9 = vshll.u32 %v1618_v52, 16  ;;  %v869_v42 = vshrl.u32 %v8831_v26, 16  ;;  %vm8932_vm9 = vmand %vm877_vm10, %vm878_vm3 }
 0x123   : > { %v8829_v23 = vpop.f32.mrb[22].mxu0  ;;  %v872_v15 = vshll.u32 %v8831_v26, 16  ;;  %v8901_v26 = vadd.f32 %v8704_v43, %v8775_v22  ;;  %v8921_v22 = vadd.f32 %v8704_v43, %v8791_v48  ;;  %v880_v48 = vld [vmem:[#allocation2 + $0x40] sm:$0xe]  ;;  %vm8948_vm10 = vmand %vm892_vm5, %vm893_vm6  ;;  %v1757_v49 = vld [vmem:[#allocation2] sm:$0xe0] }
 0x124   : > { %v8833_v28 = vpop.f32.mrb[23].mxu0  ;;  %v8909_v35 = vrot.slane %v1620_v0, 6  ;;  %v8911_v37 = vrot.slane %v1623_v9, 7  ;;  %v871_v52 = vrot.slane %v869_v42, 6  ;;  %v8217_v0 = vld [vmem:[%s10733_s3 + $0x20] sm:$0xff]   ;;  %vm1901_vm3 = vcmask 1044480  }
 0x125   : > { %v1483_v44 = vld [vmem:[#allocation2 + $0x20] sm:$0x7]  ;;  %v865_v24 = vld [vmem:[#allocation2 + $0x38] sm:$0x70]  ;;  %vm2472_vm5 = vsmask.f32 4352 }
 0x126   : > { %v1485_v8 = vshrl.u32 %v1483_v44, 16  ;;  %v1488_v10 = vshll.u32 %v1483_v44, 16  ;;  %v887_v44 = vrot.slane %v869_v42, 5  ;;  %v8944_v42 = vadd.f32 %v8704_v43, %v8799_v58 }
 0x127   : > { %v1267_v30 = vld [vmem:[#allocation3] sm:$0xff]  ;;  %v1626_v58 = vor.u32 %v8911_v37, %v8909_v35  ;;  %vm2340_vm6 = vcmask 1046528  }
 0x128   : > { %1466 = vst [vmem:[#allocation3] sm:$0x3] %v1464_v21  ;;  %7357 = vmatmul.mubr.bf16.vlgmr.msra.gmra.mrb[0].mxu1 %v1267_v30  ;;  %v1478_v21 = vld [vmem:[#allocation2 + $0x18] sm:$0xc0]  ;;  %v1467_v40 = vld [vmem:[#allocation2 + $0x18] sm:$0x38] }
 0x129   : > { %v8842_v36 = vpop.f32.mrb[24].mxu0  ;;  %7361 = vmatpush3.bf16.msra.mxu1 %v8209_v20  ;;  %7376 = vmatprep.mubr.msk.bf16.mxu1 %vm8534_vm0, %v8533_v25  ;;  %v1480_v46 = vrot.slane %v1478_v21, 2  ;;  %v1469_v3 = vshrl.u32 %v1467_v40, 16  ;;  %v1472_v4 = vshll.u32 %v1467_v40, 16  ;;  %v1487_v31 = vrot.slane %v1485_v8, 2  ;;  %v8219_v35 = vld [vmem:[%s10733_s3 + $0x28] sm:$0xff]  }
 0x12a   : > { %v8852_v7 = vpop.f32.mrb[25].mxu0  ;;  %7362 = vmatprep.subr.bf16.mxu1 %v8533_v25  ;;  %v1490_v32 = vrot.slane %v1488_v10, 3  ;;  %v874_v40 = vrot.slane %v872_v15, 7  ;;  %v839_v8 = vrot.slane %v8845_v38, 3  ;;  %v8940_v10 = vadd.f32 %v8795_v54, %v8704_v43  ;;  %v8263_v21 = vld [vmem:[%s10733_s3 + $0x1d8] sm:$0xff]  }
 0x12b   : > { %1482 = vst [vmem:[#allocation3] sm:$0x30] %v1480_v46  ;;  %v8873_v56 = vpop.f32.mrb[26].mxu0  ;;  %v1471_v17 = vrot.slane %v1469_v3, 1  ;;  %v1474_v20 = vrot.slane %v1472_v4, 2  ;;  %v888_v4 = vrot.slane %v872_v15, 6 }
 0x12c   : > { %v8892_v16 = vpop.f32.mrb[27].mxu0  ;;  %v901_v46 = vld [vmem:[#allocation2 + $0x48] sm:$0x1]  ;;  %v895_v15 = vld [vmem:[#allocation2 + $0x40] sm:$0xc0]  ;;  %v846_v54 = vshrl.u32 %v8845_v38, 16 }
 0x12d   : > { %7363 = vmatpush3.bf16.msra.mxu1 %v8211_v39  ;;  %v1475_v39 = vor.u32 %v1474_v20, %v1471_v17  ;;  %v902_v20 = vsel %vm8915_vm2, %v887_v44, %v901_v46  ;;  %841 = vst [vmem:[#allocation2 + $0x30] sm:$0x60] %v839_v8  ;;  %v656_v8 = vmax.f32 %v8905_v33, 0.0  ;;  %v8258_v3 = vld [vmem:[%s10733_s3 + $0x230] sm:$0xff]  }
 0x12e   : > { %7364 = vmatprep.subr.bf16.mxu1 %v8533_v25  ;;  %903 = vst [vmem:[#allocation2 + $0x48] sm:$0x1] %v902_v20  ;;  %v848_v53 = vrot.slane %v846_v54, 2  ;;  %v861_v59 = vrot.slane %v846_v54, 1  ;;  %v8214_v20 = vld [vmem:[%s10733_s3 + $0x100] sm:$0xff]   ;;  %v1759_v54 = vshrl.u32 %v1757_v49, 16 }
 0x12f   : > { %1477 = vst [vmem:[#allocation3] sm:$0xc] %v1475_v39  ;;  %v852_v39 = vld [vmem:[#allocation2 + $0x30] sm:$0x80] }
 0x131   : > { %7365 = vmatpush3.bf16.msra.mxu1 %v8213_v51  ;;  %v8897_v30 = vpop.f32.mrb[28].mxu0  ;;  %v1491_v51 = vor.u32 %v1490_v32, %v1487_v31  ;;  %v843_v31 = vshll.u32 %v8845_v38, 16  ;;  %v889_v32 = vor.u32 %v888_v4, %v887_v44  ;;  %v653_v44 = vmax.f32 %v8885_v63, 0.0 }
 0x132   : > { %7366 = vmatprep.subr.bf16.mxu1 %v8533_v25  ;;  %v8907_v6 = vpop.f32.mrb[29].mxu0  ;;  %v10762_v63 = vmax.f32 %v8871_v55, 0.0 }
 0x133   : > { %v8923_v29 = vpop.f32.mrb[30].mxu0  ;;  %1493 = vst [vmem:[#allocation3] sm:$0xc0] %v1491_v51  ;;  %v855_v51 = vld [vmem:[#allocation2 + $0x38] sm:$0x3]  ;;  %v845_v18 = vrot.slane %v843_v31, 3  ;;  %v896_v37 = vsel %vm8948_vm10, %v889_v32, %v895_v15 }
 0x134   : > { %v8928_v9 = vpop.f32.mrb[31].mxu0  ;;  %897 = vst [vmem:[#allocation2 + $0x40] sm:$0xc0] %v896_v37  ;;  %v8992_v32 = vld [vmem:[#allocation2 + $0x30] sm:$0xc] }
 0x135   : > { %7367 = vmatpush3.bf16.msra.mxu1 %v8215_v13  ;;  %v875_v13 = vor.u32 %v874_v40, %v871_v52  ;;  %v858_v52 = vrot.slane %v8845_v38, 2  ;;  %v650_v40 = vmax.f32 %v8881_v62, 0.0  ;;  %v8967_v38 = vld [vmem:[#allocation2 + $0x40] sm:$0x1]  ;;  %v862_v62 = vrot.slane %v843_v31, 2 }
 0x136   : > { %7368 = vmatprep.subr.bf16.mxu1 %v8533_v25  ;;  %v853_v4 = vsel %vm8712_vm11, %v845_v18, %v852_v39 }
 0x137   : > { %v881_v46 = vsel %vm8932_vm9, %v875_v13, %v880_v48  ;;  %860 = vst [vmem:[#allocation2 + $0x38] sm:$0xc] %v858_v52  ;;  %v651_v48 = vmax.f32 %v8901_v26, 0.0  ;;  %v654_v13 = vmax.f32 %v8921_v22, 0.0  ;;  %854 = vst [vmem:[#allocation2 + $0x30] sm:$0x80] %v853_v4  ;;  %v863_v15 = vor.u32 %v862_v62, %v861_v59 }
 0x138   : > { %882 = vst [vmem:[#allocation2 + $0x40] sm:$0xe] %v881_v46  ;;  %v8981_v26 = vpack.c.bf16 %v653_v44, %v10762_v63  ;;  %v8221_v59 = vld [vmem:[%s10733_s3 + $0x30] sm:$0xff]   ;;  %v655_v22 = vmax.f32 %v8944_v42, 0.0  ;;  %v10764_v52 = vrot.slane %v8855_v45, 6  ;;  %v10765_v42 = vrot.slane %v8875_v57, 7 }
 0x139   : > { %7369 = vmatpush3.bf16.msra.mxu1 %v8217_v0  ;;  %v849_v0 = vor.u32 %v848_v53, %v845_v18  ;;  %v8983_v31 = vpack.c.bf16 %v651_v48, %v650_v40  ;;  %v657_v53 = vmax.f32 %v8940_v10, 0.0  ;;  %v1762_v18 = vshll.u32 %v1757_v49, 16  ;;  %v8998_v49 = vld [vmem:[#allocation2 + $0x30] sm:$0x1c]  ;;  %v9009_v46 = vld [vmem:[#allocation2 + $0x58] sm:$0x3] }
 0x13a   : > { %7370 = vmatprep.subr.bf16.mxu1 %v8533_v25  ;;  %v1494_v55 = vld [vmem:[#allocation3] sm:$0xff]  ;;  %v866_v39 = vsel %vm8725_vm13, %v863_v15, %v865_v24  ;;  %v934_v10 = vrot.slane %v8981_v26, 6  ;;  %v2037_v40 = vshll.u32 %v8967_v38, 16  ;;  %v949_v24 = vrot.slane %v8981_v26, 5 }
 0x13b   : > { %v856_v33 = vsel %vm8719_vm12, %v849_v0, %v855_v51  ;;  %v10763_v51 = vor.u32 %v8859_v47, %v8857_v41  ;;  %1617 = vst [vmem:[#allocation3] sm:$0xc] %v10764_v52  ;;  %1628 = vst [vmem:[#allocation3] sm:$0x30] %v1626_v58  ;;  %7397 = vmatmul.mubr.bf16.vlgmr.msra.gmra.mrb[32].mxu0 %v1494_v55  ;;  %v9013_v37 = vpack.c.bf16 %v655_v22, %v654_v13  ;;  %v1752_v41 = vld [vmem:[#allocation2] sm:$0x18] }
 0x13c   : > { %857 = vst [vmem:[#allocation2 + $0x38] sm:$0x3] %v856_v33  ;;  %1633 = vst [vmem:[#allocation3] sm:$0xc0] %v10765_v42  ;;  %v1886_v47 = vld [vmem:[#allocation2 + $0x30] sm:$0x70]  ;;  %7421 = vmatpush3.bf16.msra.mxu0 %v8214_v20  ;;  %7436 = vmatprep.mubr.msk.bf16.mxu0 %vm8534_vm0, %v8533_v25  ;;  %v9023_v58 = vadd.f32 %v8810_v1, %v8704_v43 }
 0x13d   : > { %7371 = vmatpush3.bf16.msra.mxu1 %v8219_v35  ;;  %1612 = vst [vmem:[#allocation3] sm:$0x3] %v10763_v51  ;;  %867 = vst [vmem:[#allocation2 + $0x38] sm:$0x70] %v866_v39  ;;  %v9011_v35 = vpack.c.bf16 %v657_v53, %v656_v8  ;;  %v938_v45 = vshrl.u32 %v8981_v26, 16  ;;  %v8216_v57 = vld [vmem:[%s10733_s3 + $0x108] sm:$0xff]   ;;  %7422 = vmatprep.subr.bf16.mxu0 %v8533_v25 }
 0x13e   : > { %7372 = vmatprep.subr.bf16.mxu1 %v8533_v25  ;;  %936 = vst [vmem:[#allocation2 + $0x58] sm:$0xc] %v934_v10  ;;  %v1761_v38 = vrot.slane %v1759_v54, 1  ;;  %v1764_v62 = vrot.slane %v1762_v18, 2  ;;  %v1768_v44 = vld [vmem:[#allocation2 + $0x8] sm:$0x3] }
 0x13f   : > { %v10741_v48 = vshll.u32 %v8981_v26, 16  ;;  %951 = vst [vmem:[#allocation2 + $0x60] ss:$-4 sps:$4 sm:$0x81] %v949_v24   ;;  %v8223_v0 = vld [vmem:[%s10733_s3 + $0x38] sm:$0xff]   ;;  %v10766_v4 = vshrl.u32 %v8822_v14, 16 }
 0x140   : > { %v9035_v15 = vld [vmem:[#allocation2 + $0x40] sm:$0x38]  ;;  %v9038_v20 = vrot.slane %v2037_v40, 7  ;;  %v1888_v63 = vshrl.u32 %v1886_v47, 16  ;;  %v1891_v53 = vshll.u32 %v1886_v47, 16  ;;  %v8218_v14 = vld [vmem:[%s10733_s3 + $0x110] sm:$0xff]   ;;  %7423 = vmatpush3.bf16.msra.mxu0 %v8216_v57  ;;  %v1765_v39 = vor.u32 %v1764_v62, %v1761_v38 }
 0x141   : > { %7373 = vmatpush3.bf16.msra.mxu1 %v8221_v59  ;;  %v1749_v8 = vor.u32 %v8862_v50, %v10766_v4  ;;  %v8225_v50 = vld [vmem:[%s10733_s3 + $0xc0] sm:$0xff]   ;;  %v1754_v18 = vrot.slane %v1752_v41, 1  ;;  %v1770_v33 = vrot.slane %v1768_v44, 2  ;;  %v1897_v59 = vld [vmem:[#allocation2 + $0x30] sm:$0x80]  ;;  %v940_v22 = vrot.slane %v938_v45, 5  ;;  %7424 = vmatprep.subr.bf16.mxu0 %v8533_v25 }
 0x142   : > { %7374 = vmatprep.subr.bf16.mxu1 %v8533_v25  ;;  %v2050_v10 = vshrl.u32 %v9035_v15, 16  ;;  %v943_v42 = vrot.slane %v10741_v48, 6  ;;  %v9056_v40 = vadd.f32 %v8704_v43, %v8820_v11  ;;  %v908_v38 = vshrl.u32 %v8983_v31, 16  ;;  %v946_v48 = vld [vmem:[#allocation2 + $0x58] sm:$0x70] }
 0x143   : > { %v1898_v51 = vld [vmem:[#allocation2 + $0x38] sm:$0x1]  ;;  %v1907_v52 = vld [vmem:[#allocation2 + $0x38] sm:$0xe]  ;;  %v9064_v62 = vadd.f32 %v8829_v23, %v8704_v43  ;;  %v1890_v44 = vrot.slane %v1888_v63, 2  ;;  %v1893_v11 = vrot.slane %v1891_v53, 3 }
 0x144   : > { %v9058_v24 = vld [vmem:[#allocation3] sm:$0xff]  ;;  %v1909_v41 = vshrl.u32 %v1907_v52, 16  ;;  %v1912_v47 = vshll.u32 %v1907_v52, 16  ;;  %v2026_v57 = vld [vmem:[#allocation2 + $0x38] sm:$0xc0]  ;;  %v1902_v13 = vrot.slane %v1897_v59, 3  ;;  %7425 = vmatpush3.bf16.msra.mxu0 %v8218_v14 }
 0x145   : > { %7375 = vmatpush3.bf16.msra.mxu1 %v8223_v0  ;;  %1751 = vst [vmem:[#allocation3] sm:$0x3] %v1749_v8  ;;  %1756 = vst [vmem:[#allocation3] sm:$0xc] %v1754_v18  ;;  %v2029_v0 = vshrl.u32 %v2026_v57, 16  ;;  %v2032_v4 = vshll.u32 %v2026_v57, 16  ;;  %v944_v18 = vor.u32 %v943_v42, %v940_v22  ;;  %7426 = vmatprep.subr.bf16.mxu0 %v8533_v25 }
 0x146   : > { %7400 = vmatprep.subr.bf16.mxu1 %v8533_v25  ;;  %1767 = vst [vmem:[#allocation3] sm:$0x30] %v1765_v39  ;;  %1772 = vst [vmem:[#allocation3] sm:$0xc0] %v1770_v33  ;;  %v8220_v52 = vld [vmem:[%s10733_s3 + $0x118] sm:$0xff]   ;;  %v1903_v54 = vrot.slane %v1898_v51, 3  ;;  %v1894_v39 = vor.u32 %v1893_v11, %v1890_v44 }
 0x147   : > { %v1911_v55 = vrot.slane %v1909_v41, 3  ;;  %v1914_v1 = vrot.slane %v1912_v47, 4  ;;  %v2052_v23 = vrot.slane %v2050_v10, 7  ;;  %v2053_v8 = vshll.u32 %v9035_v15, 16  ;;  %v8227_v63 = vld [vmem:[%s10733_s3 + $0xc8] sm:$0xff]  }
 0x148   : > { %7377 = vmatmul.mubr.bf16.vlgmr.msra.gmra.mrb[4].mxu1 %v8783_v34  ;;  %v658_v53 = vmax.f32 %v9056_v40, 0.0  ;;  %v9076_v33 = vld [vmem:[#allocation2 + $0x40] sm:$0x6]  ;;  %v9078_v59 = vrot.slane %v2029_v0, 6  ;;  %v9080_v14 = vrot.slane %v2032_v4, 7  ;;  %v953_v34 = vrot.slane %v938_v45, 4  ;;  %7427 = vmatpush3.bf16.msra.mxu0 %v8220_v52 }
 0x149   : > { %7401 = vmatpush3.bf16.msra.mxu1 %v8225_v50  ;;  %v10767_v15 = vshll.u32 %v8981_v26, 16  ;;  %v8222_v50 = vld [vmem:[%s10733_s3 + $0x120] sm:$0xff]   ;;  %7416 = vmatprep.mubr.msk.bf16.mxu1 %vm8534_vm0, %v8533_v25  ;;  %v1915_v10 = vor.u32 %v1914_v1, %v1911_v55  ;;  %v947_v51 = vsel %vm8725_vm13, %v944_v18, %v946_v48  ;;  %v9096_v45 = vadd.f32 %v8704_v43, %v8833_v28  ;;  %v916_v1 = vld [vmem:[#allocation2 + $0x48] sm:$0xe0]  ;;  %v927_v11 = vld [vmem:[#allocation2 + $0x50] sm:$0x1c] }
 0x14a   : > { %7402 = vmatprep.subr.bf16.mxu1 %v8533_v25  ;;  %v957_v42 = vld [vmem:[#allocation2 + $0x60] sm:$0xe]  ;;  %v1904_v26 = vsel %vm1901_vm3, %v1902_v13, %v1903_v54  ;;  %948 = vst [vmem:[#allocation2 + $0x58] sm:$0x70] %v947_v51  ;;  %v910_v47 = vrot.slane %v908_v38, 2  ;;  %v911_v57 = vshll.u32 %v8983_v31, 16  ;;  %v9101_v44 = vor.u32 %v2053_v8, %v2052_v23  ;;  %7428 = vmatprep.subr.bf16.mxu0 %v8533_v25 }
 0x14b   : > { %v954_v22 = vrot.slane %v10767_v15, 5  ;;  %v2045_v0 = vrot.slane %v9076_v33, 7  ;;  %v920_v48 = vrot.slane %v8983_v31, 2  ;;  %v923_v55 = vrot.slane %v908_v38, 1  ;;  %v8229_v43 = vld [vmem:[%s10733_s3 + $0xd0] sm:$0xff]   ;;  %v8224_v31 = vld [vmem:[%s10733_s3 + $0x128] sm:$0xff]  }
 0x14c   : > { %v2035_v13 = vor.u32 %v9080_v14, %v9078_v59  ;;  %v913_v4 = vrot.slane %v911_v57, 3  ;;  %v924_v52 = vrot.slane %v911_v57, 2  ;;  %v10768_v38 = vrot.slane %v8992_v32, 2  ;;  %7429 = vmatpush3.bf16.msra.mxu0 %v8222_v50  ;;  %v9140_v57 = vld [vmem:[#allocation2 + $0x50] sm:$0x80] }
 0x14d   : > { %v955_v41 = vor.u32 %v954_v22, %v953_v34  ;;  %7403 = vmatpush3.bf16.msra.mxu1 %v8227_v63  ;;  %v9108_v28 = vld [vmem:[#allocation3] sm:$0xff]  ;;  %922 = vst [vmem:[#allocation2 + $0x50] sm:$0x3] %v920_v48  ;;  %v988_v23 = vrot.slane %v9011_v35, 7  ;;  %v992_v8 = vshrl.u32 %v9011_v35, 16  ;;  %v995_v18 = vshll.u32 %v9011_v35, 16  ;;  %7430 = vmatprep.subr.bf16.mxu0 %v8533_v25 }
 0x14e   : > { %7404 = vmatprep.subr.bf16.mxu1 %v8533_v25  ;;  %1885 = vst [vmem:[#allocation3] sm:$0x3] %v10768_v38  ;;  %1896 = vst [vmem:[#allocation3] sm:$0xc] %v1894_v39  ;;  %v8231_v63 = vld [vmem:[%s10733_s3 + $0xd8] sm:$0xff]   ;;  %v914_v59 = vor.u32 %v913_v4, %v910_v47  ;;  %v925_v14 = vor.u32 %v924_v52, %v923_v55  ;;  %v1003_v32 = vrot.slane %v9011_v35, 6 }
 0x14f   : > { %v958_v54 = vsel %vm8932_vm9, %v955_v41, %v957_v42  ;;  %1906 = vst [vmem:[#allocation3] sm:$0x30] %v1904_v26  ;;  %1917 = vst [vmem:[#allocation3] sm:$0xc0] %v1915_v10  ;;  %v961_v34 = vshrl.u32 %v9013_v37, 16  ;;  %v994_v15 = vrot.slane %v992_v8, 6  ;;  %v2040_v38 = vsel %vm759_vm4, %v2035_v13, %v9038_v20 }
 0x150   : > { %959 = vst [vmem:[#allocation2 + $0x60] sm:$0xe] %v958_v54  ;;  %990 = vst [vmem:[#allocation2 + $0x70] sm:$0x6] %v988_v23  ;;  %v997_v22 = vrot.slane %v995_v18, 7  ;;  %v1006_v10 = vrot.slane %v992_v8, 5  ;;  %v917_v26 = vsel %vm8732_vm14, %v914_v59, %v916_v1  ;;  %v928_v50 = vsel %vm8740_vm15, %v925_v14, %v927_v11  ;;  %7431 = vmatpush3.bf16.msra.mxu0 %v8224_v31 }
 0x151   : > { %v1000_v39 = vld [vmem:[#allocation2 + $0x70] sm:$0x38]  ;;  %v1007_v51 = vrot.slane %v995_v18, 6  ;;  %7405 = vmatpush3.bf16.msra.mxu1 %v8229_v43  ;;  %v9129_v42 = vld [vmem:[#allocation2 + $0x48] sm:$0x18]  ;;  %v963_v41 = vrot.slane %v961_v34, 3  ;;  %7432 = vmatprep.subr.bf16.mxu0 %v8533_v25 }
 0x152   : > { %v8226_v35 = vld [vmem:[%s10733_s3 + $0x130] sm:$0xff]   ;;  %1005 = vst [vmem:[#allocation2 + $0x70] sm:$0xc0] %v1003_v32  ;;  %v964_v47 = vshll.u32 %v9013_v37, 16  ;;  %7406 = vmatprep.subr.bf16.mxu1 %v8533_v25  ;;  %918 = vst [vmem:[#allocation2 + $0x48] sm:$0xe0] %v917_v26  ;;  %v998_v48 = vor.u32 %v997_v22, %v994_v15 }
 0x153   : > { %929 = vst [vmem:[#allocation2 + $0x50] sm:$0x1c] %v928_v50  ;;  %v1008_v55 = vor.u32 %v1007_v51, %v1006_v10  ;;  %v969_v1 = vld [vmem:[#allocation2 + $0x60] sm:$0x70]  ;;  %v973_v43 = vrot.slane %v9013_v37, 3  ;;  %v977_v11 = vrot.slane %v961_v34, 2 }
 0x154   : > { %v981_v54 = vld [vmem:[#allocation2 + $0x68] sm:$0xe]  ;;  %v1010_v4 = vld [vmem:[#allocation2 + $0x78] sm:$0x7]  ;;  %v2058_v52 = vld [vmem:[#allocation2 + $0x40] sm:$0xc0]  ;;  %v1001_v59 = vsel %vm8805_vm7, %v998_v48, %v1000_v39  ;;  %7433 = vmatpush3.bf16.msra.mxu0 %v8226_v35 }
 0x155   : > { %v966_v23 = vrot.slane %v964_v47, 4  ;;  %v978_v8 = vrot.slane %v964_v47, 3  ;;  %v9145_v18 = vld [vmem:[#allocation2 + $0x38] sm:$0x3]  ;;  %v984_v14 = vrot.slane %v9013_v37, 2  ;;  %7407 = vmatpush3.bf16.msra.mxu1 %v8231_v63  ;;  %v8233_v32 = vld [vmem:[%s10733_s3 + $0xe0] sm:$0xff]   ;;  %v1011_v37 = vsel %vm8816_vm8, %v1008_v55, %v1010_v4  ;;  %7434 = vmatprep.subr.bf16.mxu0 %v8533_v25 }
 0x156   : > { %975 = vst [vmem:[#allocation2 + $0x68] ss:$-4 sps:$4 sm:$0x81] %v973_v43   ;;  %v661_v20 = vmax.f32 %v9064_v62, 0.0  ;;  %v659_v13 = vmax.f32 %v9096_v45, 0.0  ;;  %v2459_v31 = vshll.u32 %v8998_v49, 16  ;;  %7408 = vmatprep.subr.bf16.mxu1 %v8533_v25 }
 0x157   : > { %v9157_v34 = vld [vmem:[#allocation3] sm:$0xff]  ;;  %v9159_v15 = vld [vmem:[#allocation2 + $0x50] sm:$0x3]  ;;  %1002 = vst [vmem:[#allocation2 + $0x70] sm:$0x38] %v1001_v59  ;;  %v967_v22 = vor.u32 %v966_v23, %v963_v41  ;;  %v979_v39 = vor.u32 %v978_v8, %v977_v11  ;;  %v2170_v63 = vrot.slane %v9129_v42, 3 }
 0x158   : > { %2042 = vst [vmem:[#allocation3] sm:$0x3] %v2040_v38  ;;  %2047 = vst [vmem:[#allocation3] sm:$0xc] %v2045_v0  ;;  %v2318_v62 = vshll.u32 %v9009_v46, 16  ;;  %v10769_v45 = vmax.f32 %v9023_v58, 0.0  ;;  %v9175_v51 = vpack.c.bf16 %v659_v13, %v658_v53 }
 0x159   : > { %2057 = vst [vmem:[#allocation3] sm:$0x30] %v9101_v44  ;;  %2059 = vst [vmem:[#allocation3] sm:$0xc0] %v2058_v52  ;;  %v10770_v42 = vshrl.u32 %v9009_v46, 16  ;;  %v2311_v33 = vshrl.u32 %v9140_v57, 16  ;;  %v970_v0 = vsel %vm8725_vm13, %v967_v22, %v969_v1  ;;  %v982_v44 = vsel %vm8932_vm9, %v979_v39, %v981_v54  ;;  %7409 = vmatpush3.bf16.msra.mxu1 %v8233_v32 }
 0x15a   : > { %986 = vst [vmem:[#allocation2 + $0x68] sm:$0x30] %v984_v14  ;;  %v9171_v10 = vpack.c.bf16 %v661_v20, %v10769_v45  ;;  %1012 = vst [vmem:[#allocation2 + $0x78] sm:$0x7] %v1011_v37  ;;  %v8228_v58 = vld [vmem:[%s10733_s3 + $0x138] sm:$0xff]   ;;  %v2478_v53 = vshrl.u32 %v9145_v18, 16  ;;  %7410 = vmatprep.subr.bf16.mxu1 %v8533_v25 }
 0x15b   : > { %v2317_v26 = vrot.slane %v10770_v42, 7  ;;  %v9187_v40 = vld [vmem:[#allocation2 + $0x30] sm:$0x80]  ;;  %v2481_v46 = vshll.u32 %v9145_v18, 16  ;;  %v9191_v50 = vld [vmem:[#allocation2 + $0x58] sm:$0x70]  ;;  %7435 = vmatpush3.bf16.msra.mxu0 %v8228_v58 }
 0x15c   : > { %v2186_v35 = vrot.slane %v9159_v15, 4  ;;  %971 = vst [vmem:[#allocation2 + $0x60] sm:$0x70] %v970_v0  ;;  %983 = vst [vmem:[#allocation2 + $0x68] sm:$0xe] %v982_v44  ;;  %v8235_v41 = vld [vmem:[%s10733_s3 + $0xe8] sm:$0xff]   ;;  %7460 = vmatprep.subr.bf16.mxu0 %v8533_v25 }
 0x15d   : > { %v2173_v47 = vld [vmem:[#allocation2 + $0x48] sm:$0xe0]  ;;  %v2189_v57 = vld [vmem:[#allocation2 + $0x50] sm:$0x1c]  ;;  %v1056_v48 = vrot.slane %v9171_v10, 6  ;;  %v1070_v55 = vrot.slane %v9171_v10, 5  ;;  %7411 = vmatpush3.bf16.msra.mxu1 %v8235_v41  ;;  %v2320_v22 = vor.u32 %v2318_v62, %v2317_v26 }
 0x15e   : > { %v2175_v1 = vshrl.u32 %v2173_v47, 16  ;;  %v2178_v43 = vshll.u32 %v2173_v47, 16  ;;  %v2191_v11 = vshrl.u32 %v2189_v57, 16  ;;  %v2194_v54 = vshll.u32 %v2189_v57, 16  ;;  %v8230_v8 = vld [vmem:[%s10733_s3 + $0x180] sm:$0xff]   ;;  %7412 = vmatprep.subr.bf16.mxu1 %v8533_v25  ;;  %7437 = vmatmul.mubr.bf16.vlgmr.msra.gmra.mrb[36].mxu0 %v9108_v28 }
 0x15f   : > { %v10771_v4 = vshrl.u32 %v8998_v49, 16  ;;  %v9205_v38 = vrot.slane %v2459_v31, 3  ;;  %v2330_v23 = vshll.u32 %v9191_v50, 16  ;;  %1058 = vst [vmem:[#allocation2 + $0x88] sm:$0x30] %v1056_v48  ;;  %v8237_v49 = vld [vmem:[%s10733_s3 + $0xf0] sm:$0xff]   ;;  %7461 = vmatpush3.bf16.msra.mxu0 %v8230_v8  ;;  %7476 = vmatprep.mubr.msk.bf16.mxu0 %vm8534_vm0, %v8533_v25 }
 0x160   : > { %1072 = vst [vmem:[#allocation2 + $0x90] sm:$0x6] %v1070_v55  ;;  %v2177_v18 = vrot.slane %v2175_v1, 3  ;;  %v2180_v59 = vrot.slane %v2178_v43, 4  ;;  %v2193_v14 = vrot.slane %v2191_v11, 4  ;;  %v2196_v32 = vrot.slane %v2194_v54, 5  ;;  %7462 = vmatprep.subr.bf16.mxu0 %v8533_v25 }
 0x161   : > { %v9203_v52 = vrot.slane %v10771_v4, 2  ;;  %v9215_v20 = vld [vmem:[#allocation3] sm:$0xff]  ;;  %v2474_v13 = vshrl.u32 %v9187_v40, 16  ;;  %v2480_v31 = vrot.slane %v2478_v53, 3  ;;  %v2483_v15 = vrot.slane %v2481_v46, 4  ;;  %7413 = vmatpush3.bf16.msra.mxu1 %v8237_v49  ;;  %v8234_v1 = vld [vmem:[%s10733_s3 + $0x190] sm:$0xff]  }
 0x162   : > { %2172 = vst [vmem:[#allocation3] sm:$0x3] %v2170_v63  ;;  %v2336_v39 = vld [vmem:[#allocation2 + $0x58] sm:$0x80]  ;;  %v2337_v37 = vld [vmem:[#allocation2 + $0x60] sm:$0x1]  ;;  %v2181_v45 = vor.u32 %v2180_v59, %v2177_v18  ;;  %v2197_v42 = vor.u32 %v2196_v32, %v2193_v14  ;;  %7414 = vmatprep.subr.bf16.mxu1 %v8533_v25 }
 0x163   : > { %2188 = vst [vmem:[#allocation3] sm:$0x30] %v2186_v35  ;;  %v2313_v0 = vrot.slane %v2311_v33, 7  ;;  %v2462_v44 = vor.u32 %v9205_v38, %v9203_v52  ;;  %v9222_v58 = vld [vmem:[#allocation2 + $0x30] sm:$0x60]  ;;  %v8232_v63 = vld [vmem:[%s10733_s3 + $0x188] sm:$0xff]   ;;  %v2484_v47 = vor.u32 %v2483_v15, %v2480_v31 }
 0x164   : > { %v9224_v40 = vld [vmem:[#allocation2 + $0x38] sm:$0xc]  ;;  %v9234_v62 = vld [vmem:[%s10732_s2] ss:$0 sm:$0xff]  ;;  %v2328_v26 = vshrl.u32 %v9191_v50, 16  ;;  %v2332_v33 = vrot.slane %v2330_v23, 1  ;;  %7463 = vmatpush3.bf16.msra.mxu0 %v8232_v63 }
 0x165   : > { %v9238_v28 = vadd.f32 %v9234_v62, %v8842_v36  ;;  %2183 = vst [vmem:[#allocation3] sm:$0xc] %v2181_v45  ;;  %2199 = vst [vmem:[#allocation3] sm:$0xc0] %v2197_v42  ;;  %v2606_v53 = vld [vmem:[#allocation2 + $0x60] sm:$0xc0]  ;;  %v9248_v41 = vadd.f32 %v9234_v62, %v8852_v7  ;;  %v2321_v55 = vsel %vm899_vm1, %v2313_v0, %v2320_v22  ;;  %7464 = vmatprep.subr.bf16.mxu0 %v8533_v25 }
 0x166   : > { %v1044_v46 = vshrl.u32 %v9171_v10, 16  ;;  %v8239_v35 = vld [vmem:[%s10733_s3 + $0xf8] sm:$0xff]   ;;  %v2476_v36 = vrot.slane %v2474_v13, 3  ;;  %v2341_v50 = vrot.slane %v2336_v39, 1  ;;  %v2342_v57 = vrot.slane %v2337_v37, 1  ;;  %v8241_v32 = vld [vmem:[%s10733_s3 + $0x140] sm:$0xff]  }
 0x167   : > { %v2467_v48 = vrot.slane %v9222_v58, 3  ;;  %v1047_v43 = vshll.u32 %v9171_v10, 16  ;;  %v2490_v7 = vrot.slane %v9224_v40, 4  ;;  %v9258_v11 = vld [vmem:[#allocation2 + $0x70] sm:$0x7]  ;;  %v2610_v54 = vshrl.u32 %v2606_v53, 16  ;;  %7415 = vmatpush3.bf16.msra.mxu1 %v8239_v35 }
 0x168   : > { %v9260_v4 = vld [vmem:[#allocation2 + $0x68] sm:$0x38]  ;;  %v9264_v23 = vadd.f32 %v9234_v62, %v8873_v56  ;;  %v9268_v8 = vadd.f32 %v9234_v62, %v8892_v16  ;;  %v2333_v18 = vor.u32 %v2332_v33, %v2328_v26  ;;  %v9270_v59 = vld [vmem:[#allocation2 + $0x68] sm:$0x1]  ;;  %v2613_v10 = vshll.u32 %v2606_v53, 16  ;;  %v8236_v15 = vld [vmem:[%s10733_s3 + $0x198] sm:$0xff]   ;;  %7440 = vmatprep.subr.bf16.mxu1 %v8533_v25  ;;  %7465 = vmatpush3.bf16.msra.mxu0 %v8234_v1 }
 0x169   : > { %v1046_v14 = vrot.slane %v1044_v46, 6  ;;  %v9278_v56 = vadd.f32 %v9234_v62, %v8897_v30  ;;  %v9281_v49 = vsel %vm2472_vm5, %v2476_v36, %v2484_v47  ;;  %v2324_v16 = vld [vmem:[#allocation2 + $0x58] sm:$0xc]  ;;  %v2343_v13 = vsel %vm2340_vm6, %v2341_v50, %v2342_v57  ;;  %v1067_v31 = vld [vmem:[#allocation2 + $0x90] sm:$0x1]  ;;  %v8243_v63 = vld [vmem:[%s10733_s3 + $0x148] sm:$0xff]   ;;  %7466 = vmatprep.subr.bf16.mxu0 %v8533_v25 }
 0x16a   : > { %v664_v22 = vmax.f32 %v9238_v28, 0.0  ;;  %v662_v39 = vmax.f32 %v9248_v41, 0.0  ;;  %v2752_v30 = vshll.u32 %v9258_v11, 16  ;;  %v2631_v37 = vshrl.u32 %v9260_v4, 16  ;;  %v1052_v42 = vld [vmem:[#allocation2 + $0x88] sm:$0xe]  ;;  %7417 = vmatmul.mubr.bf16.vlgmr.msra.gmra.mrb[8].mxu1 %v9058_v24 }
 0x16b   : > { %v1049_v45 = vrot.slane %v1047_v43, 7  ;;  %v1059_v0 = vrot.slane %v1044_v46, 5  ;;  %v9297_v33 = vrot.slane %v2610_v54, 4  ;;  %v2618_v53 = vshll.u32 %v9270_v59, 16  ;;  %v1064_v50 = vld [vmem:[#allocation2 + $0x88] sm:$0xc0]  ;;  %7441 = vmatpush3.bf16.msra.mxu1 %v8241_v32  ;;  %7456 = vmatprep.mubr.msk.bf16.mxu1 %vm8534_vm0, %v8533_v25 }
 0x16c   : > { %v9295_v26 = vld [vmem:[#allocation3] sm:$0xff]  ;;  %v1060_v28 = vrot.slane %v1047_v43, 6  ;;  %v635_v35 = vadd.f32 %v9234_v62, %v8923_v29  ;;  %v9303_v46 = vrot.slane %v2613_v10, 5  ;;  %v2634_v36 = vshll.u32 %v9260_v4, 16  ;;  %v1027_v1 = vld [vmem:[#allocation2 + $0x78] sm:$0x80]  ;;  %7442 = vmatprep.subr.bf16.mxu1 %v8533_v25  ;;  %7467 = vmatpush3.bf16.msra.mxu0 %v8236_v15 }
 0x16d   : > { %2323 = vst [vmem:[#allocation3] sm:$0x3] %v2321_v55  ;;  %2325 = vst [vmem:[#allocation3] sm:$0xc] %v2324_v16  ;;  %v1050_v47 = vor.u32 %v1049_v45, %v1046_v14  ;;  %v1068_v57 = vsel %vm8915_vm2, %v1059_v0, %v1067_v31  ;;  %v1014_v29 = vrot.slane %v9175_v51, 3  ;;  %v1018_v55 = vshll.u32 %v9175_v51, 16  ;;  %7468 = vmatprep.subr.bf16.mxu0 %v8533_v25 }
 0x16e   : > { %2335 = vst [vmem:[#allocation3] sm:$0x30] %v2333_v18  ;;  %2345 = vst [vmem:[#allocation3] sm:$0xc0] %v2343_v13  ;;  %v1061_v24 = vor.u32 %v1060_v28, %v1059_v0  ;;  %v1021_v43 = vshrl.u32 %v9175_v51, 16  ;;  %v9315_v54 = vrot.slane %v2631_v37, 5  ;;  %v2616_v58 = vor.u32 %v9303_v46, %v9297_v33 }
 0x16f   : > { %1069 = vst [vmem:[#allocation2 + $0x90] sm:$0x1] %v1068_v57  ;;  %v1053_v4 = vsel %vm8932_vm9, %v1050_v47, %v1052_v42  ;;  %v1030_v18 = vld [vmem:[#allocation2 + $0x80] sm:$0x3]  ;;  %v1033_v10 = vrot.slane %v9175_v51, 2  ;;  %v665_v14 = vmax.f32 %v9264_v23, 0.0  ;;  %7443 = vmatpush3.bf16.msra.mxu1 %v8243_v63 }
 0x170   : > { %1054 = vst [vmem:[#allocation2 + $0x88] sm:$0xe] %v1053_v4  ;;  %v1065_v32 = vsel %vm8948_vm10, %v1061_v24, %v1064_v50  ;;  %1016 = vst [vmem:[#allocation2 + $0x78] sm:$0x60] %v1014_v29  ;;  %v1020_v16 = vrot.slane %v1018_v55, 3  ;;  %v1023_v13 = vrot.slane %v1021_v43, 2  ;;  %7444 = vmatprep.subr.bf16.mxu1 %v8533_v25 }
 0x171   : > { %v1036_v31 = vrot.slane %v1021_v43, 1  ;;  %v8238_v37 = vld [vmem:[%s10733_s3 + $0x1a0] sm:$0xff]   ;;  %1066 = vst [vmem:[#allocation2 + $0x88] sm:$0xc0] %v1065_v32  ;;  %1035 = vst [vmem:[#allocation2 + $0x80] sm:$0xc] %v1033_v10  ;;  %v683_v23 = vpack.c.bf16 %v665_v14, %v664_v22 }
 0x172   : > { %v1037_v45 = vrot.slane %v1018_v55, 2  ;;  %v1040_v42 = vld [vmem:[#allocation2 + $0x80] sm:$0x70]  ;;  %v8245_v51 = vld [vmem:[%s10733_s3 + $0x150] sm:$0xff]   ;;  %v663_v0 = vmax.f32 %v9268_v8, 0.0  ;;  %v668_v15 = vmax.f32 %v9278_v56, 0.0  ;;  %v1024_v50 = vor.u32 %v1023_v13, %v1020_v16  ;;  %7469 = vmatpush3.bf16.msra.mxu0 %v8238_v37 }
 0x173   : > { %v9332_v28 = vld [vmem:[#allocation2 + $0x70] sm:$0xe0]  ;;  %v9334_v47 = vrot.slane %v2634_v36, 6  ;;  %v1028_v57 = vsel %vm8712_vm11, %v1020_v16, %v1027_v1  ;;  %v669_v63 = vmax.f32 %v635_v35, 0.0  ;;  %v8240_v22 = vld [vmem:[%s10733_s3 + $0x1a8] sm:$0xff]   ;;  %v1101_v8 = vrot.slane %v683_v23, 5  ;;  %7470 = vmatprep.subr.bf16.mxu0 %v8533_v25  ;;  %7445 = vmatpush3.bf16.msra.mxu1 %v8245_v51 }
 0x174   : > { %1029 = vst [vmem:[#allocation2 + $0x78] sm:$0x80] %v1028_v57  ;;  %v1038_v24 = vor.u32 %v1037_v45, %v1036_v31  ;;  %v1105_v29 = vshrl.u32 %v683_v23, 16  ;;  %v1108_v56 = vshll.u32 %v683_v23, 16  ;;  %v1031_v36 = vsel %vm8719_vm12, %v1024_v50, %v1030_v18  ;;  %v2601_v2 = vld [vmem:[#allocation2 + $0x60] sm:$0x30]  ;;  %7446 = vmatprep.subr.bf16.mxu1 %v8533_v25 }
 0x175   : > { %v9342_v55 = vld [vmem:[#allocation3] sm:$0xff]  ;;  %v1116_v1 = vrot.slane %v683_v23, 4  ;;  %v9348_v35 = vpack.c.bf16 %v663_v0, %v662_v39  ;;  %v9350_v43 = vpack.c.bf16 %v669_v63, %v668_v15  ;;  %1032 = vst [vmem:[#allocation2 + $0x80] sm:$0x3] %v1031_v36  ;;  %1103 = vst [vmem:[#allocation2 + $0xa0] sm:$0x18] %v1101_v8  ;;  %v2637_v14 = vor.u32 %v9334_v47, %v9315_v54 }
 0x176   : > { %2464 = vst [vmem:[#allocation3] sm:$0x3] %v2462_v44  ;;  %2487 = vst [vmem:[#allocation3] sm:$0x30] %v9281_v49  ;;  %v1041_v41 = vsel %vm8725_vm13, %v1038_v24, %v1040_v42  ;;  %v1107_v39 = vrot.slane %v1105_v29, 4  ;;  %v1110_v52 = vrot.slane %v1108_v56, 5  ;;  %7471 = vmatpush3.bf16.msra.mxu0 %v8240_v22  ;;  %v9414_v57 = vadd.f32 %v9234_v62, %v8907_v6 }
 0x177   : > { %2492 = vst [vmem:[#allocation3] sm:$0xc0] %v2490_v7  ;;  %2469 = vst [vmem:[#allocation3] sm:$0xc] %v2467_v48  ;;  %v1119_v38 = vrot.slane %v1105_v29, 3  ;;  %v8247_v44 = vld [vmem:[%s10733_s3 + $0x158] sm:$0xff]   ;;  %7472 = vmatprep.subr.bf16.mxu0 %v8533_v25 }
 0x178   : > { %v2620_v40 = vrot.slane %v2618_v53, 5  ;;  %v2624_v48 = vld [vmem:[#allocation2 + $0x68] sm:$0x6]  ;;  %1042 = vst [vmem:[#allocation2 + $0x80] sm:$0x70] %v1041_v41  ;;  %v1120_v12 = vrot.slane %v1108_v56, 4  ;;  %v1111_v4 = vor.u32 %v1110_v52, %v1107_v39  ;;  %7447 = vmatpush3.bf16.msra.mxu1 %v8247_v44 }
 0x179   : > { %1118 = vst [vmem:[#allocation2 + $0xa8] sm:$0x3] %v1116_v1  ;;  %v1074_v7 = vshrl.u32 %v9348_v35, 16  ;;  %1099 = vst [vmem:[#allocation2 + $0x98] sm:$0xc0] %v9348_v35  ;;  %v2765_v49 = vshrl.u32 %v9332_v28, 16  ;;  %7448 = vmatprep.subr.bf16.mxu1 %v8533_v25 }
 0x17a   : > { %vm2608_vm11 = vsmask.f32 3328  ;;  %v1090_v18 = vrot.slane %v9348_v35, 1  ;;  %v2768_v33 = vshll.u32 %v9332_v28, 16  ;;  %v2603_v59 = vrot.slane %v2601_v2, 4  ;;  %v8242_v53 = vld [vmem:[%s10733_s3 + $0x1b0] sm:$0xff]  }
 0x17b   : > { %v1123_v46 = vld [vmem:[#allocation2 + $0xa8] sm:$0x1c]  ;;  %v2626_v10 = vrot.slane %v2624_v48, 5  ;;  %v1114_v32 = vsel %vm8732_vm14, %v1111_v4, %v1113_v61  ;;  %v1121_v16 = vor.u32 %v1120_v12, %v1119_v38  ;;  %v1086_v13 = vld [vmem:[#allocation2 + $0x98] sm:$0x1]  ;;  %v8249_v31 = vld [vmem:[%s10733_s3 + $0x160] sm:$0xff]   ;;  %v2621_v54 = vsel %vm2608_vm11, %v2616_v58, %v2620_v40  ;;  %7473 = vmatpush3.bf16.msra.mxu0 %v8242_v53 }
 0x17c   : > { %1092 = vst [vmem:[#allocation2 + $0x98] sm:$0x6] %v1090_v18  ;;  %v2750_v37 = vshrl.u32 %v9258_v11, 16  ;;  %v2754_v45 = vrot.slane %v2752_v30, 1  ;;  %1115 = vst [vmem:[#allocation2 + $0xa0] sm:$0xe0] %v1114_v32  ;;  %7474 = vmatprep.subr.bf16.mxu0 %v8533_v25  ;;  %7449 = vmatpush3.bf16.msra.mxu1 %v8249_v31 }
 0x17d   : > { %v1076_v42 = vrot.slane %v1074_v7, 1  ;;  %v9397_v51 = vld [vmem:[#allocation2 + $0x70] sm:$0x18]  ;;  %v9399_v23 = vrot.slane %v2765_v49, 1  ;;  %v1124_v11 = vsel %vm8740_vm15, %v1121_v16, %v1123_v46  ;;  %v1077_v30 = vshll.u32 %v9348_v35, 16  ;;  %v8251_v63 = vld [vmem:[%s10733_s3 + $0x168] sm:$0xff]   ;;  %7450 = vmatprep.subr.bf16.mxu1 %v8533_v25 }
 0x17e   : > { %v9404_v0 = vrot.slane %v2768_v33, 2  ;;  %v9406_v15 = vld [vmem:[#allocation3] sm:$0xff]  ;;  %v9408_v28 = vld [vmem:[#allocation2 + $0x78] sm:$0x3]  ;;  %v2893_v47 = vld [vmem:[#allocation2 + $0x80] sm:$0x3]  ;;  %v2755_v1 = vor.u32 %v2754_v45, %v2750_v37 }
 0x17f   : > { %1125 = vst [vmem:[#allocation2 + $0xa8] sm:$0x1c] %v1124_v11  ;;  %v1087_v50 = vsel %vm8915_vm2, %v1076_v42, %v1086_v13  ;;  %2605 = vst [vmem:[#allocation3] sm:$0x3] %v2603_v59  ;;  %v1079_v27 = vrot.slane %v1077_v30, 2  ;;  %v2900_v22 = vshrl.u32 %v2893_v47, 16  ;;  %7475 = vmatpush3.bf16.msra.mxu0 %v8244_v19 }
 0x180   : > { %2623 = vst [vmem:[#allocation3] sm:$0xc] %v2621_v54  ;;  %2628 = vst [vmem:[#allocation3] sm:$0x30] %v2626_v10  ;;  %v2892_v24 = vld [vmem:[#allocation2 + $0x78] sm:$0x80]  ;;  %v2771_v2 = vor.u32 %v9404_v0, %v9399_v23  ;;  %7500 = vmatprep.subr.bf16.mxu0 %v8533_v25  ;;  %7451 = vmatpush3.bf16.msra.mxu1 %v8251_v63 }
 0x181   : > { %2639 = vst [vmem:[#allocation3] sm:$0xc0] %v2637_v14  ;;  %1088 = vst [vmem:[#allocation2 + $0x98] sm:$0x1] %v1087_v50  ;;  %v2903_v8 = vshll.u32 %v2893_v47, 16  ;;  %v8246_v6 = vld [vmem:[%s10733_s3 + $0x200] sm:$0xff]   ;;  %v1080_v12 = vor.u32 %v1079_v27, %v1076_v42  ;;  %7452 = vmatprep.subr.bf16.mxu1 %v8533_v25 }
 0x182   : > { %v2915_v29 = vld [vmem:[#allocation2 + $0x80] sm:$0x70]  ;;  %v2760_v56 = vrot.slane %v9397_v51, 1  ;;  %v2776_v36 = vrot.slane %v9408_v28, 2  ;;  %vm2894_vm12 = vsmask.f32 2304  ;;  %7477 = vmatmul.mubr.bf16.vlgmr.msra.gmra.mrb[40].mxu0 %v9215_v20  ;;  %v627_v20 = vadd.f32 %v9234_v62, %v8928_v9 }
 0x183   : > { %v1083_v61 = vld [vmem:[#allocation2 + $0x90] sm:$0xc0]  ;;  %v9428_v41 = vld [vmem:[#allocation2 + $0x88] sm:$0xe]  ;;  %v9430_v39 = vld [vmem:[#allocation2 + $0x90] sm:$0x1]  ;;  %7501 = vmatpush3.bf16.msra.mxu0 %v8246_v6  ;;  %7516 = vmatprep.mubr.msk.bf16.mxu0 %vm8534_vm0, %v8533_v25 }
 0x184   : > { %v666_v52 = vmax.f32 %v9414_v57, 0.0  ;;  %v1154_v38 = vshrl.u32 %v9350_v43, 16  ;;  %v3050_v44 = vld [vmem:[#allocation2 + $0x88] sm:$0xc0]  ;;  %v2896_v58 = vshrl.u32 %v2892_v24, 16  ;;  %v2917_v40 = vshrl.u32 %v2915_v29, 16  ;;  %7502 = vmatprep.subr.bf16.mxu0 %v8533_v25 }
 0x185   : > { %v2920_v48 = vshll.u32 %v2915_v29, 16  ;;  %v8253_v49 = vld [vmem:[%s10733_s3 + $0x170] sm:$0xff]   ;;  %v2902_v4 = vrot.slane %v2900_v22, 5  ;;  %v2905_v18 = vrot.slane %v2903_v8, 6  ;;  %v1096_v33 = vld [vmem:[#allocation2 + $0x98] sm:$0x38]  ;;  %v1084_v10 = vsel %vm8948_vm10, %v1080_v12, %v1083_v61 }
 0x186   : > { %v3036_v59 = vshrl.u32 %v9428_v41, 16  ;;  %v3062_v53 = vshll.u32 %v9430_v39, 16  ;;  %v9441_v46 = vld [vmem:[#allocation2 + $0x78] sm:$0x60]  ;;  %v1093_v14 = vrot.slane %v1077_v30, 1  ;;  %v8248_v32 = vld [vmem:[%s10733_s3 + $0x208] sm:$0xff]   ;;  %7453 = vmatpush3.bf16.msra.mxu1 %v8253_v49 }
 0x187   : > { %v3039_v13 = vshll.u32 %v9428_v41, 16  ;;  %v3054_v31 = vshrl.u32 %v3050_v44, 16  ;;  %v3057_v37 = vshll.u32 %v3050_v44, 16  ;;  %v2910_v45 = vld [vmem:[#allocation2 + $0x80] sm:$0xc]  ;;  %v2898_v54 = vrot.slane %v2896_v58, 5  ;;  %7454 = vmatprep.subr.bf16.mxu1 %v8533_v25  ;;  %7503 = vmatpush3.bf16.msra.mxu0 %v8248_v32 }
 0x188   : > { %v9449_v16 = vld [vmem:[#allocation3] sm:$0xff]  ;;  %1085 = vst [vmem:[#allocation2 + $0x90] sm:$0xc0] %v1084_v10  ;;  %v2919_v19 = vrot.slane %v2917_v40, 6  ;;  %v2922_v42 = vrot.slane %v2920_v48, 7  ;;  %v1094_v51 = vor.u32 %v1093_v14, %v1074_v7  ;;  %v8255_v9 = vld [vmem:[%s10733_s3 + $0x178] sm:$0xff]   ;;  %v2906_v62 = vor.u32 %v2905_v18, %v2902_v4  ;;  %7504 = vmatprep.subr.bf16.mxu0 %v8533_v25 }
 0x189   : > { %2757 = vst [vmem:[#allocation3] sm:$0x3] %v2755_v1  ;;  %2762 = vst [vmem:[#allocation3] sm:$0xc] %v2760_v56  ;;  %v8250_v23 = vld [vmem:[%s10733_s3 + $0x210] sm:$0xff]   ;;  %v1156_v11 = vrot.slane %v1154_v38, 4 }
 0x18a   : > { %2773 = vst [vmem:[#allocation3] sm:$0x30] %v2771_v2  ;;  %2778 = vst [vmem:[#allocation3] sm:$0xc0] %v2776_v36  ;;  %v1157_v30 = vshll.u32 %v9350_v43, 16  ;;  %v1166_v0 = vrot.slane %v9350_v43, 4  ;;  %v1097_v28 = vsel %vm8805_vm7, %v1094_v51, %v1096_v33  ;;  %v2923_v29 = vor.u32 %v2922_v42, %v2919_v19  ;;  %7455 = vmatpush3.bf16.msra.mxu1 %v8255_v9 }
 0x18b   : > { %v2889_v35 = vrot.slane %v9441_v46, 5  ;;  %v2912_v7 = vrot.slane %v2910_v45, 6  ;;  %v1162_v47 = vld [vmem:[#allocation2 + $0xb8] sm:$0x38]  ;;  %v9471_v50 = vrot.slane %v3054_v31, 2  ;;  %v1169_v63 = vrot.slane %v1154_v38, 3  ;;  %7480 = vmatprep.subr.bf16.mxu1 %v8533_v25  ;;  %7505 = vmatpush3.bf16.msra.mxu0 %v8250_v23 }
 0x18c   : > { %1098 = vst [vmem:[#allocation2 + $0x98] sm:$0x38] %v1097_v28  ;;  %v1159_v27 = vrot.slane %v1157_v30, 5  ;;  %1168 = vst [vmem:[#allocation2 + $0xb8] sm:$0xc0] %v1166_v0  ;;  %v1170_v24 = vrot.slane %v1157_v30, 4  ;;  %v2907_v61 = vsel %vm2894_vm12, %v2898_v54, %v2906_v62  ;;  %7506 = vmatprep.subr.bf16.mxu0 %v8533_v25 }
 0x18d   : > { %v1173_v22 = vld [vmem:[#allocation2 + $0xc0] sm:$0x7]  ;;  %v9473_v8 = vrot.slane %v3057_v37, 3  ;;  %v1176_v6 = vrot.slane %v9350_v43, 3  ;;  %v667_v56 = vmax.f32 %v627_v20, 0.0  ;;  %v8252_v1 = vld [vmem:[%s10733_s3 + $0x218] sm:$0xff]   ;;  %7457 = vmatmul.mubr.bf16.vlgmr.msra.gmra.mrb[12].mxu1 %v9157_v34 }
 0x18e   : > { %v8257_v36 = vld [vmem:[%s10733_s3 + $0x1c0] sm:$0xff]   ;;  %v1160_v2 = vor.u32 %v1159_v27, %v1156_v11  ;;  %v1171_v41 = vor.u32 %v1170_v24, %v1169_v63  ;;  %v3201_v44 = vld [vmem:[#allocation2 + $0x68] sm:$0xe]  ;;  %v3038_v58 = vrot.slane %v3036_v59, 1  ;;  %v3045_v40 = vld [vmem:[#allocation2 + $0x88] sm:$0x30]  ;;  %7496 = vmatprep.mubr.msk.bf16.mxu1 %vm8534_vm0, %v8533_v25 }
 0x18f   : > { %v3181_v38 = vld [vmem:[#allocation2 + $0x60] sm:$0x70]  ;;  %1178 = vst [vmem:[#allocation2 + $0xc0] sm:$0x18] %v1176_v6  ;;  %v684_v43 = vpack.c.bf16 %v667_v56, %v666_v52  ;;  %v3041_v49 = vrot.slane %v3039_v13, 2  ;;  %7481 = vmatpush3.bf16.msra.mxu1 %v8257_v36  ;;  %v3060_v34 = vor.u32 %v9473_v8, %v9471_v50  ;;  %v3064_v33 = vrot.slane %v3062_v53, 3  ;;  %7507 = vmatpush3.bf16.msra.mxu0 %v8252_v1 }
 0x190   : > { %v1163_v12 = vsel %vm8805_vm7, %v1160_v2, %v1162_v47  ;;  %v3068_v4 = vld [vmem:[#allocation2 + $0x90] sm:$0x6]  ;;  %v1174_v57 = vsel %vm8816_vm8, %v1171_v41, %v1173_v22  ;;  %7482 = vmatprep.subr.bf16.mxu1 %v8533_v25  ;;  %v3183_v5 = vshrl.u32 %v3181_v38, 16  ;;  %v3186_v46 = vshll.u32 %v3181_v38, 16  ;;  %v8254_v10 = vld [vmem:[%s10733_s3 + $0x220] sm:$0xff]   ;;  %7508 = vmatprep.subr.bf16.mxu0 %v8533_v25  ;;  %v8256_v50 = vld [vmem:[%s10733_s3 + $0x228] sm:$0xff]  }
 0x191   : > { %v9487_v48 = vld [vmem:[#allocation3] sm:$0xff]  ;;  %1164 = vst [vmem:[#allocation2 + $0xb8] sm:$0x38] %v1163_v12  ;;  %v1127_v52 = vrot.slane %v684_v43, 1  ;;  %v1134_v18 = vshll.u32 %v684_v43, 16  ;;  %v1132_v59 = vshrl.u32 %v684_v43, 16  ;;  %v3042_v31 = vor.u32 %v3041_v49, %v3038_v58 }
 0x192   : > { %2891 = vst [vmem:[#allocation3] sm:$0x3] %v2889_v35  ;;  %2909 = vst [vmem:[#allocation3] sm:$0xc] %v2907_v61  ;;  %vm3052_vm13 = vsmask.f32 5376 }
 0x193   : > { %2914 = vst [vmem:[#allocation3] sm:$0x30] %v2912_v7  ;;  %2925 = vst [vmem:[#allocation3] sm:$0xc0] %v2923_v29  ;;  %v3203_v14 = vshrl.u32 %v3201_v44, 16  ;;  %v3206_v32 = vshll.u32 %v3201_v44, 16  ;;  %7483 = vmatpush3.bf16.msra.mxu1 %v8259_v60  ;;  %v3065_v51 = vsel %vm3052_vm13, %v3060_v34, %v3064_v33  ;;  %7509 = vmatpush3.bf16.msra.mxu0 %v8254_v10 }
 0x194   : > { %1142 = vst [vmem:[#allocation2 + $0xb0] sm:$0x30] %v684_v43  ;;  %1175 = vst [vmem:[#allocation2 + $0xc0] sm:$0x7] %v1174_v57  ;;  %v1139_v39 = vld [vmem:[#allocation2 + $0xb0] sm:$0xe]  ;;  %7484 = vmatprep.subr.bf16.mxu1 %v8533_v25  ;;  %7510 = vmatprep.subr.bf16.mxu0 %v8533_v25 }
 0x195   : > { %1129 = vst [vmem:[#allocation2 + $0xb0] ss:$-4 sps:$4 sm:$0x81] %v1127_v52   ;;  %v1150_v53 = vld [vmem:[#allocation2 + $0xb8] sm:$0x1]  ;;  %v3047_v37 = vrot.slane %v3045_v40, 2 }
 0x196   : > { %v3192_v13 = vld [vmem:[#allocation2 + $0x60] sm:$0x80]  ;;  %v3070_v45 = vrot.slane %v3068_v4, 3  ;;  %v1136_v20 = vrot.slane %v1134_v18, 1  ;;  %v1147_v54 = vld [vmem:[#allocation2 + $0xb0] sm:$0xc0] }
 0x197   : > { %v8261_v19 = vld [vmem:[%s10733_s3 + $0x1d0] sm:$0xff]   ;;  %v3193_v42 = vld [vmem:[#allocation2 + $0x68] sm:$0x1]  ;;  %v1143_v9 = vrot.slane %v1132_v59, 7  ;;  %v3185_v62 = vrot.slane %v3183_v5, 4  ;;  %v3188_v23 = vrot.slane %v3186_v46, 5  ;;  %7511 = vmatpush3.bf16.msra.mxu0 %v8256_v50 }
 0x198   : > { %v1137_v11 = vor.u32 %v1136_v20, %v1132_v59  ;;  %v3205_v30 = vrot.slane %v3203_v14, 5  ;;  %v3208_v0 = vrot.slane %v3206_v32, 6  ;;  %v3212_v35 = vld [vmem:[#allocation2 + $0x68] sm:$0x30]  ;;  %v3196_v27 = vrot.slane %v3192_v13, 5  ;;  %7485 = vmatpush3.bf16.msra.mxu1 %v8261_v19  ;;  %v8265_v61 = vld [vmem:[%s10733_s3 + $0x1e0] sm:$0xff]   ;;  %7512 = vmatprep.subr.bf16.mxu0 %v8533_v25 }
 0x199   : > { %v1144_v28 = vor.u32 %v1143_v9, %v1134_v18  ;;  %v1151_v47 = vsel %vm8915_vm2, %v1143_v9, %v1150_v53  ;;  %v3197_v63 = vrot.slane %v3193_v42, 5  ;;  %v3330_v24 = vld [vmem:[#allocation2 + $0x98] sm:$0x7]  ;;  %v3464_v8 = vld [vmem:[#allocation2 + $0xa0] sm:$0x1c]  ;;  %7486 = vmatprep.subr.bf16.mxu1 %v8533_v25  ;;  %v3214_v36 = vrot.slane %v3212_v35, 6 }
 0x19a   : > { %v9514_v7 = vld [vmem:[#allocation3] sm:$0xff]  ;;  %v1140_v22 = vsel %vm8932_vm9, %v1137_v11, %v1139_v39  ;;  %1152 = vst [vmem:[#allocation2 + $0xb8] sm:$0x1] %v1151_v47  ;;  %v3346_v6 = vld [vmem:[#allocation2 + $0x98] sm:$0xe0]  ;;  %v3189_v1 = vor.u32 %v3188_v23, %v3185_v62  ;;  %v3209_v2 = vor.u32 %v3208_v0, %v3205_v30  ;;  %v3332_v41 = vshrl.u32 %v3330_v24, 16 }
 0x19b   : > { %3044 = vst [vmem:[#allocation3] sm:$0x3] %v3042_v31  ;;  %3049 = vst [vmem:[#allocation3] sm:$0xc] %v3047_v37  ;;  %v3481_v29 = vld [vmem:[#allocation2 + $0xa8] sm:$0x3]  ;;  %v1148_v56 = vsel %vm8948_vm10, %v1144_v28, %v1147_v54  ;;  %7513 = vmatpush3.bf16.msra.mxu0 %v8258_v3 }
 0x19c   : > { %3067 = vst [vmem:[#allocation3] sm:$0x30] %v3065_v51  ;;  %3072 = vst [vmem:[#allocation3] sm:$0xc0] %v3070_v45  ;;  %v3335_v38 = vshll.u32 %v3330_v24, 16  ;;  %v3466_v44 = vshrl.u32 %v3464_v8, 16  ;;  %7487 = vmatpush3.bf16.msra.mxu1 %v8263_v21  ;;  %7514 = vmatprep.subr.bf16.mxu0 %v8533_v25 }
 0x19d   : > { %1141 = vst [vmem:[#allocation2 + $0xb0] sm:$0xe] %v1140_v22  ;;  %1149 = vst [vmem:[#allocation2 + $0xb0] sm:$0xc0] %v1148_v56  ;;  %v3487_v17 = vshrl.u32 %v3481_v29, 16  ;;  %v3490_v43 = vshll.u32 %v3481_v29, 16  ;;  %7488 = vmatprep.subr.bf16.mxu1 %v8533_v25 }
 0x19e   : > { %v3348_v58 = vshrl.u32 %v3346_v6, 16  ;;  %vm10772_vm14 = vcmask 1042432   ;;  %v3480_v12 = vld [vmem:[#allocation2 + $0xa0] sm:$0x80]  ;;  %v8260_v49 = vld [vmem:[%s10733_s3 + $0x238] sm:$0xff]   ;;  %v3334_v57 = vrot.slane %v3332_v41, 6 }
 0x19f   : > { %v3198_v40 = vsel %vm10772_vm14, %v3196_v27, %v3197_v63  ;;  %v3337_v52 = vrot.slane %v3335_v38, 7  ;;  %v8267_v18 = vld [vmem:[%s10733_s3 + $0x1e8] sm:$0xff]   ;;  %v3325_v60 = vld [vmem:[#allocation2 + $0x90] sm:$0xc0]  ;;  %v3341_v34 = vld [vmem:[#allocation2 + $0x98] sm:$0x18]  ;;  %7515 = vmatpush3.bf16.msra.mxu0 %v8260_v49 }
 0x1a0   : > { %v3350_v33 = vrot.slane %v3348_v58, 7  ;;  %v3351_v59 = vshll.u32 %v3346_v6, 16  ;;  %7489 = vmatpush3.bf16.msra.mxu1 %v8265_v61  ;;  %v3469_v5 = vshll.u32 %v3464_v8, 16  ;;  %v3475_v46 = vld [vmem:[#allocation2 + $0xa0] sm:$0x60]  ;;  %v3468_v14 = vrot.slane %v3466_v44, 2  ;;  %7540 = vmatprep.subr.bf16.mxu0 %v8533_v25 }
 0x1a1   : > { %v8262_v10 = vld [vmem:[%s10733_s3 + $0x280] sm:$0xff]   ;;  %7490 = vmatprep.subr.bf16.mxu1 %v8533_v25  ;;  %v3483_v32 = vshrl.u32 %v3480_v12, 16  ;;  %v3489_v39 = vrot.slane %v3487_v17, 3  ;;  %v3492_v53 = vrot.slane %v3490_v43, 4  ;;  %v8269_v13 = vld [vmem:[%s10733_s3 + $0x1f0] sm:$0xff]   ;;  %v3327_v37 = vrot.slane %v3325_v60, 6 }
 0x1a2   : > { %v3497_v31 = vld [vmem:[#allocation2 + $0xa8] sm:$0xc]  ;;  %v3343_v45 = vrot.slane %v3341_v34, 7  ;;  %v3338_v20 = vor.u32 %v3337_v52, %v3334_v57  ;;  %v3353_v54 = vor.u32 %v3351_v59, %v3350_v33  ;;  %v3471_v51 = vrot.slane %v3469_v5, 3  ;;  %7517 = vmatmul.mubr.bf16.vlgmr.msra.gmra.mrb[44].mxu0 %v9342_v55  ;;  %v8271_v62 = vld [vmem:[%s10733_s3 + $0x1f8] sm:$0xff]   ;;  %v8266_v47 = vld [vmem:[%s10733_s3 + $0x290] sm:$0xff]  }
 0x1a3   : > { %v9542_v4 = vld [vmem:[#allocation3] sm:$0xff]  ;;  %v3477_v9 = vrot.slane %v3475_v46, 3  ;;  %v3485_v11 = vrot.slane %v3483_v32, 3  ;;  %v3632_v30 = vld [vmem:[#allocation2 + $0xb8] sm:$0x1]  ;;  %7541 = vmatpush3.bf16.msra.mxu0 %v8262_v10  ;;  %7556 = vmatprep.mubr.msk.bf16.mxu0 %vm8534_vm0, %v8533_v25  ;;  %v3499_v0 = vrot.slane %v3497_v31, 4  ;;  %v3493_v55 = vor.u32 %v3492_v53, %v3489_v39 }
 0x1a4   : > { %3191 = vst [vmem:[#allocation3] sm:$0x3] %v3189_v1  ;;  %3200 = vst [vmem:[#allocation3] sm:$0xc] %v3198_v40  ;;  %v3631_v19 = vld [vmem:[#allocation2 + $0xb0] sm:$0xc0]  ;;  %7491 = vmatpush3.bf16.msra.mxu1 %v8267_v18  ;;  %7542 = vmatprep.subr.bf16.mxu0 %v8533_v25  ;;  %v3472_v27 = vor.u32 %v3471_v51, %v3468_v14 }
 0x1a5   : > { %3211 = vst [vmem:[#allocation3] sm:$0x30] %v3209_v2  ;;  %3216 = vst [vmem:[#allocation3] sm:$0xc0] %v3214_v36  ;;  %v8264_v42 = vld [vmem:[%s10733_s3 + $0x288] sm:$0xff]   ;;  %7492 = vmatprep.subr.bf16.mxu1 %v8533_v25  ;;  %v3637_v28 = vshll.u32 %v3631_v19, 16  ;;  %v3494_v6 = vsel %vm2472_vm5, %v3485_v11, %v3493_v55 }
 0x1a6   : > { %v3619_v35 = vld [vmem:[#allocation2 + $0xb0] sm:$0xe]  ;;  %v8273_v50 = vld [vmem:[%s10733_s3 + $0x240] sm:$0xff]   ;;  %v3610_v63 = vld [vmem:[#allocation2 + $0xa8] sm:$0x80]  ;;  %v3635_v21 = vshrl.u32 %v3631_v19, 16 }
 0x1a7   : > { %7543 = vmatpush3.bf16.msra.mxu0 %v8264_v42  ;;  %v3611_v24 = vld [vmem:[#allocation2 + $0xb0] sm:$0x1]  ;;  %v3621_v22 = vshrl.u32 %v3619_v35, 16  ;;  %v3639_v8 = vrot.slane %v3637_v28, 1  ;;  %v3642_v29 = vshll.u32 %v3632_v30, 16  ;;  %v8268_v36 = vld [vmem:[%s10733_s3 + $0x298] sm:$0xff]  }
 0x1a8   : > { %7493 = vmatpush3.bf16.msra.mxu1 %v8269_v13  ;;  %7544 = vmatprep.subr.bf16.mxu0 %v8533_v25  ;;  %v3756_v3 = vld [vmem:[#allocation2 + $0xb8] sm:$0x38]  ;;  %v3624_v1 = vshll.u32 %v3619_v35, 16  ;;  %v8275_v2 = vld [vmem:[%s10733_s3 + $0x248] sm:$0xff]   ;;  %v3772_v41 = vld [vmem:[#allocation2 + $0xc0] sm:$0x7] }
 0x1a9   : > { %7494 = vmatprep.subr.bf16.mxu1 %v8533_v25  ;;  %v3623_v61 = vrot.slane %v3621_v22, 7  ;;  %v3614_v38 = vrot.slane %v3610_v63, 7  ;;  %v3615_v44 = vrot.slane %v3611_v24, 7  ;;  %v3640_v17 = vor.u32 %v3639_v8, %v3635_v21  ;;  %v8270_v58 = vld [vmem:[%s10733_s3 + $0x2a0] sm:$0xff]   ;;  %v8277_v52 = vld [vmem:[%s10733_s3 + $0x250] sm:$0xff]   ;;  %v8272_v5 = vld [vmem:[%s10733_s3 + $0x2a8] sm:$0xff]  }
 0x1aa   : > { %v3644_v43 = vrot.slane %v3642_v29, 1  ;;  %vm3633_vm15 = vsmask.f32 7424  ;;  %v3761_v40 = vshll.u32 %v3756_v3, 16  ;;  %v3774_v12 = vshrl.u32 %v3772_v41, 16  ;;  %v8279_v46 = vld [vmem:[%s10733_s3 + $0x258] sm:$0xff]  }
 0x1ab   : > { %7545 = vmatpush3.bf16.msra.mxu0 %v8266_v47  ;;  %v3777_v49 = vshll.u32 %v3772_v41, 16  ;;  %v3626_v57 = vor.u32 %v3624_v1, %v3623_v61  ;;  %vm10773_vm1 = vcmask 1040384   ;;  %v3629_v60 = vld [vmem:[#allocation2 + $0xb0] sm:$0x30]  ;;  %v3896_v33 = vld [vmem:[#allocation2 + $0x90] sm:$0xc0] }
 0x1ac   : > { %v9564_v23 = vld [vmem:[#allocation3] sm:$0xff]  ;;  %7495 = vmatpush3.bf16.msra.mxu1 %v8271_v62  ;;  %7546 = vmatprep.subr.bf16.mxu0 %v8533_v25  ;;  %v3616_v18 = vsel %vm10773_vm1, %v3614_v38, %v3615_v44  ;;  %v3645_v34 = vsel %vm3633_vm15, %v3640_v17, %v3644_v43  ;;  %v3918_v10 = vld [vmem:[#allocation2 + $0x98] sm:$0x38]  ;;  %v3763_v32 = vrot.slane %v3761_v40, 4  ;;  %v3776_v39 = vrot.slane %v3774_v12, 4  ;;  %v8274_v19 = vld [vmem:[%s10733_s3 + $0x2b0] sm:$0xff]  }
 0x1ad   : > { %3329 = vst [vmem:[#allocation3] sm:$0x3] %v3327_v37  ;;  %3340 = vst [vmem:[#allocation3] sm:$0xc] %v3338_v20  ;;  %7520 = vmatprep.subr.bf16.mxu1 %v8533_v25  ;;  %v3779_v53 = vrot.slane %v3777_v49, 5  ;;  %v3899_v13 = vshrl.u32 %v3896_v33, 16 }
 0x1ae   : > { %3345 = vst [vmem:[#allocation3] sm:$0x30] %v3343_v45  ;;  %3355 = vst [vmem:[#allocation3] sm:$0xc0] %v3353_v54  ;;  %v3902_v31 = vshll.u32 %v3896_v33, 16  ;;  %v3920_v54 = vshrl.u32 %v3918_v10, 16 }
 0x1af   : > { %7497 = vmatmul.mubr.bf16.vlgmr.msra.gmra.mrb[16].mxu1 %v9295_v26  ;;  %v3758_v26 = vshrl.u32 %v3756_v3, 16  ;;  %7547 = vmatpush3.bf16.msra.mxu0 %v8268_v36  ;;  %v3767_v37 = vld [vmem:[#allocation2 + $0xb8] sm:$0xc0]  ;;  %v3783_v45 = vld [vmem:[#allocation2 + $0xc0] sm:$0x18]  ;;  %v3901_v30 = vrot.slane %v3899_v13, 6 }
 0x1b0   : > { %7521 = vmatpush3.bf16.msra.mxu1 %v8273_v50  ;;  %7536 = vmatprep.mubr.msk.bf16.mxu1 %vm8534_vm0, %v8533_v25  ;;  %v3897_v20 = vld [vmem:[#allocation2 + $0x98] sm:$0x1]  ;;  %v3769_v51 = vrot.slane %v3767_v37, 4  ;;  %v3785_v62 = vrot.slane %v3783_v45, 5  ;;  %v8281_v11 = vld [vmem:[%s10733_s3 + $0x260] sm:$0xff]   ;;  %v3922_v47 = vrot.slane %v3920_v54, 7 }
 0x1b1   : > { %7522 = vmatprep.subr.bf16.mxu1 %v8533_v25  ;;  %7548 = vmatprep.subr.bf16.mxu0 %v8533_v25  ;;  %v3760_v14 = vrot.slane %v3758_v26, 3  ;;  %v3907_v35 = vshll.u32 %v3897_v20, 16  ;;  %v8276_v55 = vld [vmem:[%s10733_s3 + $0x2b8] sm:$0xff]   ;;  %v3923_v50 = vshll.u32 %v3918_v10, 16  ;;  %v4055_v21 = vld [vmem:[#allocation2 + $0x8] sm:$0x3] }
 0x1b2   : > { %v3913_v22 = vld [vmem:[#allocation2 + $0x98] sm:$0x6]  ;;  %v4038_v8 = vld [vmem:[#allocation2] sm:$0x1c]  ;;  %v8285_v61 = vld [vmem:[%s10733_s3 + $0x270] sm:$0xff]   ;;  %v4061_v1 = vshrl.u32 %v4055_v21, 16 }
 0x1b3   : > { %7549 = vmatpush3.bf16.msra.mxu0 %v8270_v58  ;;  %v3764_v42 = vor.u32 %v3763_v32, %v3760_v14  ;;  %v3909_v24 = vrot.slane %v3907_v35, 7  ;;  %v8278_v29 = vld [vmem:[%s10733_s3 + $0x300] sm:$0xff]   ;;  %v3915_v36 = vrot.slane %v3913_v22, 7  ;;  %v3925_v3 = vor.u32 %v3923_v50, %v3922_v47  ;;  %v3928_v38 = vld [vmem:[#allocation2 + $0x98] sm:$0xc0]  ;;  %v8280_v58 = vld [vmem:[%s10733_s3 + $0x308] sm:$0xff]  }
 0x1b4   : > { %7523 = vmatpush3.bf16.msra.mxu1 %v8275_v2  ;;  %7550 = vmatprep.subr.bf16.mxu0 %v8533_v25  ;;  %v4064_v2 = vshll.u32 %v4055_v21, 16  ;;  %v4040_v44 = vshrl.u32 %v4038_v8, 16  ;;  %v4043_v17 = vshll.u32 %v4038_v8, 16  ;;  %v4205_v43 = vld [vmem:[#allocation2 + $0x10] sm:$0xc0]  ;;  %v8287_v12 = vld [vmem:[%s10733_s3 + $0x278] sm:$0xff]  }
 0x1b5   : > { %v9579_v56 = vld [vmem:[#allocation3] sm:$0xff]  ;;  %7524 = vmatprep.subr.bf16.mxu1 %v8533_v25  ;;  %v8289_v10 = vld [vmem:[%s10733_s3 + $0x2c0] sm:$0xff]   ;;  %v8284_v20 = vld [vmem:[%s10733_s3 + $0x318] sm:$0xff]   ;;  %vm10775_vm2 = vsmask.f32 6400 }
 0x1b6   : > { %3479 = vst [vmem:[#allocation3] sm:$0xc] %v3477_v9  ;;  %3474 = vst [vmem:[#allocation3] sm:$0x3] %v3472_v27  ;;  %v3780_v9 = vor.u32 %v3779_v53, %v3776_v39  ;;  %v8283_v27 = vld [vmem:[%s10733_s3 + $0x268] sm:$0xff]   ;;  %v4066_v49 = vrot.slane %v4064_v2, 4 }
 0x1b7   : > { %3496 = vst [vmem:[#allocation3] sm:$0x30] %v3494_v6  ;;  %3501 = vst [vmem:[#allocation3] sm:$0xc0] %v3499_v0  ;;  %7551 = vmatpush3.bf16.msra.mxu0 %v8272_v5  ;;  %v3904_v0 = vrot.slane %v3902_v31, 7  ;;  %v8286_v47 = vld [vmem:[%s10733_s3 + $0x320] sm:$0xff]  }
 0x1b8   : > { %7525 = vmatpush3.bf16.msra.mxu1 %v8277_v52  ;;  %7552 = vmatprep.subr.bf16.mxu0 %v8533_v25  ;;  %v4054_v6 = vld [vmem:[#allocation2] sm:$0x80]  ;;  %v4210_v52 = vshll.u32 %v4205_v43, 16  ;;  %v4071_v5 = vld [vmem:[#allocation2 + $0x8] sm:$0xc]  ;;  %v8293_v50 = vld [vmem:[%s10733_s3 + $0x2d0] sm:$0xff]  }
 0x1b9   : > { %7526 = vmatprep.subr.bf16.mxu1 %v8533_v25  ;;  %v3905_v63 = vor.u32 %v3904_v0, %v3901_v30  ;;  %v4057_v26 = vshrl.u32 %v4054_v6, 16  ;;  %v4206_v39 = vld [vmem:[#allocation2 + $0x18] sm:$0x1]  ;;  %v4073_v31 = vrot.slane %v4071_v5, 4  ;;  %v4329_v0 = vld [vmem:[#allocation2 + $0x18] sm:$0x38] }
 0x1ba   : > { %v4212_v37 = vrot.slane %v4210_v52, 1  ;;  %v4345_v35 = vld [vmem:[#allocation2 + $0x20] sm:$0x7]  ;;  %v4331_v22 = vshrl.u32 %v4329_v0, 16  ;;  %v4334_v21 = vshll.u32 %v4329_v0, 16 }
 0x1bb   : > { %7553 = vmatpush3.bf16.msra.mxu0 %v8274_v19  ;;  %v3910_v41 = vsel %vm759_vm4, %v3905_v63, %v3909_v24  ;;  %v4059_v33 = vrot.slane %v4057_v26, 3  ;;  %v4185_v19 = vld [vmem:[#allocation2 + $0x10] sm:$0x1]  ;;  %v4347_v8 = vshrl.u32 %v4345_v35, 16  ;;  %v4203_v6 = vld [vmem:[#allocation2 + $0x10] sm:$0x30]  ;;  %vm10774_vm4 = vmmov %vm10773_vm1 }
 0x1bc   : > { %7527 = vmatpush3.bf16.msra.mxu1 %v8279_v46  ;;  %7554 = vmatprep.subr.bf16.mxu0 %v8533_v25  ;;  %v8282_v46 = vld [vmem:[%s10733_s3 + $0x310] sm:$0xff]   ;;  %v4486_v52 = vld [vmem:[#allocation2 + $0x28] sm:$0x80] }
 0x1bd   : > { %7528 = vmatprep.subr.bf16.mxu1 %v8533_v25  ;;  %v4487_v2 = vld [vmem:[#allocation2 + $0x30] sm:$0x3]  ;;  %v4349_v26 = vrot.slane %v4347_v8, 4 }
 0x1be   : > { %v9602_v59 = vld [vmem:[#allocation3] sm:$0xff] }
 0x1bf   : > { %3618 = vst [vmem:[#allocation3] sm:$0x3] %v3616_v18  ;;  %3628 = vst [vmem:[#allocation3] sm:$0xc] %v3626_v57  ;;  %7555 = vmatpush3.bf16.msra.mxu0 %v8276_v55  ;;  %v4193_v57 = vld [vmem:[#allocation2 + $0x10] sm:$0xe] }
 0x1c0   : > { %3630 = vst [vmem:[#allocation3] sm:$0x30] %v3629_v60  ;;  %3647 = vst [vmem:[#allocation3] sm:$0xc0] %v3645_v34  ;;  %7529 = vmatpush3.bf16.msra.mxu1 %v8281_v11  ;;  %7580 = vmatprep.subr.bf16.mxu0 %v8533_v25  ;;  %v4042_v18 = vrot.slane %v4040_v44, 2  ;;  %v4045_v60 = vrot.slane %v4043_v17, 3 }
 0x1c1   : > { %7530 = vmatprep.subr.bf16.mxu1 %v8533_v25  ;;  %v4049_v34 = vld [vmem:[#allocation2] sm:$0x60]  ;;  %v4195_v14 = vshrl.u32 %v4193_v57, 16  ;;  %v4184_v11 = vld [vmem:[#allocation2 + $0x8] sm:$0x80]  ;;  %v4189_v55 = vrot.slane %v4185_v19, 7 }
 0x1c2   : > { %7557 = vmatmul.mubr.bf16.vlgmr.msra.gmra.mrb[48].mxu0 %v9449_v16  ;;  %v4063_v16 = vrot.slane %v4061_v1, 3  ;;  %v4046_v53 = vor.u32 %v4045_v60, %v4042_v18  ;;  %v4051_v13 = vrot.slane %v4049_v34, 3  ;;  %v4188_v24 = vrot.slane %v4184_v11, 7  ;;  %v4471_v44 = vld [vmem:[#allocation2 + $0x28] sm:$0x1c]  ;;  %v8297_v18 = vld [vmem:[%s10733_s3 + $0x2e0] sm:$0xff]  }
 0x1c3   : > { %7581 = vmatpush3.bf16.msra.mxu0 %v8278_v29  ;;  %7596 = vmatprep.mubr.msk.bf16.mxu0 %vm8534_vm0, %v8533_v25  ;;  %v4350_v29 = vshll.u32 %v4345_v35, 16  ;;  %v4333_v17 = vrot.slane %v4331_v22, 3  ;;  %v4475_v60 = vshll.u32 %v4471_v44, 16  ;;  %v4481_v19 = vld [vmem:[#allocation2 + $0x28] sm:$0x60] }
 0x1c4   : > { %7531 = vmatpush3.bf16.msra.mxu1 %v8283_v27  ;;  %7582 = vmatprep.subr.bf16.mxu0 %v8533_v25  ;;  %v4067_v32 = vor.u32 %v4066_v49, %v4063_v16  ;;  %v4496_v16 = vshll.u32 %v4487_v2, 16  ;;  %v4356_v49 = vld [vmem:[#allocation2 + $0x20] sm:$0x18] }
 0x1c5   : > { %7532 = vmatprep.subr.bf16.mxu1 %v8533_v25 }
 0x1c6   : > { %v4068_v45 = vsel %vm2472_vm5, %v4059_v33, %v4067_v32  ;;  %v4498_v32 = vrot.slane %v4496_v16, 2  ;;  %v8306_v16 = vld [vmem:[%s10733_s3 + $0x3b0] sm:$0xff]  }
 0x1c7   : > { %v9620_v28 = vld [vmem:[#allocation3] sm:$0xff]  ;;  %7583 = vmatpush3.bf16.msra.mxu0 %v8280_v58  ;;  %v4352_v58 = vrot.slane %v4350_v29, 5  ;;  %v4611_v29 = vld [vmem:[#allocation2] sm:$0x18] }
 0x1c8   : > { %3766 = vst [vmem:[#allocation3] sm:$0x3] %v3764_v42  ;;  %3771 = vst [vmem:[#allocation3] sm:$0xc] %v3769_v51  ;;  %7533 = vmatpush3.bf16.msra.mxu1 %v8285_v61  ;;  %7584 = vmatprep.subr.bf16.mxu0 %v8533_v25  ;;  %v8291_v42 = vld [vmem:[%s10733_s3 + $0x2c8] sm:$0xff]   ;;  %v4197_v51 = vrot.slane %v4195_v14, 7 }
 0x1c9   : > { %3782 = vst [vmem:[#allocation3] sm:$0x30] %v3780_v9  ;;  %3787 = vst [vmem:[#allocation3] sm:$0xc0] %v3785_v62  ;;  %7534 = vmatprep.subr.bf16.mxu1 %v8533_v25  ;;  %v4208_v9 = vshrl.u32 %v4205_v43, 16  ;;  %v4215_v62 = vshll.u32 %v4206_v39, 16  ;;  %v4353_v5 = vor.u32 %v4352_v58, %v4349_v26 }
 0x1ca   : > { %v8288_v61 = vld [vmem:[%s10733_s3 + $0x328] sm:$0xff]   ;;  %v4336_v43 = vrot.slane %v4334_v21, 4  ;;  %v8292_v39 = vld [vmem:[%s10733_s3 + $0x338] sm:$0xff]   ;;  %v8309_v26 = vld [vmem:[%s10733_s3 + $0x350] sm:$0xff]  }
 0x1cb   : > { %7585 = vmatpush3.bf16.msra.mxu0 %v8282_v46  ;;  %v4213_v30 = vor.u32 %v4212_v37, %v4208_v9  ;;  %v4217_v63 = vrot.slane %v4215_v62, 1  ;;  %v4358_v46 = vrot.slane %v4356_v49, 5  ;;  %v4473_v37 = vshrl.u32 %v4471_v44, 16  ;;  %v8294_v9 = vld [vmem:[%s10733_s3 + $0x380] sm:$0xff]   ;;  %v8301_v62 = vld [vmem:[%s10733_s3 + $0x2f0] sm:$0xff]   ;;  %v8300_v44 = vld [vmem:[%s10733_s3 + $0x398] sm:$0xff]  }
 0x1cc   : > { %7535 = vmatpush3.bf16.msra.mxu1 %v8287_v12  ;;  %7586 = vmatprep.subr.bf16.mxu0 %v8533_v25  ;;  %v4493_v12 = vshrl.u32 %v4487_v2, 16  ;;  %v4337_v34 = vor.u32 %v4336_v43, %v4333_v17  ;;  %v8307_v43 = vld [vmem:[%s10733_s3 + $0x348] sm:$0xff]   ;;  %v8313_v49 = vld [vmem:[%s10733_s3 + $0x360] sm:$0xff]  }
 0x1cd   : > { %7560 = vmatprep.subr.bf16.mxu1 %v8533_v25  ;;  %v8304_v58 = vld [vmem:[%s10733_s3 + $0x3a8] sm:$0xff]  }
 0x1ce   : > { %v4495_v14 = vrot.slane %v4493_v12, 1  ;;  %v8311_v12 = vld [vmem:[%s10733_s3 + $0x358] sm:$0xff]  }
 0x1cf   : > { %7537 = vmatmul.mubr.bf16.vlgmr.msra.gmra.mrb[20].mxu1 %v9406_v15  ;;  %v4198_v15 = vshll.u32 %v4193_v57, 16  ;;  %7587 = vmatpush3.bf16.msra.mxu0 %v8284_v20  ;;  %v8290_v57 = vld [vmem:[%s10733_s3 + $0x330] sm:$0xff]   ;;  %v4632_v20 = vld [vmem:[#allocation2 + $0x8] sm:$0x1c] }
 0x1d0   : > { %v9645_v40 = vld [vmem:[#allocation3] sm:$0xff]  ;;  %7561 = vmatpush3.bf16.msra.mxu1 %v8289_v10  ;;  %7576 = vmatprep.mubr.msk.bf16.mxu1 %vm8534_vm0, %v8533_v25  ;;  %v4489_v10 = vshrl.u32 %v4486_v52, 16  ;;  %v4637_v0 = vshll.u32 %v4632_v20, 16 }
 0x1d1   : > { %3912 = vst [vmem:[#allocation3] sm:$0x3] %v3910_v41  ;;  %3917 = vst [vmem:[#allocation3] sm:$0xc] %v3915_v36  ;;  %7562 = vmatprep.subr.bf16.mxu1 %v8533_v25  ;;  %7588 = vmatprep.subr.bf16.mxu0 %v8533_v25  ;;  %v4200_v27 = vor.u32 %v4198_v15, %v4197_v51  ;;  %v4218_v36 = vsel %vm3633_vm15, %v4213_v30, %v4217_v63  ;;  %v8295_v41 = vld [vmem:[%s10733_s3 + $0x2d8] sm:$0xff]   ;;  %v4634_v30 = vshrl.u32 %v4632_v20, 16 }
 0x1d2   : > { %3927 = vst [vmem:[#allocation3] sm:$0x30] %v3925_v3  ;;  %3929 = vst [vmem:[#allocation3] sm:$0xc0] %v3928_v38  ;;  %v4190_v3 = vsel %vm10774_vm4, %v4188_v24, %v4189_v55  ;;  %v4340_v38 = vld [vmem:[#allocation2 + $0x18] sm:$0xc0]  ;;  %v4499_v51 = vor.u32 %v4498_v32, %v4495_v14 }
 0x1d3   : > { %7589 = vmatpush3.bf16.msra.mxu0 %v8286_v47  ;;  %v4342_v33 = vrot.slane %v4340_v38, 4  ;;  %v4483_v55 = vrot.slane %v4481_v19, 1  ;;  %v4469_v47 = vld [vmem:[#allocation2 + $0x28] sm:$0x3]  ;;  %v4636_v21 = vrot.slane %v4634_v30, 4  ;;  %v4639_v8 = vrot.slane %v4637_v0, 5 }
 0x1d4   : > { %7563 = vmatpush3.bf16.msra.mxu1 %v8291_v42  ;;  %7590 = vmatprep.subr.bf16.mxu0 %v8533_v25  ;;  %v4491_v42 = vrot.slane %v4489_v10, 1  ;;  %v8315_v52 = vld [vmem:[%s10733_s3 + $0x368] sm:$0xff]   ;;  %v8319_v14 = vld [vmem:[%s10733_s3 + $0x378] sm:$0xff]   ;;  %v8321_v32 = vld [vmem:[%s10733_s3 + $0x3c0] sm:$0xff]  }
 0x1d5   : > { %7564 = vmatprep.subr.bf16.mxu1 %v8533_v25  ;;  %v4640_v38 = vor.u32 %v4639_v8, %v4636_v21  ;;  %v8312_v10 = vld [vmem:[%s10733_s3 + $0x408] sm:$0xff]   ;;  %v8326_v0 = vld [vmem:[%s10733_s3 + $0x480] sm:$0xff]   ;;  %v8335_v8 = vld [vmem:[%s10733_s3 + $0x3f8] sm:$0xff]  }
 0x1d7   : > { %7591 = vmatpush3.bf16.msra.mxu0 %v8288_v61  ;;  %v4613_v61 = vrot.slane %v4611_v29, 3  ;;  %v8337_v29 = vld [vmem:[%s10733_s3 + $0x440] sm:$0xff]  }
 0x1d8   : > { %7565 = vmatpush3.bf16.msra.mxu1 %v8293_v50  ;;  %7592 = vmatprep.subr.bf16.mxu0 %v8533_v25  ;;  %v4500_v50 = vsel %vm10775_vm2, %v4491_v42, %v4499_v51  ;;  %v8322_v42 = vld [vmem:[%s10733_s3 + $0x430] sm:$0xff]  }
 0x1d9   : > { %v9665_v54 = vld [vmem:[#allocation3] sm:$0xff]  ;;  %7566 = vmatprep.subr.bf16.mxu1 %v8533_v25 }
 0x1da   : > { %4048 = vst [vmem:[#allocation3] sm:$0x3] %v4046_v53  ;;  %4053 = vst [vmem:[#allocation3] sm:$0xc] %v4051_v13  ;;  %v8299_v13 = vld [vmem:[%s10733_s3 + $0x2e8] sm:$0xff]  }
 0x1db   : > { %4070 = vst [vmem:[#allocation3] sm:$0x30] %v4068_v45  ;;  %4075 = vst [vmem:[#allocation3] sm:$0xc0] %v4073_v31  ;;  %7593 = vmatpush3.bf16.msra.mxu0 %v8290_v57  ;;  %v4616_v31 = vld [vmem:[#allocation2] sm:$0xe0] }
 0x1dc   : > { %7567 = vmatpush3.bf16.msra.mxu1 %v8295_v41  ;;  %7594 = vmatprep.subr.bf16.mxu0 %v8533_v25  ;;  %v4477_v45 = vrot.slane %v4475_v60, 1  ;;  %v4618_v15 = vshrl.u32 %v4616_v31, 16  ;;  %v4621_v11 = vshll.u32 %v4616_v31, 16  ;;  %v8308_v57 = vld [vmem:[%s10733_s3 + $0x3b8] sm:$0xff]   ;;  %v8310_v60 = vld [vmem:[%s10733_s3 + $0x400] sm:$0xff]  }
 0x1dd   : > { %7568 = vmatprep.subr.bf16.mxu1 %v8533_v25  ;;  %v8318_v31 = vld [vmem:[%s10733_s3 + $0x420] sm:$0xff]  }
 0x1de   : > { %v4478_v35 = vor.u32 %v4477_v45, %v4473_v37  ;;  %v4620_v24 = vrot.slane %v4618_v15, 3  ;;  %v4623_v22 = vrot.slane %v4621_v11, 4  ;;  %v8320_v37 = vld [vmem:[%s10733_s3 + $0x428] sm:$0xff]   ;;  %v8327_v45 = vld [vmem:[%s10733_s3 + $0x3d8] sm:$0xff]  }
 0x1df   : > { %7595 = vmatpush3.bf16.msra.mxu0 %v8292_v39  ;;  %v8316_v39 = vld [vmem:[%s10733_s3 + $0x418] sm:$0xff]   ;;  %v8331_v11 = vld [vmem:[%s10733_s3 + $0x3e8] sm:$0xff]  }
 0x1e0   : > { %7569 = vmatpush3.bf16.msra.mxu1 %v8297_v18  ;;  %7620 = vmatprep.subr.bf16.mxu0 %v8533_v25  ;;  %v4624_v2 = vor.u32 %v4623_v22, %v4620_v24  ;;  %v8324_v15 = vld [vmem:[%s10733_s3 + $0x438] sm:$0xff]   ;;  %v8328_v22 = vld [vmem:[%s10733_s3 + $0x488] sm:$0xff]  }
 0x1e1   : > { %7570 = vmatprep.subr.bf16.mxu1 %v8533_v25 }
 0x1e2   : > { %v9687_v1 = vld [vmem:[#allocation3] sm:$0xff]  ;;  %7597 = vmatmul.mubr.bf16.vlgmr.msra.gmra.mrb[52].mxu0 %v9514_v7  ;;  %v8303_v7 = vld [vmem:[%s10733_s3 + $0x2f8] sm:$0xff]  }
 0x1e3   : > { %4192 = vst [vmem:[#allocation3] sm:$0x3] %v4190_v3  ;;  %4202 = vst [vmem:[#allocation3] sm:$0xc] %v4200_v27  ;;  %7621 = vmatpush3.bf16.msra.mxu0 %v8294_v9  ;;  %v8296_v27 = vld [vmem:[%s10733_s3 + $0x388] sm:$0xff]   ;;  %7636 = vmatprep.mubr.msk.bf16.mxu0 %vm8534_vm0, %v8533_v25  ;;  %v8305_v3 = vld [vmem:[%s10733_s3 + $0x340] sm:$0xff]  }
 0x1e4   : > { %4204 = vst [vmem:[#allocation3] sm:$0x30] %v4203_v6  ;;  %4220 = vst [vmem:[#allocation3] sm:$0xc0] %v4218_v36  ;;  %7571 = vmatpush3.bf16.msra.mxu1 %v8299_v13  ;;  %7622 = vmatprep.subr.bf16.mxu0 %v8533_v25  ;;  %v4627_v6 = vld [vmem:[#allocation2 + $0x8] sm:$0x3] }
 0x1e5   : > { %7572 = vmatprep.subr.bf16.mxu1 %v8533_v25  ;;  %v8298_v36 = vld [vmem:[%s10733_s3 + $0x390] sm:$0xff]   ;;  %v4629_v41 = vrot.slane %v4627_v6, 4  ;;  %v8323_v13 = vld [vmem:[%s10733_s3 + $0x3c8] sm:$0xff]   ;;  %v8332_v6 = vld [vmem:[%s10733_s3 + $0x498] sm:$0xff]  }
 0x1e7   : > { %7623 = vmatpush3.bf16.msra.mxu0 %v8296_v27 }
 0x1e8   : > { %7573 = vmatpush3.bf16.msra.mxu1 %v8301_v62  ;;  %7624 = vmatprep.subr.bf16.mxu0 %v8533_v25  ;;  %v8329_v62 = vld [vmem:[%s10733_s3 + $0x3e0] sm:$0xff]  }
 0x1e9   : > { %7574 = vmatprep.subr.bf16.mxu1 %v8533_v25 }
 0x1eb   : > { %v9705_v53 = vld [vmem:[#allocation3] sm:$0xff]  ;;  %7625 = vmatpush3.bf16.msra.mxu0 %v8298_v36 }
 0x1ec   : > { %4339 = vst [vmem:[#allocation3] sm:$0x3] %v4337_v34  ;;  %4344 = vst [vmem:[#allocation3] sm:$0xc] %v4342_v33  ;;  %7575 = vmatpush3.bf16.msra.mxu1 %v8303_v7  ;;  %7626 = vmatprep.subr.bf16.mxu0 %v8533_v25  ;;  %v8339_v36 = vld [vmem:[%s10733_s3 + $0x448] sm:$0xff]  }
 0x1ed   : > { %4355 = vst [vmem:[#allocation3] sm:$0x30] %v4353_v5  ;;  %4360 = vst [vmem:[#allocation3] sm:$0xc0] %v4358_v46  ;;  %7600 = vmatprep.subr.bf16.mxu1 %v8533_v25  ;;  %v8317_v5 = vld [vmem:[%s10733_s3 + $0x370] sm:$0xff]  }
 0x1ef   : > { %7577 = vmatmul.mubr.bf16.vlgmr.msra.gmra.mrb[24].mxu1 %v9487_v48  ;;  %7627 = vmatpush3.bf16.msra.mxu0 %v8300_v44  ;;  %v8302_v48 = vld [vmem:[%s10733_s3 + $0x3a0] sm:$0xff]  }
 0x1f0   : > { %7601 = vmatpush3.bf16.msra.mxu1 %v8305_v3  ;;  %7616 = vmatprep.mubr.msk.bf16.mxu1 %vm8534_vm0, %v8533_v25  ;;  %v8334_v3 = vld [vmem:[%s10733_s3 + $0x4a0] sm:$0xff]  }
 0x1f1   : > { %7602 = vmatprep.subr.bf16.mxu1 %v8533_v25  ;;  %7628 = vmatprep.subr.bf16.mxu0 %v8533_v25 }
 0x1f3   : > { %7629 = vmatpush3.bf16.msra.mxu0 %v8302_v48 }
 0x1f4   : > { %v9727_v63 = vld [vmem:[#allocation3] sm:$0xff]  ;;  %7603 = vmatpush3.bf16.msra.mxu1 %v8307_v43  ;;  %7630 = vmatprep.subr.bf16.mxu0 %v8533_v25  ;;  %v8338_v43 = vld [vmem:[%s10733_s3 + $0x4b0] sm:$0xff]  }
 0x1f5   : > { %4470 = vst [vmem:[#allocation3] sm:$0x3] %v4469_v47  ;;  %4480 = vst [vmem:[#allocation3] sm:$0xc] %v4478_v35  ;;  %7604 = vmatprep.subr.bf16.mxu1 %v8533_v25 }
 0x1f6   : > { %4485 = vst [vmem:[#allocation3] sm:$0x30] %v4483_v55  ;;  %4502 = vst [vmem:[#allocation3] sm:$0xc0] %v4500_v50  ;;  %v8333_v50 = vld [vmem:[%s10733_s3 + $0x3f0] sm:$0xff]  }
 0x1f7   : > { %7631 = vmatpush3.bf16.msra.mxu0 %v8304_v58  ;;  %v8340_v58 = vld [vmem:[%s10733_s3 + $0x4b8] sm:$0xff]  }
 0x1f8   : > { %7605 = vmatpush3.bf16.msra.mxu1 %v8309_v26  ;;  %7632 = vmatprep.subr.bf16.mxu0 %v8533_v25  ;;  %v8345_v26 = vld [vmem:[%s10733_s3 + $0x460] sm:$0xff]  }
 0x1f9   : > { %7606 = vmatprep.subr.bf16.mxu1 %v8533_v25 }
 0x1fb   : > { %7633 = vmatpush3.bf16.msra.mxu0 %v8306_v16  ;;  %v9787_v18 = vpop.f32.mrb[0].mxu1 }
 0x1fc   : > { %7607 = vmatpush3.bf16.msra.mxu1 %v8311_v12  ;;  %7634 = vmatprep.subr.bf16.mxu0 %v8533_v25  ;;  %v7358_v34 = vpop.f32.mrb[1].mxu1  ;;  %v8347_v12 = vld [vmem:[%s10733_s3 + $0x468] sm:$0xff]  }
 0x1fd   : > { %v9746_v17 = vld [vmem:[#allocation3] sm:$0xff]  ;;  %7608 = vmatprep.subr.bf16.mxu1 %v8533_v25  ;;  %v9793_v33 = vpop.f32.mrb[2].mxu1 }
 0x1fe   : > { %4615 = vst [vmem:[#allocation3] sm:$0x3] %v4613_v61  ;;  %4626 = vst [vmem:[#allocation3] sm:$0xc] %v4624_v2  ;;  %v7359_v46 = vpop.f32.mrb[3].mxu1  ;;  %v8336_v61 = vld [vmem:[%s10733_s3 + $0x4a8] sm:$0xff]  }
 0x1ff   : > { %4631 = vst [vmem:[#allocation3] sm:$0x30] %v4629_v41  ;;  %4642 = vst [vmem:[#allocation3] sm:$0xc0] %v4640_v38  ;;  %7635 = vmatpush3.bf16.msra.mxu0 %v8308_v57  ;;  %v8343_v2 = vld [vmem:[%s10733_s3 + $0x458] sm:$0xff]   ;;  %v8344_v46 = vld [vmem:[%s10733_s3 + $0x508] sm:$0xff]  }
 0x200   : > { %7609 = vmatpush3.bf16.msra.mxu1 %v8313_v49  ;;  %7660 = vmatprep.subr.bf16.mxu0 %v8533_v25  ;;  %v8342_v49 = vld [vmem:[%s10733_s3 + $0x500] sm:$0xff]  }
 0x201   : > { %7610 = vmatprep.subr.bf16.mxu1 %v8533_v25 }
 0x202   : > { %7637 = vmatmul.mubr.bf16.vlgmr.msra.gmra.mrb[56].mxu0 %v9564_v23  ;;  %v8314_v23 = vld [vmem:[%s10733_s3 + $0x410] sm:$0xff]  }
 0x203   : > { %7661 = vmatpush3.bf16.msra.mxu0 %v8310_v60  ;;  %7676 = vmatprep.mubr.msk.bf16.mxu0 %vm8534_vm0, %v8533_v25  ;;  %v8349_v60 = vld [vmem:[%s10733_s3 + $0x470] sm:$0xff]  }
 0x204   : > { %7611 = vmatpush3.bf16.msra.mxu1 %v8315_v52  ;;  %7662 = vmatprep.subr.bf16.mxu0 %v8533_v25 }
 0x205   : > { %7612 = vmatprep.subr.bf16.mxu1 %v8533_v25 }
 0x207   : > { %7663 = vmatpush3.bf16.msra.mxu0 %v8312_v10 }
 0x208   : > { %7613 = vmatpush3.bf16.msra.mxu1 %v8317_v5  ;;  %7664 = vmatprep.subr.bf16.mxu0 %v8533_v25 }
 0x209   : > { %7614 = vmatprep.subr.bf16.mxu1 %v8533_v25 }
 0x20b   : > { %7665 = vmatpush3.bf16.msra.mxu0 %v8314_v23  ;;  %v8353_v23 = vld [vmem:[%s10733_s3 + $0x4c0] sm:$0xff]  }
 0x20c   : > { %7615 = vmatpush3.bf16.msra.mxu1 %v8319_v14  ;;  %7666 = vmatprep.subr.bf16.mxu0 %v8533_v25  ;;  %v8351_v14 = vld [vmem:[%s10733_s3 + $0x478] sm:$0xff]  }
 0x20d   : > { %7640 = vmatprep.subr.bf16.mxu1 %v8533_v25 }
 0x20e   : > { %v1593_v20 = vpop.f32.mrb[32].mxu0 }
 0x20f   : > { %7617 = vmatmul.mubr.bf16.vlgmr.msra.gmra.mrb[28].mxu1 %v9542_v4  ;;  %7667 = vmatpush3.bf16.msra.mxu0 %v8316_v39  ;;  %v8325_v4 = vld [vmem:[%s10733_s3 + $0x3d0] sm:$0xff]   ;;  %v7398_v19 = vpop.f32.mrb[33].mxu0  ;;  %v8355_v39 = vld [vmem:[%s10733_s3 + $0x4c8] sm:$0xff]  }
 0x210   : > { %7641 = vmatpush3.bf16.msra.mxu1 %v8321_v32  ;;  %7656 = vmatprep.mubr.msk.bf16.mxu1 %vm8534_vm0, %v8533_v25  ;;  %v1596_v51 = vpop.f32.mrb[34].mxu0  ;;  %v8348_v32 = vld [vmem:[%s10733_s3 + $0x518] sm:$0xff]  }
 0x211   : > { %7642 = vmatprep.subr.bf16.mxu1 %v8533_v25  ;;  %7668 = vmatprep.subr.bf16.mxu0 %v8533_v25  ;;  %v7399_v9 = vpop.f32.mrb[35].mxu0 }
 0x212   : > { %v8356_v9 = vld [vmem:[%s10733_s3 + $0x538] sm:$0xff]  }
 0x213   : > { %7669 = vmatpush3.bf16.msra.mxu0 %v8318_v31  ;;  %v8352_v31 = vld [vmem:[%s10733_s3 + $0x528] sm:$0xff]  }
 0x214   : > { %7643 = vmatpush3.bf16.msra.mxu1 %v8323_v13  ;;  %7670 = vmatprep.subr.bf16.mxu0 %v8533_v25  ;;  %v8350_v13 = vld [vmem:[%s10733_s3 + $0x520] sm:$0xff]  }
 0x215   : > { %7644 = vmatprep.subr.bf16.mxu1 %v8533_v25 }
 0x217   : > { %7671 = vmatpush3.bf16.msra.mxu0 %v8320_v37 }
 0x218   : > { %7645 = vmatpush3.bf16.msra.mxu1 %v8325_v4  ;;  %7672 = vmatprep.subr.bf16.mxu0 %v8533_v25  ;;  %v8359_v4 = vld [vmem:[%s10733_s3 + $0x4d8] sm:$0xff]  }
 0x219   : > { %7646 = vmatprep.subr.bf16.mxu1 %v8533_v25 }
 0x21b   : > { %7673 = vmatpush3.bf16.msra.mxu0 %v8322_v42  ;;  %v1455_v30 = vpop.f32.mrb[4].mxu1 }
 0x21c   : > { %7647 = vmatpush3.bf16.msra.mxu1 %v8327_v45  ;;  %7674 = vmatprep.subr.bf16.mxu0 %v8533_v25  ;;  %v1456_v35 = vadd.f32 %v1455_v30, %v9787_v18  ;;  %v7378_v55 = vpop.f32.mrb[5].mxu1 }
 0x21d   : > { %7648 = vmatprep.subr.bf16.mxu1 %v8533_v25  ;;  %v1458_v47 = vpop.f32.mrb[6].mxu1  ;;  %v8365_v55 = vld [vmem:[%s10733_s3 + $0x4f0] sm:$0xff]  }
 0x21e   : > { %v1459_v27 = vadd.f32 %v1458_v47, %v9793_v33  ;;  %v7379_v7 = vpop.f32.mrb[7].mxu1  ;;  %v1600_v24 = vadd.f32 %v1593_v20, %v1456_v35  ;;  %v8354_v20 = vld [vmem:[%s10733_s3 + $0x530] sm:$0xff]  }
 0x21f   : > { %7675 = vmatpush3.bf16.msra.mxu0 %v8324_v15  ;;  %v8360_v7 = vld [vmem:[%s10733_s3 + $0x588] sm:$0xff]  }
 0x220   : > { %7649 = vmatpush3.bf16.msra.mxu1 %v8329_v62  ;;  %7700 = vmatprep.subr.bf16.mxu0 %v8533_v25  ;;  %v1601_v21 = vadd.f32 %v1596_v51, %v1459_v27  ;;  %v8361_v51 = vld [vmem:[%s10733_s3 + $0x4e0] sm:$0xff]   ;;  %v8363_v62 = vld [vmem:[%s10733_s3 + $0x4e8] sm:$0xff]  }
 0x221   : > { %7650 = vmatprep.subr.bf16.mxu1 %v8533_v25 }
 0x222   : > { %7677 = vmatmul.mubr.bf16.vlgmr.msra.gmra.mrb[60].mxu0 %v9602_v59  ;;  %v8330_v59 = vld [vmem:[%s10733_s3 + $0x490] sm:$0xff]  }
 0x223   : > { %7701 = vmatpush3.bf16.msra.mxu0 %v8326_v0  ;;  %7716 = vmatprep.mubr.msk.bf16.mxu0 %vm8534_vm0, %v8533_v25 }
 0x224   : > { %7651 = vmatpush3.bf16.msra.mxu1 %v8331_v11  ;;  %7702 = vmatprep.subr.bf16.mxu0 %v8533_v25  ;;  %v8358_v11 = vld [vmem:[%s10733_s3 + $0x580] sm:$0xff]  }
 0x225   : > { %7652 = vmatprep.subr.bf16.mxu1 %v8533_v25 }
 0x227   : > { %7703 = vmatpush3.bf16.msra.mxu0 %v8328_v22  ;;  %v8367_v22 = vld [vmem:[%s10733_s3 + $0x4f8] sm:$0xff]  }
 0x228   : > { %7653 = vmatpush3.bf16.msra.mxu1 %v8333_v50  ;;  %7704 = vmatprep.subr.bf16.mxu0 %v8533_v25 }
 0x229   : > { %7654 = vmatprep.subr.bf16.mxu1 %v8533_v25 }
 0x22b   : > { %7705 = vmatpush3.bf16.msra.mxu0 %v8330_v59  ;;  %v8371_v59 = vld [vmem:[%s10733_s3 + $0x548] sm:$0xff]  }
 0x22c   : > { %7655 = vmatpush3.bf16.msra.mxu1 %v8335_v8  ;;  %7706 = vmatprep.subr.bf16.mxu0 %v8533_v25  ;;  %v8364_v8 = vld [vmem:[%s10733_s3 + $0x598] sm:$0xff]  }
 0x22d   : > { %7680 = vmatprep.subr.bf16.mxu1 %v8533_v25 }
 0x22f   : > { %7657 = vmatmul.mubr.bf16.vlgmr.msra.gmra.mrb[32].mxu1 %v9579_v56  ;;  %7707 = vmatpush3.bf16.msra.mxu0 %v8332_v6  ;;  %v8341_v56 = vld [vmem:[%s10733_s3 + $0x450] sm:$0xff]   ;;  %v8368_v6 = vld [vmem:[%s10733_s3 + $0x5a8] sm:$0xff]  }
 0x230   : > { %7681 = vmatpush3.bf16.msra.mxu1 %v8337_v29  ;;  %7696 = vmatprep.mubr.msk.bf16.mxu1 %vm8534_vm0, %v8533_v25  ;;  %v8366_v29 = vld [vmem:[%s10733_s3 + $0x5a0] sm:$0xff]  }
 0x231   : > { %7682 = vmatprep.subr.bf16.mxu1 %v8533_v25  ;;  %7708 = vmatprep.subr.bf16.mxu0 %v8533_v25  ;;  %v1872_v41 = vpop.f32.mrb[36].mxu0 }
 0x232   : > { %v7438_v38 = vpop.f32.mrb[37].mxu0 }
 0x233   : > { %7709 = vmatpush3.bf16.msra.mxu0 %v8334_v3  ;;  %v1875_v44 = vpop.f32.mrb[38].mxu0  ;;  %v8377_v38 = vld [vmem:[%s10733_s3 + $0x560] sm:$0xff]  }
 0x234   : > { %7683 = vmatpush3.bf16.msra.mxu1 %v8339_v36  ;;  %7710 = vmatprep.subr.bf16.mxu0 %v8533_v25  ;;  %v7439_v48 = vpop.f32.mrb[39].mxu0  ;;  %v8375_v36 = vld [vmem:[%s10733_s3 + $0x558] sm:$0xff]  }
 0x235   : > { %7684 = vmatprep.subr.bf16.mxu1 %v8533_v25 }
 0x237   : > { %7711 = vmatpush3.bf16.msra.mxu0 %v8336_v61 }
 0x238   : > { %7685 = vmatpush3.bf16.msra.mxu1 %v8341_v56  ;;  %7712 = vmatprep.subr.bf16.mxu0 %v8533_v25 }
 0x239   : > { %7686 = vmatprep.subr.bf16.mxu1 %v8533_v25 }
 0x23b   : > { %7713 = vmatpush3.bf16.msra.mxu0 %v8338_v43  ;;  %v8379_v43 = vld [vmem:[%s10733_s3 + $0x568] sm:$0xff]  }
 0x23c   : > { %7687 = vmatpush3.bf16.msra.mxu1 %v8343_v2  ;;  %7714 = vmatprep.subr.bf16.mxu0 %v8533_v25  ;;  %v8370_v2 = vld [vmem:[%s10733_s3 + $0x5b0] sm:$0xff]  }
 0x23d   : > { %7688 = vmatprep.subr.bf16.mxu1 %v8533_v25  ;;  %v1733_v16 = vpop.f32.mrb[8].mxu1 }
 0x23e   : > { %v1740_v57 = vadd.f32 %v1733_v16, %v1600_v24  ;;  %v7418_v52 = vpop.f32.mrb[9].mxu1 }
 0x23f   : > { %7715 = vmatpush3.bf16.msra.mxu0 %v8340_v58  ;;  %v1736_v18 = vpop.f32.mrb[10].mxu1 }
 0x240   : > { %7689 = vmatpush3.bf16.msra.mxu1 %v8345_v26  ;;  %7740 = vmatprep.subr.bf16.mxu0 %v8533_v25  ;;  %v1741_v34 = vadd.f32 %v1736_v18, %v1601_v21  ;;  %v7419_v33 = vpop.f32.mrb[11].mxu1  ;;  %v1879_v5 = vadd.f32 %v1872_v41, %v1740_v57  ;;  %v8369_v21 = vld [vmem:[%s10733_s3 + $0x540] sm:$0xff]  }
 0x241   : > { %7690 = vmatprep.subr.bf16.mxu1 %v8533_v25  ;;  %v8374_v26 = vld [vmem:[%s10733_s3 + $0x600] sm:$0xff]   ;;  %v8383_v33 = vld [vmem:[%s10733_s3 + $0x578] sm:$0xff]  }
 0x242   : > { %7717 = vmatmul.mubr.bf16.vlgmr.msra.gmra.mrb[64].mxu0 %v9645_v40  ;;  %v1880_v10 = vadd.f32 %v1875_v44, %v1741_v34  ;;  %v8346_v40 = vld [vmem:[%s10733_s3 + $0x510] sm:$0xff]   ;;  %v8372_v44 = vld [vmem:[%s10733_s3 + $0x5b8] sm:$0xff]  }
 0x243   : > { %7741 = vmatpush3.bf16.msra.mxu0 %v8342_v49  ;;  %7756 = vmatprep.mubr.msk.bf16.mxu0 %vm8534_vm0, %v8533_v25  ;;  %v8381_v49 = vld [vmem:[%s10733_s3 + $0x570] sm:$0xff]  }
 0x244   : > { %7691 = vmatpush3.bf16.msra.mxu1 %v8347_v12  ;;  %7742 = vmatprep.subr.bf16.mxu0 %v8533_v25 }
 0x245   : > { %7692 = vmatprep.subr.bf16.mxu1 %v8533_v25 }
 0x247   : > { %7743 = vmatpush3.bf16.msra.mxu0 %v8344_v46  ;;  %v8380_v46 = vld [vmem:[%s10733_s3 + $0x618] sm:$0xff]  }
 0x248   : > { %7693 = vmatpush3.bf16.msra.mxu1 %v8349_v60  ;;  %7744 = vmatprep.subr.bf16.mxu0 %v8533_v25  ;;  %v8376_v60 = vld [vmem:[%s10733_s3 + $0x608] sm:$0xff]  }
 0x249   : > { %7694 = vmatprep.subr.bf16.mxu1 %v8533_v25 }
 0x24b   : > { %7745 = vmatpush3.bf16.msra.mxu0 %v8346_v40  ;;  %v8384_v40 = vld [vmem:[%s10733_s3 + $0x628] sm:$0xff]  }
 0x24c   : > { %7695 = vmatpush3.bf16.msra.mxu1 %v8351_v14  ;;  %7746 = vmatprep.subr.bf16.mxu0 %v8533_v25  ;;  %v8382_v14 = vld [vmem:[%s10733_s3 + $0x620] sm:$0xff]  }
 0x24d   : > { %7720 = vmatprep.subr.bf16.mxu1 %v8533_v25 }
 0x24f   : > { %7697 = vmatmul.mubr.bf16.vlgmr.msra.gmra.mrb[36].mxu1 %v9620_v28  ;;  %7747 = vmatpush3.bf16.msra.mxu0 %v8348_v32  ;;  %v8357_v28 = vld [vmem:[%s10733_s3 + $0x4d0] sm:$0xff]  }
 0x250   : > { %7721 = vmatpush3.bf16.msra.mxu1 %v8353_v23  ;;  %7736 = vmatprep.mubr.msk.bf16.mxu1 %vm8534_vm0, %v8533_v25  ;;  %v8390_v23 = vld [vmem:[%s10733_s3 + $0x5d8] sm:$0xff]  }
 0x251   : > { %7722 = vmatprep.subr.bf16.mxu1 %v8533_v25  ;;  %7748 = vmatprep.subr.bf16.mxu0 %v8533_v25 }
 0x253   : > { %7749 = vmatpush3.bf16.msra.mxu0 %v8350_v13  ;;  %v8386_v13 = vld [vmem:[%s10733_s3 + $0x630] sm:$0xff]  }
 0x254   : > { %7723 = vmatpush3.bf16.msra.mxu1 %v8355_v39  ;;  %7750 = vmatprep.subr.bf16.mxu0 %v8533_v25 }
 0x255   : > { %7724 = vmatprep.subr.bf16.mxu1 %v8533_v25  ;;  %v2159_v37 = vpop.f32.mrb[40].mxu0 }
 0x256   : > { %v7478_v45 = vpop.f32.mrb[41].mxu0 }
 0x257   : > { %7751 = vmatpush3.bf16.msra.mxu0 %v8352_v31  ;;  %v2162_v19 = vpop.f32.mrb[42].mxu0  ;;  %v8392_v45 = vld [vmem:[%s10733_s3 + $0x5e8] sm:$0xff]  }
 0x258   : > { %7725 = vmatpush3.bf16.msra.mxu1 %v8357_v28  ;;  %7752 = vmatprep.subr.bf16.mxu0 %v8533_v25  ;;  %v7479_v42 = vpop.f32.mrb[43].mxu0 }
 0x259   : > { %7726 = vmatprep.subr.bf16.mxu1 %v8533_v25 }
 0x25b   : > { %7753 = vmatpush3.bf16.msra.mxu0 %v8354_v20 }
 0x25c   : > { %7727 = vmatpush3.bf16.msra.mxu1 %v8359_v4  ;;  %7754 = vmatprep.subr.bf16.mxu0 %v8533_v25  ;;  %v8391_v4 = vld [vmem:[%s10733_s3 + $0x5e0] sm:$0xff]  }
 0x25d   : > { %7728 = vmatprep.subr.bf16.mxu1 %v8533_v25 }
 0x25f   : > { %7755 = vmatpush3.bf16.msra.mxu0 %v8356_v9  ;;  %v8393_v9 = vld [vmem:[%s10733_s3 + $0x5f0] sm:$0xff]  }
 0x260   : > { %7729 = vmatpush3.bf16.msra.mxu1 %v8361_v51  ;;  %v2017_v15 = vpop.f32.mrb[12].mxu1  ;;  %7780 = vmatprep.subr.bf16.mxu0 %v8533_v25 }
 0x261   : > { %7730 = vmatprep.subr.bf16.mxu1 %v8533_v25  ;;  %v2024_v30 = vadd.f32 %v2017_v15, %v1879_v5  ;;  %v7458_v0 = vpop.f32.mrb[13].mxu1  ;;  %v8385_v5 = vld [vmem:[%s10733_s3 + $0x5c0] sm:$0xff]  }
 0x262   : > { %v2020_v35 = vpop.f32.mrb[14].mxu1  ;;  %7757 = vmatmul.mubr.bf16.vlgmr.msra.gmra.mrb[68].mxu0 %v9687_v1  ;;  %v8362_v1 = vld [vmem:[%s10733_s3 + $0x590] sm:$0xff]  }
 0x263   : > { %v2025_v47 = vadd.f32 %v2020_v35, %v1880_v10  ;;  %v7459_v50 = vpop.f32.mrb[15].mxu1  ;;  %v2166_v27 = vadd.f32 %v2159_v37, %v2024_v30  ;;  %7781 = vmatpush3.bf16.msra.mxu0 %v8358_v11  ;;  %7796 = vmatprep.mubr.msk.bf16.mxu0 %vm8534_vm0, %v8533_v25  ;;  %v8387_v10 = vld [vmem:[%s10733_s3 + $0x5c8] sm:$0xff]   ;;  %v8388_v37 = vld [vmem:[%s10733_s3 + $0x638] sm:$0xff]  }
 0x264   : > { %7731 = vmatpush3.bf16.msra.mxu1 %v8363_v62  ;;  %7782 = vmatprep.subr.bf16.mxu0 %v8533_v25  ;;  %v4643_v62 = vld [vmem:[#allocation3] sm:$0xff]  ;;  %v8394_v35 = vld [vmem:[%s10733_s3 + $0x5f8] sm:$0xff]  }
 0x265   : > { %7732 = vmatprep.subr.bf16.mxu1 %v8533_v25  ;;  %v2167_v24 = vadd.f32 %v2162_v19, %v2025_v47 }
 0x267   : > { %7783 = vmatpush3.bf16.msra.mxu0 %v8360_v7 }
 0x268   : > { %7733 = vmatpush3.bf16.msra.mxu1 %v8365_v55  ;;  %7784 = vmatprep.subr.bf16.mxu0 %v8533_v25 }
 0x269   : > { %7734 = vmatprep.subr.bf16.mxu1 %v8533_v25 }
 0x26b   : > { %7785 = vmatpush3.bf16.msra.mxu0 %v8362_v1 }
 0x26c   : > { %7735 = vmatpush3.bf16.msra.mxu1 %v8367_v22  ;;  %7786 = vmatprep.subr.bf16.mxu0 %v8533_v25 }
 0x26d   : > { %7760 = vmatprep.subr.bf16.mxu1 %v8533_v25 }
 0x26f   : > { %7737 = vmatmul.mubr.bf16.vlgmr.msra.gmra.mrb[40].mxu1 %v9665_v54  ;;  %7787 = vmatpush3.bf16.msra.mxu0 %v8364_v8  ;;  %v8373_v54 = vld [vmem:[%s10733_s3 + $0x550] sm:$0xff]  }
 0x270   : > { %7761 = vmatpush3.bf16.msra.mxu1 %v8369_v21  ;;  %7776 = vmatprep.mubr.msk.bf16.mxu1 %vm8534_vm0, %v8533_v25 }
 0x271   : > { %7762 = vmatprep.subr.bf16.mxu1 %v8533_v25  ;;  %7788 = vmatprep.subr.bf16.mxu0 %v8533_v25 }
 0x273   : > { %7789 = vmatpush3.bf16.msra.mxu0 %v8366_v29 }
 0x274   : > { %7763 = vmatpush3.bf16.msra.mxu1 %v8371_v59  ;;  %7790 = vmatprep.subr.bf16.mxu0 %v8533_v25 }
 0x275   : > { %7764 = vmatprep.subr.bf16.mxu1 %v8533_v25  ;;  %v2445_v3 = vpop.f32.mrb[44].mxu0 }
 0x276   : > { %v7518_v56 = vpop.f32.mrb[45].mxu0 }
 0x277   : > { %7791 = vmatpush3.bf16.msra.mxu0 %v8368_v6  ;;  %v2448_v61 = vpop.f32.mrb[46].mxu0 }
 0x278   : > { %7765 = vmatpush3.bf16.msra.mxu1 %v8373_v54  ;;  %v7519_v41 = vpop.f32.mrb[47].mxu0  ;;  %7792 = vmatprep.subr.bf16.mxu0 %v8533_v25 }
 0x279   : > { %7766 = vmatprep.subr.bf16.mxu1 %v8533_v25 }
 0x27b   : > { %7793 = vmatpush3.bf16.msra.mxu0 %v8370_v2 }
 0x27c   : > { %7767 = vmatpush3.bf16.msra.mxu1 %v8375_v36  ;;  %7794 = vmatprep.subr.bf16.mxu0 %v8533_v25 }
 0x27d   : > { %7768 = vmatprep.subr.bf16.mxu1 %v8533_v25 }
 0x27f   : > { %7795 = vmatpush3.bf16.msra.mxu0 %v8372_v44 }
 0x280   : > { %7769 = vmatpush3.bf16.msra.mxu1 %v8377_v38  ;;  %7820 = vmatprep.subr.bf16.mxu0 %v8533_v25 }
 0x281   : > { %7770 = vmatprep.subr.bf16.mxu1 %v8533_v25 }
 0x282   : > { %v2299_v48 = vpop.f32.mrb[16].mxu1  ;;  %7797 = vmatmul.mubr.bf16.vlgmr.msra.gmra.mrb[72].mxu0 %v9727_v63  ;;  %v8378_v63 = vld [vmem:[%s10733_s3 + $0x610] sm:$0xff]  }
 0x283   : > { %v2306_v58 = vadd.f32 %v2299_v48, %v2166_v27  ;;  %v7498_v12 = vpop.f32.mrb[17].mxu1  ;;  %7821 = vmatpush3.bf16.msra.mxu0 %v8374_v26  ;;  %7836 = vmatprep.mubr.msk.bf16.mxu0 %vm8534_vm0, %v8533_v25 }
 0x284   : > { %v2302_v16 = vpop.f32.mrb[18].mxu1  ;;  %7771 = vmatpush3.bf16.msra.mxu1 %v8379_v43  ;;  %7822 = vmatprep.subr.bf16.mxu0 %v8533_v25 }
 0x285   : > { %v2307_v57 = vadd.f32 %v2302_v16, %v2167_v24  ;;  %v7499_v52 = vpop.f32.mrb[19].mxu1  ;;  %7772 = vmatprep.subr.bf16.mxu1 %v8533_v25  ;;  %v2452_v18 = vadd.f32 %v2445_v3, %v2306_v58  ;;  %v8395_v16 = vld [vmem:[%s10735_s5] sm:$0xff]  }
 0x286   : > { %v8398_v52 = vld [vmem:[%s10735_s5 + $0x48] sm:$0xff]  }
 0x287   : > { %v2453_v34 = vadd.f32 %v2448_v61, %v2307_v57  ;;  %7823 = vmatpush3.bf16.msra.mxu0 %v8376_v60  ;;  %v8397_v57 = vld [vmem:[%s10735_s5 + $0x8] sm:$0xff]   ;;  %v8399_v60 = vld [vmem:[%s10735_s5 + $0x10] sm:$0xff]  }
 0x288   : > { %7773 = vmatpush3.bf16.msra.mxu1 %v8381_v49  ;;  %7824 = vmatprep.subr.bf16.mxu0 %v8533_v25  ;;  %v8396_v49 = vld [vmem:[%s10735_s5 + $0x40] sm:$0xff]  }
 0x289   : > { %7774 = vmatprep.subr.bf16.mxu1 %v8533_v25 }
 0x28b   : > { %7825 = vmatpush3.bf16.msra.mxu0 %v8378_v63 }
 0x28c   : > { %7775 = vmatpush3.bf16.msra.mxu1 %v8383_v33  ;;  %7826 = vmatprep.subr.bf16.mxu0 %v8533_v25 }
 0x28d   : > { %7800 = vmatprep.subr.bf16.mxu1 %v8533_v25 }
 0x28f   : > { %7777 = vmatmul.mubr.bf16.vlgmr.msra.gmra.mrb[44].mxu1 %v9705_v53  ;;  %7827 = vmatpush3.bf16.msra.mxu0 %v8380_v46  ;;  %v8389_v53 = vld [vmem:[%s10733_s3 + $0x5d0] sm:$0xff]  }
 0x290   : > { %7801 = vmatpush3.bf16.msra.mxu1 %v8385_v5  ;;  %7816 = vmatprep.mubr.msk.bf16.mxu1 %vm8534_vm0, %v8533_v25 }
 0x291   : > { %7802 = vmatprep.subr.bf16.mxu1 %v8533_v25  ;;  %7828 = vmatprep.subr.bf16.mxu0 %v8533_v25 }
 0x293   : > { %7829 = vmatpush3.bf16.msra.mxu0 %v8382_v14 }
 0x294   : > { %7803 = vmatpush3.bf16.msra.mxu1 %v8387_v10  ;;  %7830 = vmatprep.subr.bf16.mxu0 %v8533_v25 }
 0x295   : > { %7804 = vmatprep.subr.bf16.mxu1 %v8533_v25  ;;  %v2739_v32 = vpop.f32.mrb[48].mxu0 }
 0x296   : > { %v7558_v39 = vpop.f32.mrb[49].mxu0 }
 0x297   : > { %7831 = vmatpush3.bf16.msra.mxu0 %v8384_v40  ;;  %v2742_v28 = vpop.f32.mrb[50].mxu0  ;;  %v8402_v40 = vld [vmem:[%s10735_s5 + $0x58] sm:$0xff]   ;;  %v8404_v39 = vld [vmem:[%s10735_s5 + $0x60] sm:$0xff]  }
 0x298   : > { %7805 = vmatpush3.bf16.msra.mxu1 %v8389_v53  ;;  %7832 = vmatprep.subr.bf16.mxu0 %v8533_v25  ;;  %v7559_v31 = vpop.f32.mrb[51].mxu0  ;;  %v8401_v53 = vld [vmem:[%s10735_s5 + $0x18] sm:$0xff]  }
 0x299   : > { %7806 = vmatprep.subr.bf16.mxu1 %v8533_v25  ;;  %v8407_v31 = vld [vmem:[%s10735_s5 + $0x30] sm:$0xff]  }
 0x29b   : > { %7833 = vmatpush3.bf16.msra.mxu0 %v8386_v13  ;;  %v8405_v13 = vld [vmem:[%s10735_s5 + $0x28] sm:$0xff]  }
 0x29c   : > { %7807 = vmatpush3.bf16.msra.mxu1 %v8390_v23  ;;  %7834 = vmatprep.subr.bf16.mxu0 %v8533_v25 }
 0x29d   : > { %7808 = vmatprep.subr.bf16.mxu1 %v8533_v25 }
 0x29f   : > { %7835 = vmatpush3.bf16.msra.mxu0 %v8388_v37  ;;  %v8409_v37 = vld [vmem:[%s10735_s5 + $0x38] sm:$0xff]  }
 0x2a0   : > { %7809 = vmatpush3.bf16.msra.mxu1 %v8391_v4  ;;  %7860 = vmatprep.subr.bf16.mxu0 %v8533_v25  ;;  %v8408_v4 = vld [vmem:[%s10735_s5 + $0x70] sm:$0xff]  }
 0x2a1   : > { %7810 = vmatprep.subr.bf16.mxu1 %v8533_v25 }
 0x2a2   : > { %v2592_v20 = vpop.f32.mrb[20].mxu1  ;;  %7837 = vmatmul.mubr.bf16.vlgmr.msra.gmra.mrb[76].mxu0 %v4643_v62 }
 0x2a3   : > { %v2599_v19 = vadd.f32 %v2592_v20, %v2452_v18  ;;  %v7538_v42 = vpop.f32.mrb[21].mxu1  ;;  %7876 = vmatprep.mubr.msk.bf16.mxu0 %vm8534_vm0, %v8533_v25  ;;  %7861 = vmatpush3.bf16.msra.mxu0 %v8395_v16 }
 0x2a4   : > { %v2595_v51 = vpop.f32.mrb[22].mxu1  ;;  %7811 = vmatpush3.bf16.msra.mxu1 %v8392_v45  ;;  %7862 = vmatprep.subr.bf16.mxu0 %v8533_v25  ;;  %v8410_v45 = vld [vmem:[%s10735_s5 + $0x78] sm:$0xff]  }
 0x2a5   : > { %v2600_v15 = vadd.f32 %v2595_v51, %v2453_v34  ;;  %v7539_v11 = vpop.f32.mrb[23].mxu1  ;;  %7812 = vmatprep.subr.bf16.mxu1 %v8533_v25  ;;  %v2746_v30 = vadd.f32 %v2739_v32, %v2599_v19  ;;  %v8400_v34 = vld [vmem:[%s10735_s5 + $0x50] sm:$0xff]   ;;  %v8403_v32 = vld [vmem:[%s10735_s5 + $0x20] sm:$0xff]  }
 0x2a7   : > { %v2747_v0 = vadd.f32 %v2742_v28, %v2600_v15  ;;  %7863 = vmatpush3.bf16.msra.mxu0 %v8397_v57  ;;  %v8406_v28 = vld [vmem:[%s10735_s5 + $0x68] sm:$0xff]  }
 0x2a8   : > { %7813 = vmatpush3.bf16.msra.mxu1 %v8393_v9  ;;  %7864 = vmatprep.subr.bf16.mxu0 %v8533_v25 }
 0x2a9   : > { %7814 = vmatprep.subr.bf16.mxu1 %v8533_v25 }
 0x2ab   : > { %7865 = vmatpush3.bf16.msra.mxu0 %v8399_v60 }
 0x2ac   : > { %7815 = vmatpush3.bf16.msra.mxu1 %v8394_v35  ;;  %7866 = vmatprep.subr.bf16.mxu0 %v8533_v25 }
 0x2ad   : > { %7840 = vmatprep.subr.bf16.mxu1 %v8533_v25 }
 0x2af   : > { %7817 = vmatmul.mubr.bf16.vlgmr.msra.gmra.mrb[48].mxu1 %v9746_v17  ;;  %7867 = vmatpush3.bf16.msra.mxu0 %v8401_v53 }
 0x2b0   : > { %7856 = vmatprep.mubr.msk.bf16.mxu1 %vm8534_vm0, %v8533_v25  ;;  %7841 = vmatpush3.bf16.msra.mxu1 %v8396_v49 }
 0x2b1   : > { %7842 = vmatprep.subr.bf16.mxu1 %v8533_v25  ;;  %7868 = vmatprep.subr.bf16.mxu0 %v8533_v25 }
 0x2b3   : > { %7869 = vmatpush3.bf16.msra.mxu0 %v8403_v32  ;;  %v8412_v32 = vld [vmem:[%s10735_s5 + $0x80] sm:$0xff]  }
 0x2b4   : > { %7843 = vmatpush3.bf16.msra.mxu1 %v8398_v52  ;;  %7870 = vmatprep.subr.bf16.mxu0 %v8533_v25 }
 0x2b5   : > { %v3025_v55 = vpop.f32.mrb[52].mxu0  ;;  %7844 = vmatprep.subr.bf16.mxu1 %v8533_v25 }
 0x2b6   : > { %v7598_v47 = vpop.f32.mrb[53].mxu0 }
 0x2b7   : > { %v3028_v50 = vpop.f32.mrb[54].mxu0  ;;  %7871 = vmatpush3.bf16.msra.mxu0 %v8405_v13  ;;  %v8413_v13 = vld [vmem:[%s10735_s5 + $0xc8] sm:$0xff]  }
 0x2b8   : > { %v7599_v27 = vpop.f32.mrb[55].mxu0  ;;  %7845 = vmatpush3.bf16.msra.mxu1 %v8400_v34  ;;  %7872 = vmatprep.subr.bf16.mxu0 %v8533_v25 }
 0x2b9   : > { %7846 = vmatprep.subr.bf16.mxu1 %v8533_v25 }
 0x2bb   : > { %7873 = vmatpush3.bf16.msra.mxu0 %v8407_v31  ;;  %v8415_v31 = vld [vmem:[%s10735_s5 + $0xd0] sm:$0xff]  }
 0x2bc   : > { %7847 = vmatpush3.bf16.msra.mxu1 %v8402_v40  ;;  %7874 = vmatprep.subr.bf16.mxu0 %v8533_v25  ;;  %v8411_v40 = vld [vmem:[%s10735_s5 + $0xc0] sm:$0xff]  }
 0x2bd   : > { %7848 = vmatprep.subr.bf16.mxu1 %v8533_v25 }
 0x2bf   : > { %7875 = vmatpush3.bf16.msra.mxu0 %v8409_v37  ;;  %v8417_v37 = vld [vmem:[%s10735_s5 + $0xd8] sm:$0xff]  }
 0x2c0   : > { %7849 = vmatpush3.bf16.msra.mxu1 %v8404_v39  ;;  %7900 = vmatprep.subr.bf16.mxu0 %v8533_v25 }
 0x2c1   : > { %7850 = vmatprep.subr.bf16.mxu1 %v8533_v25 }
 0x2c2   : > { %v2878_v7 = vpop.f32.mrb[24].mxu1 }
 0x2c3   : > { %v2885_v24 = vadd.f32 %v2878_v7, %v2746_v30  ;;  %v7578_v22 = vpop.f32.mrb[25].mxu1 }
 0x2c4   : > { %v2881_v1 = vpop.f32.mrb[26].mxu1  ;;  %7851 = vmatpush3.bf16.msra.mxu1 %v8406_v28  ;;  %v8414_v28 = vld [vmem:[%s10735_s5 + $0x88] sm:$0xff]  }
 0x2c5   : > { %v2886_v21 = vadd.f32 %v2881_v1, %v2747_v0  ;;  %v7579_v8 = vpop.f32.mrb[27].mxu1  ;;  %v3032_v59 = vadd.f32 %v3025_v55, %v2885_v24  ;;  %7852 = vmatprep.subr.bf16.mxu1 %v8533_v25 }
 0x2c7   : > { %v3033_v29 = vadd.f32 %v3028_v50, %v2886_v21 }
 0x2c8   : > { %7853 = vmatpush3.bf16.msra.mxu1 %v8408_v4  ;;  %v8416_v4 = vld [vmem:[%s10735_s5 + $0x90] sm:$0xff]  }
 0x2c9   : > { %7854 = vmatprep.subr.bf16.mxu1 %v8533_v25 }
 0x2cc   : > { %7855 = vmatpush3.bf16.msra.mxu1 %v8410_v45  ;;  %v8418_v45 = vld [vmem:[%s10735_s5 + $0x98] sm:$0xff]  }
 0x2cd   : > { %7880 = vmatprep.subr.bf16.mxu1 %v8533_v25 }
 0x2d5   : > { %v3316_v54 = vpop.f32.mrb[56].mxu0 }
 0x2d6   : > { %v7638_v6 = vpop.f32.mrb[57].mxu0 }
 0x2d7   : > { %v3319_v36 = vpop.f32.mrb[58].mxu0 }
 0x2d8   : > { %v7639_v3 = vpop.f32.mrb[59].mxu0 }
 0x2e2   : > { %v3172_v17 = vpop.f32.mrb[28].mxu1 }
 0x2e3   : > { %v3179_v56 = vadd.f32 %v3172_v17, %v3032_v59  ;;  %v7618_v61 = vpop.f32.mrb[29].mxu1 }
 0x2e4   : > { %v3175_v2 = vpop.f32.mrb[30].mxu1 }
 0x2e5   : > { %v3180_v41 = vadd.f32 %v3175_v2, %v3033_v29  ;;  %v7619_v38 = vpop.f32.mrb[31].mxu1  ;;  %v3323_v44 = vadd.f32 %v3316_v54, %v3179_v56 }
 0x2e7   : > { %v3324_v43 = vadd.f32 %v3319_v36, %v3180_v41 }
 0x2f5   : > { %v3601_v48 = vpop.f32.mrb[60].mxu0 }
 0x2f6   : > { %v7678_v26 = vpop.f32.mrb[61].mxu0 }
 0x2f7   : > { %v3604_v58 = vpop.f32.mrb[62].mxu0 }
 0x2f8   : > { %v7679_v12 = vpop.f32.mrb[63].mxu0 }
 0x302   : > { %v3455_v18 = vpop.f32.mrb[32].mxu1 }
 0x303   : > { %v3462_v33 = vadd.f32 %v3455_v18, %v3323_v44  ;;  %v7658_v63 = vpop.f32.mrb[33].mxu1  ;;  %v6767_v18 = vld [vmem:[%s10734_s4] ss:$0 sm:$0xff] }
 0x304   : > { %v3458_v5 = vpop.f32.mrb[34].mxu1 }
 0x305   : > { %v3463_v46 = vadd.f32 %v3458_v5, %v3324_v43  ;;  %v7659_v10 = vpop.f32.mrb[35].mxu1  ;;  %v3608_v14 = vadd.f32 %v3601_v48, %v3462_v33 }
 0x307   : > { %v3609_v23 = vadd.f32 %v3604_v58, %v3463_v46 }
 0x315   : > { %v3887_v20 = vpop.f32.mrb[64].mxu0 }
 0x316   : > { %v7718_v19 = vpop.f32.mrb[65].mxu0 }
 0x317   : > { %v3890_v42 = vpop.f32.mrb[66].mxu0  ;;  %v8420_v19 = vld [vmem:[%s10735_s5 + $0xa0] sm:$0xff]  }
 0x318   : > { %v7719_v51 = vpop.f32.mrb[67].mxu0 }
 0x319   : > { %v8422_v51 = vld [vmem:[%s10735_s5 + $0xa8] sm:$0xff]  }
 0x322   : > { %v3747_v9 = vpop.f32.mrb[36].mxu1 }
 0x323   : > { %v3754_v62 = vadd.f32 %v3747_v9, %v3608_v14  ;;  %v7698_v15 = vpop.f32.mrb[37].mxu1  ;;  %v8423_v9 = vld [vmem:[%s10735_s5 + $0xf0] sm:$0xff]  }
 0x324   : > { %v3750_v11 = vpop.f32.mrb[38].mxu1  ;;  %v8425_v15 = vld [vmem:[%s10735_s5 + $0xf8] sm:$0xff]  }
 0x325   : > { %v3755_v30 = vadd.f32 %v3750_v11, %v3609_v23  ;;  %v7699_v0 = vpop.f32.mrb[39].mxu1  ;;  %v3894_v35 = vadd.f32 %v3887_v20, %v3754_v62  ;;  %v8419_v20 = vld [vmem:[%s10735_s5 + $0xe0] sm:$0xff]   ;;  %v8424_v62 = vld [vmem:[%s10735_s5 + $0xb0] sm:$0xff]   ;;  %v8426_v11 = vld [vmem:[%s10735_s5 + $0xb8] sm:$0xff]  }
 0x327   : > { %v3895_v55 = vadd.f32 %v3890_v42, %v3755_v30  ;;  %v8421_v42 = vld [vmem:[%s10735_s5 + $0xe8] sm:$0xff]   ;;  %v8427_v30 = vld [vmem:[%s10735_s5 + $0x140] sm:$0xff]  }
 0x335   : > { %v4175_v47 = vpop.f32.mrb[68].mxu0 }
 0x336   : > { %v7758_v50 = vpop.f32.mrb[69].mxu0 }
 0x337   : > { %v4178_v27 = vpop.f32.mrb[70].mxu0  ;;  %v8430_v50 = vld [vmem:[%s10735_s5 + $0x108] sm:$0xff]  }
 0x338   : > { %v7759_v7 = vpop.f32.mrb[71].mxu0 }
 0x339   : > { %v8432_v7 = vld [vmem:[%s10735_s5 + $0x110] sm:$0xff]  }
 0x342   : > { %v4029_v24 = vpop.f32.mrb[40].mxu1 }
 0x343   : > { %v4036_v22 = vadd.f32 %v4029_v24, %v3894_v35  ;;  %v7738_v1 = vpop.f32.mrb[41].mxu1  ;;  %v8428_v35 = vld [vmem:[%s10735_s5 + $0x100] sm:$0xff]   ;;  %v8433_v24 = vld [vmem:[%s10735_s5 + $0x158] sm:$0xff]  }
 0x344   : > { %v4032_v21 = vpop.f32.mrb[42].mxu1  ;;  %v8435_v1 = vld [vmem:[%s10735_s5 + $0x160] sm:$0xff]  }
 0x345   : > { %v4037_v8 = vadd.f32 %v4032_v21, %v3895_v55  ;;  %v7739_v59 = vpop.f32.mrb[43].mxu1  ;;  %v4182_v29 = vadd.f32 %v4175_v47, %v4036_v22  ;;  %v8429_v47 = vld [vmem:[%s10735_s5 + $0x148] sm:$0xff]   ;;  %v8434_v22 = vld [vmem:[%s10735_s5 + $0x118] sm:$0xff]   ;;  %v8436_v21 = vld [vmem:[%s10735_s5 + $0x120] sm:$0xff]  }
 0x346   : > { %v8438_v59 = vld [vmem:[%s10735_s5 + $0x128] sm:$0xff]  }
 0x347   : > { %v4183_v54 = vadd.f32 %v4178_v27, %v4037_v8  ;;  %v8431_v27 = vld [vmem:[%s10735_s5 + $0x150] sm:$0xff]   ;;  %v8437_v8 = vld [vmem:[%s10735_s5 + $0x168] sm:$0xff]  }
 0x355   : > { %v4460_v6 = vpop.f32.mrb[72].mxu0 }
 0x356   : > { %v7798_v36 = vpop.f32.mrb[73].mxu0 }
 0x357   : > { %v4463_v3 = vpop.f32.mrb[74].mxu0  ;;  %v8442_v36 = vld [vmem:[%s10735_s5 + $0x138] sm:$0xff]  }
 0x358   : > { %v7799_v17 = vpop.f32.mrb[75].mxu0 }
 0x362   : > { %v4320_v56 = vpop.f32.mrb[44].mxu1 }
 0x363   : > { %v4327_v61 = vadd.f32 %v4320_v56, %v4182_v29  ;;  %v7778_v2 = vpop.f32.mrb[45].mxu1  ;;  %v8439_v29 = vld [vmem:[%s10735_s5 + $0x170] sm:$0xff]   ;;  %v8444_v56 = vld [vmem:[%s10735_s5 + $0x180] sm:$0xff]  }
 0x364   : > { %v4323_v41 = vpop.f32.mrb[46].mxu1  ;;  %v8445_v2 = vld [vmem:[%s10735_s5 + $0x1c8] sm:$0xff]  }
 0x365   : > { %v4328_v38 = vadd.f32 %v4323_v41, %v4183_v54  ;;  %v7779_v44 = vpop.f32.mrb[47].mxu1  ;;  %v4467_v43 = vadd.f32 %v4460_v6, %v4327_v61  ;;  %v8440_v54 = vld [vmem:[%s10735_s5 + $0x130] sm:$0xff]   ;;  %v8441_v6 = vld [vmem:[%s10735_s5 + $0x178] sm:$0xff]   ;;  %v8446_v41 = vld [vmem:[%s10735_s5 + $0x188] sm:$0xff]  }
 0x366   : > { %v8448_v44 = vld [vmem:[%s10735_s5 + $0x190] sm:$0xff]  }
 0x367   : > { %v4468_v48 = vadd.f32 %v4463_v3, %v4328_v38  ;;  %v8443_v3 = vld [vmem:[%s10735_s5 + $0x1c0] sm:$0xff]   ;;  %v8447_v38 = vld [vmem:[%s10735_s5 + $0x1d0] sm:$0xff]  }
 0x375   : > { %v4742_v26 = vpop.f32.mrb[76].mxu0 }
 0x376   : > { %v7838_v58 = vpop.f32.mrb[77].mxu0 }
 0x377   : > { %v4745_v12 = vpop.f32.mrb[78].mxu0  ;;  %v8452_v58 = vld [vmem:[%s10735_s5 + $0x1a0] sm:$0xff]  }
 0x378   : > { %v7839_v16 = vpop.f32.mrb[79].mxu0 }
 0x379   : > { %v8454_v16 = vld [vmem:[%s10735_s5 + $0x1a8] sm:$0xff]  }
 0x382   : > { %v4602_v49 = vpop.f32.mrb[48].mxu1 }
 0x383   : > { %v4609_v57 = vadd.f32 %v4602_v49, %v4467_v43  ;;  %v7818_v52 = vpop.f32.mrb[49].mxu1  ;;  %v8449_v43 = vld [vmem:[%s10735_s5 + $0x1d8] sm:$0xff]   ;;  %v8455_v49 = vld [vmem:[%s10735_s5 + $0x1f0] sm:$0xff]  }
 0x384   : > { %v4605_v60 = vpop.f32.mrb[50].mxu1  ;;  %v8457_v52 = vld [vmem:[%s10735_s5 + $0x1f8] sm:$0xff]  }
 0x385   : > { %v4749_v34 = vadd.f32 %v4742_v26, %v4609_v57  ;;  %v4610_v33 = vadd.f32 %v4605_v60, %v4468_v48  ;;  %v7819_v63 = vpop.f32.mrb[51].mxu1  ;;  %v8450_v48 = vld [vmem:[%s10735_s5 + $0x198] sm:$0xff]   ;;  %v8451_v26 = vld [vmem:[%s10735_s5 + $0x1e0] sm:$0xff]   ;;  %v8456_v57 = vld [vmem:[%s10735_s5 + $0x1b0] sm:$0xff]  }
 0x386   : > { %v8459_v60 = vld [vmem:[%s10735_s5 + $0x240] sm:$0xff]  }
 0x387   : > { %v4758_v5 = vadd.f32 %v6767_v18, %v4749_v34  ;;  %v4750_v46 = vadd.f32 %v4745_v12, %v4610_v33  ;;  %v8453_v12 = vld [vmem:[%s10735_s5 + $0x1e8] sm:$0xff]   ;;  %v8460_v33 = vld [vmem:[%s10735_s5 + $0x200] sm:$0xff]  }
 0x389   : > { %v4759_v10 = vadd.f32 %v6767_v18, %v4750_v46  ;;  %v4760_v14 = vmax.f32 %v4758_v5, 0.0  ;;  %v8458_v18 = vld [vmem:[%s10735_s5 + $0x1b8] sm:$0xff]   ;;  %v8461_v5 = vld [vmem:[%s10735_s5 + $0x248] sm:$0xff]  }
 0x38a   : > { %v8462_v46 = vld [vmem:[%s10735_s5 + $0x208] sm:$0xff]  }
 0x38b   : > { %v4761_v53 = vmax.f32 %v4759_v10, 0.0  ;;  %v8463_v10 = vld [vmem:[%s10735_s5 + $0x250] sm:$0xff]  }
 0x38d   : > { %v10228_v23 = vpack.c.bf16 %v4761_v53, %v4760_v14  ;;  %v8464_v14 = vld [vmem:[%s10735_s5 + $0x210] sm:$0xff]   ;;  %v8465_v53 = vld [vmem:[%s10735_s5 + $0x258] sm:$0xff]  }
 0x38f   : > { %7877 = vmatmul.mubr.bf16.vlgmr.msra.gmra.mrb[80].mxu0 %v10228_v23  ;;  %v10235_v39 = vshrl.u32 %v10228_v23, 16  ;;  %v4992_v55 = vrot.slane %v10228_v23, 1  ;;  %v5206_v61 = vrot.slane %v10228_v23, 2  ;;  %v5420_v63 = vrot.slane %v10228_v23, 3 }
 0x390   : > { %7901 = vmatpush3.bf16.msra.mxu0 %v8411_v40  ;;  %7916 = vmatprep.mubr.msk.bf16.mxu0 %vm8534_vm0, %v8533_v25  ;;  %v8466_v40 = vld [vmem:[%s10735_s5 + $0x218] sm:$0xff]  }
 0x391   : > { %7857 = vmatmul.mubr.bf16.vlgmr.msra.gmra.mrb[52].mxu1 %v10235_v39  ;;  %7902 = vmatprep.subr.bf16.mxu0 %v8533_v25  ;;  %v5099_v0 = vrot.slane %v10235_v39, 1  ;;  %v5313_v17 = vrot.slane %v10235_v39, 2  ;;  %v5527_v34 = vrot.slane %v10235_v39, 3 }
 0x392   : > { %7881 = vmatpush3.bf16.msra.mxu1 %v8412_v32  ;;  %7896 = vmatprep.mubr.msk.bf16.mxu1 %vm8534_vm0, %v8533_v25  ;;  %v8467_v32 = vld [vmem:[%s10735_s5 + $0x260] sm:$0xff]  }
 0x393   : > { %7882 = vmatprep.subr.bf16.mxu1 %v8533_v25 }
 0x394   : > { %7903 = vmatpush3.bf16.msra.mxu0 %v8413_v13  ;;  %v8468_v13 = vld [vmem:[%s10735_s5 + $0x220] sm:$0xff]  }
 0x395   : > { %7904 = vmatprep.subr.bf16.mxu0 %v8533_v25 }
 0x396   : > { %7883 = vmatpush3.bf16.msra.mxu1 %v8414_v28  ;;  %v8469_v28 = vld [vmem:[%s10735_s5 + $0x268] sm:$0xff]  }
 0x397   : > { %7884 = vmatprep.subr.bf16.mxu1 %v8533_v25 }
 0x398   : > { %7905 = vmatpush3.bf16.msra.mxu0 %v8415_v31  ;;  %v8470_v31 = vld [vmem:[%s10735_s5 + $0x228] sm:$0xff]  }
 0x399   : > { %7906 = vmatprep.subr.bf16.mxu0 %v8533_v25 }
 0x39a   : > { %7885 = vmatpush3.bf16.msra.mxu1 %v8416_v4  ;;  %v8471_v4 = vld [vmem:[%s10735_s5 + $0x270] sm:$0xff]  }
 0x39b   : > { %7886 = vmatprep.subr.bf16.mxu1 %v8533_v25 }
 0x39c   : > { %7907 = vmatpush3.bf16.msra.mxu0 %v8417_v37  ;;  %v8472_v37 = vld [vmem:[%s10735_s5 + $0x230] sm:$0xff]  }
 0x39d   : > { %7908 = vmatprep.subr.bf16.mxu0 %v8533_v25 }
 0x39e   : > { %7887 = vmatpush3.bf16.msra.mxu1 %v8418_v45  ;;  %v8473_v45 = vld [vmem:[%s10735_s5 + $0x278] sm:$0xff]  }
 0x39f   : > { %7888 = vmatprep.subr.bf16.mxu1 %v8533_v25 }
 0x3a0   : > { %7909 = vmatpush3.bf16.msra.mxu0 %v8419_v20  ;;  %v8474_v20 = vld [vmem:[%s10735_s5 + $0x238] sm:$0xff]  }
 0x3a1   : > { %7910 = vmatprep.subr.bf16.mxu0 %v8533_v25 }
 0x3a2   : > { %7889 = vmatpush3.bf16.msra.mxu1 %v8420_v19  ;;  %v8475_v19 = vld [vmem:[%s10735_s5 + $0x2c0] sm:$0xff]  }
 0x3a3   : > { %7890 = vmatprep.subr.bf16.mxu1 %v8533_v25 }
 0x3a4   : > { %7911 = vmatpush3.bf16.msra.mxu0 %v8421_v42  ;;  %v5741_v42 = vrot.slane %v10235_v39, 4 }
 0x3a5   : > { %7912 = vmatprep.subr.bf16.mxu0 %v8533_v25 }
 0x3a6   : > { %7891 = vmatpush3.bf16.msra.mxu1 %v8422_v51  ;;  %v8476_v51 = vld [vmem:[%s10735_s5 + $0x280] sm:$0xff]  }
 0x3a7   : > { %7892 = vmatprep.subr.bf16.mxu1 %v8533_v25 }
 0x3a8   : > { %7913 = vmatpush3.bf16.msra.mxu0 %v8423_v9  ;;  %v5634_v9 = vrot.slane %v10228_v23, 4 }
 0x3a9   : > { %7914 = vmatprep.subr.bf16.mxu0 %v8533_v25 }
 0x3aa   : > { %7893 = vmatpush3.bf16.msra.mxu1 %v8424_v62  ;;  %v8477_v62 = vld [vmem:[%s10735_s5 + $0x2c8] sm:$0xff]  }
 0x3ab   : > { %7894 = vmatprep.subr.bf16.mxu1 %v8533_v25 }
 0x3ac   : > { %7915 = vmatpush3.bf16.msra.mxu0 %v8425_v15  ;;  %v8478_v15 = vld [vmem:[%s10735_s5 + $0x288] sm:$0xff]  }
 0x3ad   : > { %7940 = vmatprep.subr.bf16.mxu0 %v8533_v25 }
 0x3ae   : > { %7895 = vmatpush3.bf16.msra.mxu1 %v8426_v11  ;;  %v8479_v11 = vld [vmem:[%s10735_s5 + $0x2d0] sm:$0xff]  }
 0x3af   : > { %7917 = vmatmul.mubr.bf16.vlgmr.msra.gmra.mrb[84].mxu0 %v5099_v0  ;;  %7920 = vmatprep.subr.bf16.mxu1 %v8533_v25  ;;  %v8481_v0 = vld [vmem:[%s10735_s5 + $0x2d8] sm:$0xff]  }
 0x3b0   : > { %7941 = vmatpush3.bf16.msra.mxu0 %v8427_v30  ;;  %7956 = vmatprep.mubr.msk.bf16.mxu0 %vm8534_vm0, %v8533_v25  ;;  %v8480_v30 = vld [vmem:[%s10735_s5 + $0x290] sm:$0xff]  }
 0x3b1   : > { %7897 = vmatmul.mubr.bf16.vlgmr.msra.gmra.mrb[56].mxu1 %v4992_v55  ;;  %7942 = vmatprep.subr.bf16.mxu0 %v8533_v25  ;;  %v8483_v55 = vld [vmem:[%s10735_s5 + $0x2e0] sm:$0xff]  }
 0x3b2   : > { %7921 = vmatpush3.bf16.msra.mxu1 %v8428_v35  ;;  %7936 = vmatprep.mubr.msk.bf16.mxu1 %vm8534_vm0, %v8533_v25  ;;  %v8482_v35 = vld [vmem:[%s10735_s5 + $0x298] sm:$0xff]  }
 0x3b3   : > { %7922 = vmatprep.subr.bf16.mxu1 %v8533_v25 }
 0x3b4   : > { %7943 = vmatpush3.bf16.msra.mxu0 %v8429_v47  ;;  %v8484_v47 = vld [vmem:[%s10735_s5 + $0x2a0] sm:$0xff]  }
 0x3b5   : > { %7944 = vmatprep.subr.bf16.mxu0 %v8533_v25 }
 0x3b6   : > { %7923 = vmatpush3.bf16.msra.mxu1 %v8430_v50  ;;  %v8485_v50 = vld [vmem:[%s10735_s5 + $0x2e8] sm:$0xff]  }
 0x3b7   : > { %7924 = vmatprep.subr.bf16.mxu1 %v8533_v25 }
 0x3b8   : > { %7945 = vmatpush3.bf16.msra.mxu0 %v8431_v27  ;;  %v8486_v27 = vld [vmem:[%s10735_s5 + $0x2a8] sm:$0xff]  }
 0x3b9   : > { %7946 = vmatprep.subr.bf16.mxu0 %v8533_v25 }
 0x3ba   : > { %7925 = vmatpush3.bf16.msra.mxu1 %v8432_v7  ;;  %v8487_v7 = vld [vmem:[%s10735_s5 + $0x2f0] sm:$0xff]  }
 0x3bb   : > { %7926 = vmatprep.subr.bf16.mxu1 %v8533_v25 }
 0x3bc   : > { %7947 = vmatpush3.bf16.msra.mxu0 %v8433_v24  ;;  %v8488_v24 = vld [vmem:[%s10735_s5 + $0x2b0] sm:$0xff]  }
 0x3bd   : > { %7948 = vmatprep.subr.bf16.mxu0 %v8533_v25 }
 0x3be   : > { %7927 = vmatpush3.bf16.msra.mxu1 %v8434_v22  ;;  %v8489_v22 = vld [vmem:[%s10735_s5 + $0x2f8] sm:$0xff]  }
 0x3bf   : > { %7928 = vmatprep.subr.bf16.mxu1 %v8533_v25 }
 0x3c0   : > { %7949 = vmatpush3.bf16.msra.mxu0 %v8435_v1  ;;  %v8490_v1 = vld [vmem:[%s10735_s5 + $0x2b8] sm:$0xff]  }
 0x3c1   : > { %7950 = vmatprep.subr.bf16.mxu0 %v8533_v25 }
 0x3c2   : > { %7929 = vmatpush3.bf16.msra.mxu1 %v8436_v21  ;;  %v8491_v21 = vld [vmem:[%s10735_s5 + $0x340] sm:$0xff]  }
 0x3c3   : > { %7930 = vmatprep.subr.bf16.mxu1 %v8533_v25 }
 0x3c4   : > { %7951 = vmatpush3.bf16.msra.mxu0 %v8437_v8  ;;  %v5955_v8 = vrot.slane %v10235_v39, 5 }
 0x3c5   : > { %7952 = vmatprep.subr.bf16.mxu0 %v8533_v25 }
 0x3c6   : > { %7931 = vmatpush3.bf16.msra.mxu1 %v8438_v59  ;;  %v8492_v59 = vld [vmem:[%s10735_s5 + $0x300] sm:$0xff]  }
 0x3c7   : > { %7932 = vmatprep.subr.bf16.mxu1 %v8533_v25 }
 0x3c8   : > { %7953 = vmatpush3.bf16.msra.mxu0 %v8439_v29  ;;  %v5848_v29 = vrot.slane %v10228_v23, 5 }
 0x3c9   : > { %7954 = vmatprep.subr.bf16.mxu0 %v8533_v25 }
 0x3ca   : > { %7933 = vmatpush3.bf16.msra.mxu1 %v8440_v54  ;;  %v8493_v54 = vld [vmem:[%s10735_s5 + $0x348] sm:$0xff]  }
 0x3cb   : > { %7934 = vmatprep.subr.bf16.mxu1 %v8533_v25 }
 0x3cc   : > { %7955 = vmatpush3.bf16.msra.mxu0 %v8441_v6  ;;  %v8494_v6 = vld [vmem:[%s10735_s5 + $0x308] sm:$0xff]  }
 0x3cd   : > { %7980 = vmatprep.subr.bf16.mxu0 %v8533_v25 }
 0x3ce   : > { %7935 = vmatpush3.bf16.msra.mxu1 %v8442_v36  ;;  %v8495_v36 = vld [vmem:[%s10735_s5 + $0x350] sm:$0xff]  }
 0x3cf   : > { %7957 = vmatmul.mubr.bf16.vlgmr.msra.gmra.mrb[88].mxu0 %v5313_v17  ;;  %7960 = vmatprep.subr.bf16.mxu1 %v8533_v25  ;;  %v8497_v17 = vld [vmem:[%s10735_s5 + $0x358] sm:$0xff]  }
 0x3d0   : > { %7981 = vmatpush3.bf16.msra.mxu0 %v8443_v3  ;;  %7996 = vmatprep.mubr.msk.bf16.mxu0 %vm8534_vm0, %v8533_v25  ;;  %v8496_v3 = vld [vmem:[%s10735_s5 + $0x310] sm:$0xff]  }
 0x3d1   : > { %7937 = vmatmul.mubr.bf16.vlgmr.msra.gmra.mrb[60].mxu1 %v5206_v61  ;;  %7982 = vmatprep.subr.bf16.mxu0 %v8533_v25  ;;  %v8499_v61 = vld [vmem:[%s10735_s5 + $0x360] sm:$0xff]  }
 0x3d2   : > { %7961 = vmatpush3.bf16.msra.mxu1 %v8444_v56  ;;  %7976 = vmatprep.mubr.msk.bf16.mxu1 %vm8534_vm0, %v8533_v25  ;;  %v8498_v56 = vld [vmem:[%s10735_s5 + $0x318] sm:$0xff]  }
 0x3d3   : > { %7962 = vmatprep.subr.bf16.mxu1 %v8533_v25 }
 0x3d4   : > { %7983 = vmatpush3.bf16.msra.mxu0 %v8445_v2  ;;  %v8500_v2 = vld [vmem:[%s10735_s5 + $0x320] sm:$0xff]  }
 0x3d5   : > { %7984 = vmatprep.subr.bf16.mxu0 %v8533_v25 }
 0x3d6   : > { %7963 = vmatpush3.bf16.msra.mxu1 %v8446_v41  ;;  %v8501_v41 = vld [vmem:[%s10735_s5 + $0x368] sm:$0xff]  }
 0x3d7   : > { %7964 = vmatprep.subr.bf16.mxu1 %v8533_v25 }
 0x3d8   : > { %7985 = vmatpush3.bf16.msra.mxu0 %v8447_v38  ;;  %v8502_v38 = vld [vmem:[%s10735_s5 + $0x328] sm:$0xff]  }
 0x3d9   : > { %7986 = vmatprep.subr.bf16.mxu0 %v8533_v25 }
 0x3da   : > { %7965 = vmatpush3.bf16.msra.mxu1 %v8448_v44  ;;  %v8503_v44 = vld [vmem:[%s10735_s5 + $0x370] sm:$0xff]  }
 0x3db   : > { %7966 = vmatprep.subr.bf16.mxu1 %v8533_v25 }
 0x3dc   : > { %7987 = vmatpush3.bf16.msra.mxu0 %v8449_v43  ;;  %v8504_v43 = vld [vmem:[%s10735_s5 + $0x330] sm:$0xff]  }
 0x3dd   : > { %7988 = vmatprep.subr.bf16.mxu0 %v8533_v25 }
 0x3de   : > { %7967 = vmatpush3.bf16.msra.mxu1 %v8450_v48  ;;  %v8505_v48 = vld [vmem:[%s10735_s5 + $0x378] sm:$0xff]  }
 0x3df   : > { %7968 = vmatprep.subr.bf16.mxu1 %v8533_v25 }
 0x3e0   : > { %7989 = vmatpush3.bf16.msra.mxu0 %v8451_v26  ;;  %v8506_v26 = vld [vmem:[%s10735_s5 + $0x338] sm:$0xff]  }
 0x3e1   : > { %7990 = vmatprep.subr.bf16.mxu0 %v8533_v25 }
 0x3e2   : > { %7969 = vmatpush3.bf16.msra.mxu1 %v8452_v58  ;;  %v8507_v58 = vld [vmem:[%s10735_s5 + $0x3c0] sm:$0xff]  }
 0x3e3   : > { %7970 = vmatprep.subr.bf16.mxu1 %v8533_v25 }
 0x3e4   : > { %7991 = vmatpush3.bf16.msra.mxu0 %v8453_v12  ;;  %v6169_v12 = vrot.slane %v10235_v39, 6 }
 0x3e5   : > { %7992 = vmatprep.subr.bf16.mxu0 %v8533_v25 }
 0x3e6   : > { %7971 = vmatpush3.bf16.msra.mxu1 %v8454_v16  ;;  %v8508_v16 = vld [vmem:[%s10735_s5 + $0x380] sm:$0xff]  }
 0x3e7   : > { %7972 = vmatprep.subr.bf16.mxu1 %v8533_v25 }
 0x3e8   : > { %7993 = vmatpush3.bf16.msra.mxu0 %v8455_v49  ;;  %v6062_v49 = vrot.slane %v10228_v23, 6 }
 0x3e9   : > { %7994 = vmatprep.subr.bf16.mxu0 %v8533_v25 }
 0x3ea   : > { %7973 = vmatpush3.bf16.msra.mxu1 %v8456_v57  ;;  %v8509_v57 = vld [vmem:[%s10735_s5 + $0x3c8] sm:$0xff]  }
 0x3eb   : > { %7974 = vmatprep.subr.bf16.mxu1 %v8533_v25 }
 0x3ec   : > { %7995 = vmatpush3.bf16.msra.mxu0 %v8457_v52  ;;  %v8510_v52 = vld [vmem:[%s10735_s5 + $0x388] sm:$0xff]  }
 0x3ed   : > { %8020 = vmatprep.subr.bf16.mxu0 %v8533_v25 }
 0x3ee   : > { %7975 = vmatpush3.bf16.msra.mxu1 %v8458_v18  ;;  %v8511_v18 = vld [vmem:[%s10735_s5 + $0x3d0] sm:$0xff]  }
 0x3ef   : > { %7997 = vmatmul.mubr.bf16.vlgmr.msra.gmra.mrb[92].mxu0 %v5527_v34  ;;  %8000 = vmatprep.subr.bf16.mxu1 %v8533_v25  ;;  %v8513_v34 = vld [vmem:[%s10735_s5 + $0x3d8] sm:$0xff]  }
 0x3f0   : > { %8021 = vmatpush3.bf16.msra.mxu0 %v8459_v60  ;;  %8036 = vmatprep.mubr.msk.bf16.mxu0 %vm8534_vm0, %v8533_v25  ;;  %v8512_v60 = vld [vmem:[%s10735_s5 + $0x390] sm:$0xff]  }
 0x3f1   : > { %7977 = vmatmul.mubr.bf16.vlgmr.msra.gmra.mrb[64].mxu1 %v5420_v63  ;;  %8022 = vmatprep.subr.bf16.mxu0 %v8533_v25  ;;  %v8515_v63 = vld [vmem:[%s10735_s5 + $0x3e0] sm:$0xff]  }
 0x3f2   : > { %8001 = vmatpush3.bf16.msra.mxu1 %v8460_v33  ;;  %8016 = vmatprep.mubr.msk.bf16.mxu1 %vm8534_vm0, %v8533_v25  ;;  %v8514_v33 = vld [vmem:[%s10735_s5 + $0x398] sm:$0xff]  }
 0x3f3   : > { %8002 = vmatprep.subr.bf16.mxu1 %v8533_v25 }
 0x3f4   : > { %8023 = vmatpush3.bf16.msra.mxu0 %v8461_v5  ;;  %v8516_v5 = vld [vmem:[%s10735_s5 + $0x3a0] sm:$0xff]  }
 0x3f5   : > { %8024 = vmatprep.subr.bf16.mxu0 %v8533_v25 }
 0x3f6   : > { %8003 = vmatpush3.bf16.msra.mxu1 %v8462_v46  ;;  %v8517_v46 = vld [vmem:[%s10735_s5 + $0x3e8] sm:$0xff]  }
 0x3f7   : > { %8004 = vmatprep.subr.bf16.mxu1 %v8533_v25 }
 0x3f8   : > { %8025 = vmatpush3.bf16.msra.mxu0 %v8463_v10 }
 0x3f9   : > { %8026 = vmatprep.subr.bf16.mxu0 %v8533_v25 }
 0x3fa   : > { %8005 = vmatpush3.bf16.msra.mxu1 %v8464_v14  ;;  %v8518_v14 = vld [vmem:[%s10735_s5 + $0x3a8] sm:$0xff]  }
 0x3fb   : > { %8006 = vmatprep.subr.bf16.mxu1 %v8533_v25 }
 0x3fc   : > { %8027 = vmatpush3.bf16.msra.mxu0 %v8465_v53 }
 0x3fd   : > { %8028 = vmatprep.subr.bf16.mxu0 %v8533_v25 }
 0x3fe   : > { %8007 = vmatpush3.bf16.msra.mxu1 %v8466_v40 }
 0x3ff   : > { %8008 = vmatprep.subr.bf16.mxu1 %v8533_v25 }
 0x400   : > { %8029 = vmatpush3.bf16.msra.mxu0 %v8467_v32 }
 0x401   : > { %8030 = vmatprep.subr.bf16.mxu0 %v8533_v25 }
 0x402   : > { %8009 = vmatpush3.bf16.msra.mxu1 %v8468_v13  ;;  %v8519_v13 = vld [vmem:[%s10735_s5 + $0x3f0] sm:$0xff]  }
 0x403   : > { %8010 = vmatprep.subr.bf16.mxu1 %v8533_v25 }
 0x404   : > { %8031 = vmatpush3.bf16.msra.mxu0 %v8469_v28 }
 0x405   : > { %8032 = vmatprep.subr.bf16.mxu0 %v8533_v25 }
 0x406   : > { %8011 = vmatpush3.bf16.msra.mxu1 %v8470_v31 }
 0x407   : > { %8012 = vmatprep.subr.bf16.mxu1 %v8533_v25 }
 0x408   : > { %8033 = vmatpush3.bf16.msra.mxu0 %v8471_v4 }
 0x409   : > { %8034 = vmatprep.subr.bf16.mxu0 %v8533_v25 }
 0x40a   : > { %8013 = vmatpush3.bf16.msra.mxu1 %v8472_v37 }
 0x40b   : > { %8014 = vmatprep.subr.bf16.mxu1 %v8533_v25 }
 0x40c   : > { %8035 = vmatpush3.bf16.msra.mxu0 %v8473_v45  ;;  %v8520_v45 = vld [vmem:[%s10735_s5 + $0x3b0] sm:$0xff]  }
 0x40d   : > { %8060 = vmatprep.subr.bf16.mxu0 %v8533_v25 }
 0x40e   : > { %8015 = vmatpush3.bf16.msra.mxu1 %v8474_v20 }
 0x40f   : > { %8037 = vmatmul.mubr.bf16.vlgmr.msra.gmra.mrb[96].mxu0 %v5741_v42  ;;  %8040 = vmatprep.subr.bf16.mxu1 %v8533_v25  ;;  %v8522_v42 = vld [vmem:[%s10735_s5 + $0x3b8] sm:$0xff]  }
 0x410   : > { %8061 = vmatpush3.bf16.msra.mxu0 %v8475_v19  ;;  %8076 = vmatprep.mubr.msk.bf16.mxu0 %vm8534_vm0, %v8533_v25  ;;  %v8521_v19 = vld [vmem:[%s10735_s5 + $0x3f8] sm:$0xff]  }
 0x411   : > { %8017 = vmatmul.mubr.bf16.vlgmr.msra.gmra.mrb[68].mxu1 %v5634_v9  ;;  %8062 = vmatprep.subr.bf16.mxu0 %v8533_v25  ;;  %v6276_v9 = vrot.slane %v10228_v23, 7 }
 0x412   : > { %8041 = vmatpush3.bf16.msra.mxu1 %v8476_v51  ;;  %8056 = vmatprep.mubr.msk.bf16.mxu1 %vm8534_vm0, %v8533_v25  ;;  %v6383_v51 = vrot.slane %v10235_v39, 7 }
 0x413   : > { %8042 = vmatprep.subr.bf16.mxu1 %v8533_v25 }
 0x414   : > { %8063 = vmatpush3.bf16.msra.mxu0 %v8477_v62 }
 0x415   : > { %8064 = vmatprep.subr.bf16.mxu0 %v8533_v25 }
 0x416   : > { %8043 = vmatpush3.bf16.msra.mxu1 %v8478_v15 }
 0x417   : > { %8044 = vmatprep.subr.bf16.mxu1 %v8533_v25 }
 0x418   : > { %8065 = vmatpush3.bf16.msra.mxu0 %v8479_v11 }
 0x419   : > { %8066 = vmatprep.subr.bf16.mxu0 %v8533_v25 }
 0x41a   : > { %8045 = vmatpush3.bf16.msra.mxu1 %v8480_v30 }
 0x41b   : > { %8046 = vmatprep.subr.bf16.mxu1 %v8533_v25 }
 0x41c   : > { %8067 = vmatpush3.bf16.msra.mxu0 %v8481_v0 }
 0x41d   : > { %8068 = vmatprep.subr.bf16.mxu0 %v8533_v25 }
 0x41e   : > { %8047 = vmatpush3.bf16.msra.mxu1 %v8482_v35 }
 0x41f   : > { %8048 = vmatprep.subr.bf16.mxu1 %v8533_v25 }
 0x420   : > { %8069 = vmatpush3.bf16.msra.mxu0 %v8483_v55 }
 0x421   : > { %8070 = vmatprep.subr.bf16.mxu0 %v8533_v25 }
 0x422   : > { %8049 = vmatpush3.bf16.msra.mxu1 %v8484_v47 }
 0x423   : > { %8050 = vmatprep.subr.bf16.mxu1 %v8533_v25 }
 0x424   : > { %8071 = vmatpush3.bf16.msra.mxu0 %v8485_v50 }
 0x425   : > { %8072 = vmatprep.subr.bf16.mxu0 %v8533_v25 }
 0x426   : > { %8051 = vmatpush3.bf16.msra.mxu1 %v8486_v27 }
 0x427   : > { %8052 = vmatprep.subr.bf16.mxu1 %v8533_v25 }
 0x428   : > { %8073 = vmatpush3.bf16.msra.mxu0 %v8487_v7 }
 0x429   : > { %8074 = vmatprep.subr.bf16.mxu0 %v8533_v25 }
 0x42a   : > { %8053 = vmatpush3.bf16.msra.mxu1 %v8488_v24 }
 0x42b   : > { %8054 = vmatprep.subr.bf16.mxu1 %v8533_v25 }
 0x42c   : > { %8075 = vmatpush3.bf16.msra.mxu0 %v8489_v22 }
 0x42d   : > { %8100 = vmatprep.subr.bf16.mxu0 %v8533_v25 }
 0x42e   : > { %8055 = vmatpush3.bf16.msra.mxu1 %v8490_v1 }
 0x42f   : > { %8077 = vmatmul.mubr.bf16.vlgmr.msra.gmra.mrb[100].mxu0 %v5955_v8  ;;  %8080 = vmatprep.subr.bf16.mxu1 %v8533_v25 }
 0x430   : > { %8101 = vmatpush3.bf16.msra.mxu0 %v8491_v21  ;;  %8116 = vmatprep.mubr.msk.bf16.mxu0 %vm8534_vm0, %v8533_v25 }
 0x431   : > { %8057 = vmatmul.mubr.bf16.vlgmr.msra.gmra.mrb[72].mxu1 %v5848_v29  ;;  %8102 = vmatprep.subr.bf16.mxu0 %v8533_v25 }
 0x432   : > { %8081 = vmatpush3.bf16.msra.mxu1 %v8492_v59  ;;  %8096 = vmatprep.mubr.msk.bf16.mxu1 %vm8534_vm0, %v8533_v25 }
 0x433   : > { %8082 = vmatprep.subr.bf16.mxu1 %v8533_v25 }
 0x434   : > { %8103 = vmatpush3.bf16.msra.mxu0 %v8493_v54 }
 0x435   : > { %8104 = vmatprep.subr.bf16.mxu0 %v8533_v25 }
 0x436   : > { %8083 = vmatpush3.bf16.msra.mxu1 %v8494_v6 }
 0x437   : > { %8084 = vmatprep.subr.bf16.mxu1 %v8533_v25 }
 0x438   : > { %8105 = vmatpush3.bf16.msra.mxu0 %v8495_v36 }
 0x439   : > { %8106 = vmatprep.subr.bf16.mxu0 %v8533_v25 }
 0x43a   : > { %8085 = vmatpush3.bf16.msra.mxu1 %v8496_v3 }
 0x43b   : > { %8086 = vmatprep.subr.bf16.mxu1 %v8533_v25 }
 0x43c   : > { %8107 = vmatpush3.bf16.msra.mxu0 %v8497_v17 }
 0x43d   : > { %8108 = vmatprep.subr.bf16.mxu0 %v8533_v25 }
 0x43e   : > { %8087 = vmatpush3.bf16.msra.mxu1 %v8498_v56 }
 0x43f   : > { %8088 = vmatprep.subr.bf16.mxu1 %v8533_v25 }
 0x440   : > { %8109 = vmatpush3.bf16.msra.mxu0 %v8499_v61 }
 0x441   : > { %8110 = vmatprep.subr.bf16.mxu0 %v8533_v25 }
 0x442   : > { %8089 = vmatpush3.bf16.msra.mxu1 %v8500_v2 }
 0x443   : > { %8090 = vmatprep.subr.bf16.mxu1 %v8533_v25 }
 0x444   : > { %8111 = vmatpush3.bf16.msra.mxu0 %v8501_v41 }
 0x445   : > { %8112 = vmatprep.subr.bf16.mxu0 %v8533_v25 }
 0x446   : > { %8091 = vmatpush3.bf16.msra.mxu1 %v8502_v38 }
 0x447   : > { %8092 = vmatprep.subr.bf16.mxu1 %v8533_v25 }
 0x448   : > { %8113 = vmatpush3.bf16.msra.mxu0 %v8503_v44 }
 0x449   : > { %8114 = vmatprep.subr.bf16.mxu0 %v8533_v25 }
 0x44a   : > { %8093 = vmatpush3.bf16.msra.mxu1 %v8504_v43 }
 0x44b   : > { %8094 = vmatprep.subr.bf16.mxu1 %v8533_v25 }
 0x44c   : > { %8115 = vmatpush3.bf16.msra.mxu0 %v8505_v48 }
 0x44d   : > { %8140 = vmatprep.subr.bf16.mxu0 %v8533_v25 }
 0x44e   : > { %8095 = vmatpush3.bf16.msra.mxu1 %v8506_v26 }
 0x44f   : > { %8117 = vmatmul.mubr.bf16.vlgmr.msra.gmra.mrb[104].mxu0 %v6169_v12  ;;  %8120 = vmatprep.subr.bf16.mxu1 %v8533_v25 }
 0x450   : > { %8141 = vmatpush3.bf16.msra.mxu0 %v8507_v58  ;;  %8156 = vmatprep.mubr.msk.bf16.mxu0 %vm8534_vm0, %v8533_v25 }
 0x451   : > { %8097 = vmatmul.mubr.bf16.vlgmr.msra.gmra.mrb[76].mxu1 %v6062_v49  ;;  %8142 = vmatprep.subr.bf16.mxu0 %v8533_v25 }
 0x452   : > { %8121 = vmatpush3.bf16.msra.mxu1 %v8508_v16  ;;  %8136 = vmatprep.mubr.msk.bf16.mxu1 %vm8534_vm0, %v8533_v25 }
 0x453   : > { %8122 = vmatprep.subr.bf16.mxu1 %v8533_v25 }
 0x454   : > { %8143 = vmatpush3.bf16.msra.mxu0 %v8509_v57 }
 0x455   : > { %8144 = vmatprep.subr.bf16.mxu0 %v8533_v25 }
 0x456   : > { %8123 = vmatpush3.bf16.msra.mxu1 %v8510_v52 }
 0x457   : > { %8124 = vmatprep.subr.bf16.mxu1 %v8533_v25 }
 0x458   : > { %8145 = vmatpush3.bf16.msra.mxu0 %v8511_v18 }
 0x459   : > { %8146 = vmatprep.subr.bf16.mxu0 %v8533_v25 }
 0x45a   : > { %8125 = vmatpush3.bf16.msra.mxu1 %v8512_v60 }
 0x45b   : > { %8126 = vmatprep.subr.bf16.mxu1 %v8533_v25 }
 0x45c   : > { %8147 = vmatpush3.bf16.msra.mxu0 %v8513_v34 }
 0x45d   : > { %8148 = vmatprep.subr.bf16.mxu0 %v8533_v25 }
 0x45e   : > { %8127 = vmatpush3.bf16.msra.mxu1 %v8514_v33 }
 0x45f   : > { %8128 = vmatprep.subr.bf16.mxu1 %v8533_v25 }
 0x460   : > { %8149 = vmatpush3.bf16.msra.mxu0 %v8515_v63 }
 0x461   : > { %8150 = vmatprep.subr.bf16.mxu0 %v8533_v25 }
 0x462   : > { %8129 = vmatpush3.bf16.msra.mxu1 %v8516_v5  ;;  %v4969_v10 = vpop.f32.mrb[80].mxu0 }
 0x463   : > { %v7878_v53 = vpop.f32.mrb[81].mxu0  ;;  %8130 = vmatprep.subr.bf16.mxu1 %v8533_v25 }
 0x464   : > { %8151 = vmatpush3.bf16.msra.mxu0 %v8517_v46  ;;  %v4881_v40 = vpop.f32.mrb[52].mxu1  ;;  %v4972_v32 = vpop.f32.mrb[82].mxu0 }
 0x465   : > { %v4970_v28 = vadd.f32 %v4969_v10, %v4881_v40  ;;  %v7858_v31 = vpop.f32.mrb[53].mxu1  ;;  %v7879_v4 = vpop.f32.mrb[83].mxu0  ;;  %8152 = vmatprep.subr.bf16.mxu0 %v8533_v25 }
 0x466   : > { %8131 = vmatpush3.bf16.msra.mxu1 %v8518_v14  ;;  %v4884_v37 = vpop.f32.mrb[54].mxu1 }
 0x467   : > { %v7859_v20 = vpop.f32.mrb[55].mxu1  ;;  %8132 = vmatprep.subr.bf16.mxu1 %v8533_v25 }
 0x468   : > { %8153 = vmatpush3.bf16.msra.mxu0 %v8519_v13 }
 0x469   : > { %8154 = vmatprep.subr.bf16.mxu0 %v8533_v25 }
 0x46a   : > { %8133 = vmatpush3.bf16.msra.mxu1 %v8520_v45 }
 0x46b   : > { %8134 = vmatprep.subr.bf16.mxu1 %v8533_v25 }
 0x46c   : > { %8155 = vmatpush3.bf16.msra.mxu0 %v8521_v19  ;;  %v6476_v19 = vlaneseq }
 0x46e   : > { %8135 = vmatpush3.bf16.msra.mxu1 %v8522_v42 }
 0x46f   : > { %8157 = vmatmul.mubr.bf16.vlgmr.msra.gmra.mrb[108].mxu0 %v6383_v51 }
 0x471   : > { %8137 = vmatmul.mubr.bf16.vlgmr.msra.gmra.mrb[80].mxu1 %v6276_v9  ;;  %v6477_v9 = vshrl.u32 %v6476_v19, 7 }
 0x482   : > { %v5183_v62 = vpop.f32.mrb[84].mxu0 }
 0x483   : > { %v7918_v15 = vpop.f32.mrb[85].mxu0 }
 0x484   : > { %v5076_v11 = vpop.f32.mrb[56].mxu1  ;;  %v5186_v30 = vpop.f32.mrb[86].mxu0 }
 0x485   : > { %v5082_v0 = vadd.f32 %v5076_v11, %v4970_v28  ;;  %v7898_v35 = vpop.f32.mrb[57].mxu1  ;;  %v7919_v55 = vpop.f32.mrb[87].mxu0 }
 0x486   : > { %v5079_v47 = vpop.f32.mrb[58].mxu1  ;;  %v6474_v35 = vld [vmem:[%s10736_s6] sm:$0x1] }
 0x487   : > { %v7899_v50 = vpop.f32.mrb[59].mxu1  ;;  %v5189_v27 = vadd.f32 %v5183_v62, %v5082_v0 }
 0x488   : > { %v6478_v50 = vsub.s32 0, %v6477_v9 }
 0x4a2   : > { %v5397_v7 = vpop.f32.mrb[88].mxu0 }
 0x4a3   : > { %v7958_v25 = vpop.f32.mrb[89].mxu0 }
 0x4a4   : > { %v5290_v24 = vpop.f32.mrb[60].mxu1  ;;  %v5400_v22 = vpop.f32.mrb[90].mxu0 }
 0x4a5   : > { %v5296_v39 = vadd.f32 %v5290_v24, %v5189_v27  ;;  %v7938_v1 = vpop.f32.mrb[61].mxu1  ;;  %v7959_v21 = vpop.f32.mrb[91].mxu0 }
 0x4a6   : > { %v5293_v8 = vpop.f32.mrb[62].mxu1 }
 0x4a7   : > { %v7939_v23 = vpop.f32.mrb[63].mxu1  ;;  %v5403_v59 = vadd.f32 %v5397_v7, %v5296_v39 }
 0x4c2   : > { %v5611_v29 = vpop.f32.mrb[92].mxu0 }
 0x4c3   : > { %v7998_v54 = vpop.f32.mrb[93].mxu0 }
 0x4c4   : > { %v5504_v6 = vpop.f32.mrb[64].mxu1  ;;  %v5614_v36 = vpop.f32.mrb[94].mxu0 }
 0x4c5   : > { %v5510_v3 = vadd.f32 %v5504_v6, %v5403_v59  ;;  %v7978_v17 = vpop.f32.mrb[65].mxu1  ;;  %v7999_v56 = vpop.f32.mrb[95].mxu0 }
 0x4c6   : > { %v5507_v61 = vpop.f32.mrb[66].mxu1 }
 0x4c7   : > { %v7979_v2 = vpop.f32.mrb[67].mxu1  ;;  %v5617_v41 = vadd.f32 %v5611_v29, %v5510_v3 }
 0x4e2   : > { %v5825_v38 = vpop.f32.mrb[96].mxu0 }
 0x4e3   : > { %v8038_v44 = vpop.f32.mrb[97].mxu0 }
 0x4e4   : > { %v5718_v43 = vpop.f32.mrb[68].mxu1  ;;  %v5828_v48 = vpop.f32.mrb[98].mxu0 }
 0x4e5   : > { %v5724_v26 = vadd.f32 %v5718_v43, %v5617_v41  ;;  %v8018_v58 = vpop.f32.mrb[69].mxu1  ;;  %v8039_v12 = vpop.f32.mrb[99].mxu0 }
 0x4e6   : > { %v5721_v16 = vpop.f32.mrb[70].mxu1 }
 0x4e7   : > { %v8019_v49 = vpop.f32.mrb[71].mxu1  ;;  %v5831_v57 = vadd.f32 %v5825_v38, %v5724_v26 }
 0x502   : > { %v6039_v52 = vpop.f32.mrb[100].mxu0 }
 0x503   : > { %v8078_v18 = vpop.f32.mrb[101].mxu0 }
 0x504   : > { %v5932_v60 = vpop.f32.mrb[72].mxu1  ;;  %v6042_v34 = vpop.f32.mrb[102].mxu0 }
 0x505   : > { %v5938_v33 = vadd.f32 %v5932_v60, %v5831_v57  ;;  %v8058_v63 = vpop.f32.mrb[73].mxu1  ;;  %v8079_v5 = vpop.f32.mrb[103].mxu0 }
 0x506   : > { %v5935_v46 = vpop.f32.mrb[74].mxu1 }
 0x507   : > { %v8059_v10 = vpop.f32.mrb[75].mxu1  ;;  %v6045_v14 = vadd.f32 %v6039_v52, %v5938_v33 }
 0x522   : > { %v6253_v53 = vpop.f32.mrb[104].mxu0 }
 0x523   : > { %v8118_v40 = vpop.f32.mrb[105].mxu0 }
 0x524   : > { %v6146_v32 = vpop.f32.mrb[76].mxu1  ;;  %v6256_v13 = vpop.f32.mrb[106].mxu0 }
 0x525   : > { %v6152_v28 = vadd.f32 %v6146_v32, %v6045_v14  ;;  %v8098_v31 = vpop.f32.mrb[77].mxu1  ;;  %v8119_v4 = vpop.f32.mrb[107].mxu0 }
 0x526   : > { %v6149_v37 = vpop.f32.mrb[78].mxu1 }
 0x527   : > { %v8099_v45 = vpop.f32.mrb[79].mxu1  ;;  %v6259_v20 = vadd.f32 %v6253_v53, %v6152_v28 }
 0x542   : > { %v6467_v42 = vpop.f32.mrb[108].mxu0 }
 0x543   : > { %v8158_v51 = vpop.f32.mrb[109].mxu0 }
 0x544   : > { %v6360_v62 = vpop.f32.mrb[80].mxu1  ;;  %v6470_v15 = vpop.f32.mrb[110].mxu0 }
 0x545   : > { %v6366_v11 = vadd.f32 %v6360_v62, %v6259_v20  ;;  %v8138_v30 = vpop.f32.mrb[81].mxu1  ;;  %v8159_v0 = vpop.f32.mrb[111].mxu0 }
 0x546   : > { %v6363_v55 = vpop.f32.mrb[82].mxu1 }
 0x547   : > { %v6473_v47 = vadd.f32 %v6467_v42, %v6366_v11  ;;  %v8139_v27 = vpop.f32.mrb[83].mxu1 }
 0x549   : > { %v6475_v7 = vadd.f32 %v6474_v35, %v6473_v47 }
 0x54b   : > { %v6479_v25 = vrot.slane %v6475_v7, %v6478_v50 }
 0x54d   : > { %6480 = vst [vmem:[%s276_s18] sm:$0xff] %v6479_v25 }
 0x54e PF: > { %s17_s24 = sadd.s32 1, %s8530_s24  }
 0x54f   : > { %p14_p4 = scmp.ge.s32.totalorder %s17_s24, 4  }
 0x551   :  { %16 = sbr.rel (!%p14_p4) target bundleno = 1 (0x1), region = 78 }

</bundles_post_ra>
